<compile_context>
chip_gen: v7x
topology: tpu7x:2x2x1
jax: 0.10.0
libtpu: 0.0.40
codegen_flags: <defaults>
</compile_context>

<pallas_src>
import jax
import jax.numpy as jnp
from jax.experimental import pallas as pl
from jax.experimental.pallas import tpu as pltpu


# ----------------------------------------------------------------------------- kernel
def lstm_kernel(x_ref,        # (Bblk, T)    f32  lane-dense input (input_size == 1)
                w_x0_ref,     # (1, 4Hp)     f32  layer-0 input->gates
                b0_ref,       # (1, 4Hp)     f32  layer-0 bias (b_ih + b_hh folded)
                w_h0_ref,     # (Hp, 4Hp)    f32  layer-0 hidden->gates
                w_ih1_ref,    # (Hp, 4Hp)    f32  layer-1 input(=h0)->gates
                w_hh1_ref,    # (Hp, 4Hp)    f32  layer-1 hidden->gates
                b1_ref,       # (1, 4Hp)     f32
                w_fc_ref,     # (1, Hp)      f32
                b_fc_ref,     # (1, 1)       f32
                out_ref):     # (Bblk, 1)    f32
    Bblk, T = x_ref.shape
    Hp4 = w_x0_ref.shape[1]
    Hp = Hp4 // 4

    # Hoist bias broadcasts out of the unrolled loop (broadcast_in_dim is not CSE'd).
    b0_b = jnp.broadcast_to(b0_ref[...], (Bblk, Hp4))
    b1_b = jnp.broadcast_to(b1_ref[...], (Bblk, Hp4))

    def cell(gates, c_prev):
        # Gate order (i, f, o, g); each Hp block is a full 128-lane-aligned slab, so
        # every slice below is whole-vreg: one wide sigmoid + one tanh, no masks.
        ifo = jax.nn.sigmoid(gates[:, :3 * Hp])
        g = jnp.tanh(gates[:, 3 * Hp:])
        i, f, o = ifo[:, :Hp], ifo[:, Hp:2 * Hp], ifo[:, 2 * Hp:]
        c = f * c_prev + i * g
        h = o * jnp.tanh(c)
        return h, c

    # Zero-init hidden/cell state (PyTorch default when h0/c0 not given).
    zeros = jnp.zeros((Bblk, Hp), jnp.float32)
    h0, c0, h1, c1 = zeros, zeros, zeros, zeros

    # Static unroll over T (small, trace-time constant); state is carried in
    # registers only -- no VMEM store->load on the serial dependency chain.
    for t in range(T):
        # Layer-0 input projection: input_size == 1 -> VPU outer product.  It has
        # no recurrent dependency, so the scheduler overlaps it with the chain.
        xg0_t = x_ref[:, t:t + 1] * w_x0_ref[...] + b0_b          # (Bblk, 4Hp)
        gates0 = xg0_t + jnp.dot(h0, w_h0_ref[...],
                                 preferred_element_type=jnp.float32)
        h0, c0 = cell(gates0, c0)

        # Layer 1: two dots instead of a VMEM concat round-trip.
        # TODO(synk): inter-layer dropout is training-only; inference path omits it.
        gates1 = (jnp.dot(h0, w_ih1_ref[...], preferred_element_type=jnp.float32)
                  + jnp.dot(h1, w_hh1_ref[...], preferred_element_type=jnp.float32)
                  + b1_b)
        h1, c1 = cell(gates1, c1)

    # fc + sigmoid on the last step's top-layer hidden state: VPU multiply + lane
    # reduction (avoids a 1-column MXU pass; MXU is idle at the epilogue anyway).
    logits = jnp.sum(h1 * w_fc_ref[...], axis=-1, keepdims=True) + b_fc_ref[...]
    out_ref[...] = jax.nn.sigmoid(logits)


# ----------------------------------------------------------------------------- wrapper
def lstm_model_forward(x, params, *, batch_block=None):
    """x: (B, T, 1) f32 -> (B, 1) f32 sigmoid output (regression=False path)."""
    B, T, I = x.shape
    assert I == 1, "kernel specialised to input_size=1 (module default)"
    # TODO(synk): general input_size > 1 needs a real (B, I) @ (I, 4Hp) projection.

    Hp4 = params["w_x0"].shape[1]

    if batch_block is None:
        batch_block = B            # single program; on v7x pass B//2 (multiple of 8)
    assert B % batch_block == 0 and (batch_block == B or batch_block % 8 == 0)
    grid = (B // batch_block,)

    x_bt = x.reshape(B, T)         # lane-dense: one (8,128)-padded tile per block

    def full(a):                   # whole-array block, same tile every grid step
        return pl.BlockSpec(a.shape, lambda b: (0,) * a.ndim)

    # TODO(synk): for large H, set vmem_limit_bytes (v7x: 64 MiB phys / 32 MiB scoped)
    # and stream x over a T grid; at H=64 total VMEM here is < 1 MiB.
    return pl.pallas_call(
        lstm_kernel,
        out_shape=jax.ShapeDtypeStruct((B, 1), jnp.float32),
        grid=grid,
        in_specs=[
            pl.BlockSpec((batch_block, T), lambda b: (b, 0)),      # x
            full(params["w_x0"]), full(params["b0"]), full(params["w_h0"]),
            full(params["w_ih1"]), full(params["w_hh1"]), full(params["b1"]),
            full(params["w_fc"]), full(params["b_fc"]),
        ],
        out_specs=pl.BlockSpec((batch_block, 1), lambda b: (b, 0)),
        compiler_params=pltpu.CompilerParams(
            dimension_semantics=("parallel",)),                    # v7x: 2nd TC
    )(x_bt,
      params["w_x0"], params["b0"], params["w_h0"],
      params["w_ih1"], params["w_hh1"], params["b1"],
      params["w_fc"], params["b_fc"])


# ----------------------------------------------------------------------------- params
def init_torch_like_params(key, input_size=1, hidden_size=64):
    """Random params in PyTorch's native nn.LSTM / nn.Linear layout."""
    H, I = hidden_size, input_size
    ks = jax.random.split(key, 10)
    s = 1.0 / (H ** 0.5)
    u = lambda k, shape: jax.random.uniform(k, shape, jnp.float32, -s, s)
    return {
        "weight_ih_l0": u(ks[0], (4 * H, I)),
        "weight_hh_l0": u(ks[1], (4 * H, H)),
        "bias_ih_l0":   u(ks[2], (4 * H,)),
        "bias_hh_l0":   u(ks[3], (4 * H,)),
        "weight_ih_l1": u(ks[4], (4 * H, H)),
        "weight_hh_l1": u(ks[5], (4 * H, H)),
        "bias_ih_l1":   u(ks[6], (4 * H,)),
        "bias_hh_l1":   u(ks[7], (4 * H,)),
        "fc_weight":    u(ks[8], (1, H)),
        "fc_bias":      u(ks[9], (1,)),
    }


def pack_params(pt, hidden_size=64, lane_pad=128):
    """PyTorch layout -> kernel layout.

    The conversion a checkpoint loader must perform:
      * transpose weights so the contraction dim leads: (4H, K) -> (K, 4H)
      * reorder gates along the 4H axis from PyTorch (i, f, g, o) to (i, f, o, g)
      * fold b_ih + b_hh into a single bias
      * zero-pad each per-gate block H -> Hp (multiple of 128 lanes) and the hidden
        contraction dim H -> Hp.  Exact: padded h/c lanes stay 0 for every step.
    """
    H = hidden_size
    Hp = ((H + lane_pad - 1) // lane_pad) * lane_pad

    def gates_last(w):                        # w: (K, 4H), PyTorch order (i,f,g,o)
        i, f, g, o = (w[:, k * H:(k + 1) * H] for k in range(4))
        pad = lambda t: jnp.pad(t, ((0, 0), (0, Hp - H)))
        return jnp.concatenate([pad(i), pad(f), pad(o), pad(g)], axis=1)

    def pad_rows(w):                          # (H, 4Hp) -> (Hp, 4Hp)
        return jnp.pad(w, ((0, Hp - H), (0, 0)))

    b0 = (pt["bias_ih_l0"] + pt["bias_hh_l0"])[None, :]
    b1 = (pt["bias_ih_l1"] + pt["bias_hh_l1"])[None, :]
    return {
        "w_x0":  gates_last(pt["weight_ih_l0"].T),                 # (I, 4Hp)
        "b0":    gates_last(b0),                                   # (1, 4Hp)
        "w_h0":  pad_rows(gates_last(pt["weight_hh_l0"].T)),       # (Hp, 4Hp)
        "w_ih1": pad_rows(gates_last(pt["weight_ih_l1"].T)),       # (Hp, 4Hp)
        "w_hh1": pad_rows(gates_last(pt["weight_hh_l1"].T)),       # (Hp, 4Hp)
        "b1":    gates_last(b1),                                   # (1, 4Hp)
        "w_fc":  jnp.pad(pt["fc_weight"], ((0, 0), (0, Hp - H))),  # (1, Hp)
        "b_fc":  pt["fc_bias"][None, :],                           # (1, 1)
    }


# ----------------------------------------------------------------------------- reference
def lstm_reference(x, pt, hidden_size=64):
    """Pure-JAX f32 reference in PyTorch layout (inference: dropout = identity)."""
    B, T, _ = x.shape
    H = hidden_size

    def cell(x_t, h, c, w_ih, w_hh, b_ih, b_hh):
        gates = x_t @ w_ih.T + h @ w_hh.T + b_ih + b_hh
        i, f, g, o = (gates[:, k * H:(k + 1) * H] for k in range(4))
        i, f, o = jax.nn.sigmoid(i), jax.nn.sigmoid(f), jax.nn.sigmoid(o)
        g = jnp.tanh(g)
        c = f * c + i * g
        return o * jnp.tanh(c), c

    h0 = c0 = h1 = c1 = jnp.zeros((B, H), jnp.float32)
    for t in range(T):
        h0, c0 = cell(x[:, t, :], h0, c0, pt["weight_ih_l0"], pt["weight_hh_l0"],
                      pt["bias_ih_l0"], pt["bias_hh_l0"])
        h1, c1 = cell(h0, h1, c1, pt["weight_ih_l1"], pt["weight_hh_l1"],
                      pt["bias_ih_l1"], pt["bias_hh_l1"])
    return jax.nn.sigmoid(h1 @ pt["fc_weight"].T + pt["fc_bias"])


# ----------------------------------------------------------------------------- demo
if __name__ == "__main__":
    key = jax.random.PRNGKey(0)
    k_param, k_x = jax.random.split(key)

    B, T, I, H = 8, 8, 1, 64          # B multiple of 8 to fill vreg sublanes
    pt_params = init_torch_like_params(k_param, input_size=I, hidden_size=H)
    params = pack_params(pt_params, hidden_size=H)
    x = jax.random.normal(k_x, (B, T, I), jnp.float32)

    out = lstm_model_forward(x, params)
    out = jax.block_until_ready(out)

    assert out.shape == (B, 1)
    assert bool(jnp.all(jnp.isfinite(out)))
    ref = lstm_reference(x, pt_params, hidden_size=H)
    assert bool(jnp.allclose(out, ref, atol=2e-2)), (out, ref)
    print("KERNEL_OK")
</pallas_src>

<mosaic_0001>
module attributes {stable_mosaic.version = 11 : i64} {
  func.func @lstm_kernel(%arg0: i32, %arg1: memref<8x8xf32, #tpu.memory_space<vmem>>, %arg2: memref<1x512xf32, #tpu.memory_space<vmem>>, %arg3: memref<1x512xf32, #tpu.memory_space<vmem>>, %arg4: memref<128x512xf32, #tpu.memory_space<vmem>>, %arg5: memref<128x512xf32, #tpu.memory_space<vmem>>, %arg6: memref<128x512xf32, #tpu.memory_space<vmem>>, %arg7: memref<1x512xf32, #tpu.memory_space<vmem>>, %arg8: memref<1x128xf32, #tpu.memory_space<vmem>>, %arg9: memref<1x1xf32, #tpu.memory_space<vmem>>, %arg10: memref<8x1xf32, #tpu.memory_space<vmem>>) attributes {dimension_semantics = [#tpu.dimension_semantics<parallel>], iteration_bounds = array<i64: 1>, scalar_prefetch = 0 : i64, scratch_operands = 0 : i64, tpu.core_type = #tpu.core_type<tc>, window_params = [{transform_indices = @transform_0, window_bounds = array<i64: 8, 8>}, {pipeline_mode = #tpu.pipeline_mode<synchronous>, transform_indices = @transform_1, window_bounds = array<i64: 1, 512>}, {pipeline_mode = #tpu.pipeline_mode<synchronous>, transform_indices = @transform_2, window_bounds = array<i64: 1, 512>}, {pipeline_mode = #tpu.pipeline_mode<synchronous>, transform_indices = @transform_3, window_bounds = array<i64: 128, 512>}, {pipeline_mode = #tpu.pipeline_mode<synchronous>, transform_indices = @transform_4, window_bounds = array<i64: 128, 512>}, {pipeline_mode = #tpu.pipeline_mode<synchronous>, transform_indices = @transform_5, window_bounds = array<i64: 128, 512>}, {pipeline_mode = #tpu.pipeline_mode<synchronous>, transform_indices = @transform_6, window_bounds = array<i64: 1, 512>}, {pipeline_mode = #tpu.pipeline_mode<synchronous>, transform_indices = @transform_7, window_bounds = array<i64: 1, 128>}, {pipeline_mode = #tpu.pipeline_mode<synchronous>, transform_indices = @transform_8, window_bounds = array<i64: 1, 1>}, {transform_indices = @transform_9, window_bounds = array<i64: 8, 1>}]} {
    %c0 = arith.constant 0 : index
    %c0_0 = arith.constant 0 : index
    %0 = vector.load %arg3[%c0, %c0_0] : memref<1x512xf32, #tpu.memory_space<vmem>>, vector<1x512xf32>
    %1 = vector.shape_cast %0 : vector<1x512xf32> to vector<1x512xf32>
    %2 = vector.broadcast %1 : vector<1x512xf32> to vector<8x512xf32>
    %c0_1 = arith.constant 0 : index
    %c0_2 = arith.constant 0 : index
    %3 = vector.load %arg7[%c0_1, %c0_2] : memref<1x512xf32, #tpu.memory_space<vmem>>, vector<1x512xf32>
    %4 = vector.shape_cast %3 : vector<1x512xf32> to vector<1x512xf32>
    %5 = vector.broadcast %4 : vector<1x512xf32> to vector<8x512xf32>
    %cst = arith.constant 0.000000e+00 : f32
    %6 = vector.broadcast %cst : f32 to vector<8x128xf32>
    %c0_3 = arith.constant 0 : index
    %c0_4 = arith.constant 0 : index
    %7 = vector.load %arg1[%c0_3, %c0_4] : memref<8x8xf32, #tpu.memory_space<vmem>>, vector<8x1xf32>
    %c0_5 = arith.constant 0 : index
    %c0_6 = arith.constant 0 : index
    %8 = vector.load %arg2[%c0_5, %c0_6] : memref<1x512xf32, #tpu.memory_space<vmem>>, vector<1x512xf32>
    %9 = vector.broadcast %7 : vector<8x1xf32> to vector<8x512xf32>
    %10 = vector.broadcast %8 : vector<1x512xf32> to vector<8x512xf32>
    %11 = arith.mulf %9, %10 : vector<8x512xf32>
    %12 = arith.addf %11, %2 : vector<8x512xf32>
    %c0_7 = arith.constant 0 : index
    %c0_8 = arith.constant 0 : index
    %13 = vector.load %arg4[%c0_7, %c0_8] : memref<128x512xf32, #tpu.memory_space<vmem>>, vector<128x512xf32>
    %cst_9 = arith.constant dense<0.000000e+00> : vector<8x512xf32>
    %14 = tpu.matmul %6, %13, %cst_9 {dimension_numbers = #tpu.dot_dimension_numbers<[1], [0], [0], [1], [0, 0, 1, 1], [], []>} : vector<8x128xf32>, vector<128x512xf32>, vector<8x512xf32> -> vector<8x512xf32>
    %15 = arith.addf %12, %14 : vector<8x512xf32>
    %16 = vector.extract_strided_slice %15 {offsets = [0, 0], sizes = [8, 384], strides = [1, 1]} : vector<8x512xf32> to vector<8x384xf32>
    %17 = arith.negf %16 : vector<8x384xf32>
    %18 = math.exp %17 : vector<8x384xf32>
    %cst_10 = arith.constant 1.000000e+00 : f32
    %19 = vector.broadcast %cst_10 : f32 to vector<8x384xf32>
    %20 = arith.addf %19, %18 : vector<8x384xf32>
    %21 = arith.divf %19, %20 : vector<8x384xf32>
    %22 = vector.extract_strided_slice %15 {offsets = [0, 384], sizes = [8, 128], strides = [1, 1]} : vector<8x512xf32> to vector<8x128xf32>
    %23 = math.tanh %22 : vector<8x128xf32>
    %24 = vector.extract_strided_slice %21 {offsets = [0, 0], sizes = [8, 128], strides = [1, 1]} : vector<8x384xf32> to vector<8x128xf32>
    %25 = vector.extract_strided_slice %21 {offsets = [0, 128], sizes = [8, 128], strides = [1, 1]} : vector<8x384xf32> to vector<8x128xf32>
    %26 = vector.extract_strided_slice %21 {offsets = [0, 256], sizes = [8, 128], strides = [1, 1]} : vector<8x384xf32> to vector<8x128xf32>
    %27 = arith.mulf %25, %6 : vector<8x128xf32>
    %28 = arith.mulf %24, %23 : vector<8x128xf32>
    %29 = arith.addf %27, %28 : vector<8x128xf32>
    %30 = math.tanh %29 : vector<8x128xf32>
    %31 = arith.mulf %26, %30 : vector<8x128xf32>
    %c0_11 = arith.constant 0 : index
    %c0_12 = arith.constant 0 : index
    %32 = vector.load %arg5[%c0_11, %c0_12] : memref<128x512xf32, #tpu.memory_space<vmem>>, vector<128x512xf32>
    %cst_13 = arith.constant dense<0.000000e+00> : vector<8x512xf32>
    %33 = tpu.matmul %31, %32, %cst_13 {dimension_numbers = #tpu.dot_dimension_numbers<[1], [0], [0], [1], [0, 0, 1, 1], [], []>} : vector<8x128xf32>, vector<128x512xf32>, vector<8x512xf32> -> vector<8x512xf32>
    %c0_14 = arith.constant 0 : index
    %c0_15 = arith.constant 0 : index
    %34 = vector.load %arg6[%c0_14, %c0_15] : memref<128x512xf32, #tpu.memory_space<vmem>>, vector<128x512xf32>
    %cst_16 = arith.constant dense<0.000000e+00> : vector<8x512xf32>
    %35 = tpu.matmul %6, %34, %cst_16 {dimension_numbers = #tpu.dot_dimension_numbers<[1], [0], [0], [1], [0, 0, 1, 1], [], []>} : vector<8x128xf32>, vector<128x512xf32>, vector<8x512xf32> -> vector<8x512xf32>
    %36 = arith.addf %33, %35 : vector<8x512xf32>
    %37 = arith.addf %36, %5 : vector<8x512xf32>
    %38 = vector.extract_strided_slice %37 {offsets = [0, 0], sizes = [8, 384], strides = [1, 1]} : vector<8x512xf32> to vector<8x384xf32>
    %39 = arith.negf %38 : vector<8x384xf32>
    %40 = math.exp %39 : vector<8x384xf32>
    %cst_17 = arith.constant 1.000000e+00 : f32
    %41 = vector.broadcast %cst_17 : f32 to vector<8x384xf32>
    %42 = arith.addf %41, %40 : vector<8x384xf32>
    %43 = arith.divf %41, %42 : vector<8x384xf32>
    %44 = vector.extract_strided_slice %37 {offsets = [0, 384], sizes = [8, 128], strides = [1, 1]} : vector<8x512xf32> to vector<8x128xf32>
    %45 = math.tanh %44 : vector<8x128xf32>
    %46 = vector.extract_strided_slice %43 {offsets = [0, 0], sizes = [8, 128], strides = [1, 1]} : vector<8x384xf32> to vector<8x128xf32>
    %47 = vector.extract_strided_slice %43 {offsets = [0, 128], sizes = [8, 128], strides = [1, 1]} : vector<8x384xf32> to vector<8x128xf32>
    %48 = vector.extract_strided_slice %43 {offsets = [0, 256], sizes = [8, 128], strides = [1, 1]} : vector<8x384xf32> to vector<8x128xf32>
    %49 = arith.mulf %47, %6 : vector<8x128xf32>
    %50 = arith.mulf %46, %45 : vector<8x128xf32>
    %51 = arith.addf %49, %50 : vector<8x128xf32>
    %52 = math.tanh %51 : vector<8x128xf32>
    %53 = arith.mulf %48, %52 : vector<8x128xf32>
    %c0_18 = arith.constant 0 : index
    %c1 = arith.constant 1 : index
    %54 = vector.load %arg1[%c0_18, %c1] : memref<8x8xf32, #tpu.memory_space<vmem>>, vector<8x1xf32>
    %c0_19 = arith.constant 0 : index
    %c0_20 = arith.constant 0 : index
    %55 = vector.load %arg2[%c0_19, %c0_20] : memref<1x512xf32, #tpu.memory_space<vmem>>, vector<1x512xf32>
    %56 = vector.broadcast %54 : vector<8x1xf32> to vector<8x512xf32>
    %57 = vector.broadcast %55 : vector<1x512xf32> to vector<8x512xf32>
    %58 = arith.mulf %56, %57 : vector<8x512xf32>
    %59 = arith.addf %58, %2 : vector<8x512xf32>
    %c0_21 = arith.constant 0 : index
    %c0_22 = arith.constant 0 : index
    %60 = vector.load %arg4[%c0_21, %c0_22] : memref<128x512xf32, #tpu.memory_space<vmem>>, vector<128x512xf32>
    %cst_23 = arith.constant dense<0.000000e+00> : vector<8x512xf32>
    %61 = tpu.matmul %31, %60, %cst_23 {dimension_numbers = #tpu.dot_dimension_numbers<[1], [0], [0], [1], [0, 0, 1, 1], [], []>} : vector<8x128xf32>, vector<128x512xf32>, vector<8x512xf32> -> vector<8x512xf32>
    %62 = arith.addf %59, %61 : vector<8x512xf32>
    %63 = vector.extract_strided_slice %62 {offsets = [0, 0], sizes = [8, 384], strides = [1, 1]} : vector<8x512xf32> to vector<8x384xf32>
    %64 = arith.negf %63 : vector<8x384xf32>
    %65 = math.exp %64 : vector<8x384xf32>
    %cst_24 = arith.constant 1.000000e+00 : f32
    %66 = vector.broadcast %cst_24 : f32 to vector<8x384xf32>
    %67 = arith.addf %66, %65 : vector<8x384xf32>
    %68 = arith.divf %66, %67 : vector<8x384xf32>
    %69 = vector.extract_strided_slice %62 {offsets = [0, 384], sizes = [8, 128], strides = [1, 1]} : vector<8x512xf32> to vector<8x128xf32>
    %70 = math.tanh %69 : vector<8x128xf32>
    %71 = vector.extract_strided_slice %68 {offsets = [0, 0], sizes = [8, 128], strides = [1, 1]} : vector<8x384xf32> to vector<8x128xf32>
    %72 = vector.extract_strided_slice %68 {offsets = [0, 128], sizes = [8, 128], strides = [1, 1]} : vector<8x384xf32> to vector<8x128xf32>
    %73 = vector.extract_strided_slice %68 {offsets = [0, 256], sizes = [8, 128], strides = [1, 1]} : vector<8x384xf32> to vector<8x128xf32>
    %74 = arith.mulf %72, %29 : vector<8x128xf32>
    %75 = arith.mulf %71, %70 : vector<8x128xf32>
    %76 = arith.addf %74, %75 : vector<8x128xf32>
    %77 = math.tanh %76 : vector<8x128xf32>
    %78 = arith.mulf %73, %77 : vector<8x128xf32>
    %c0_25 = arith.constant 0 : index
    %c0_26 = arith.constant 0 : index
    %79 = vector.load %arg5[%c0_25, %c0_26] : memref<128x512xf32, #tpu.memory_space<vmem>>, vector<128x512xf32>
    %cst_27 = arith.constant dense<0.000000e+00> : vector<8x512xf32>
    %80 = tpu.matmul %78, %79, %cst_27 {dimension_numbers = #tpu.dot_dimension_numbers<[1], [0], [0], [1], [0, 0, 1, 1], [], []>} : vector<8x128xf32>, vector<128x512xf32>, vector<8x512xf32> -> vector<8x512xf32>
    %c0_28 = arith.constant 0 : index
    %c0_29 = arith.constant 0 : index
    %81 = vector.load %arg6[%c0_28, %c0_29] : memref<128x512xf32, #tpu.memory_space<vmem>>, vector<128x512xf32>
    %cst_30 = arith.constant dense<0.000000e+00> : vector<8x512xf32>
    %82 = tpu.matmul %53, %81, %cst_30 {dimension_numbers = #tpu.dot_dimension_numbers<[1], [0], [0], [1], [0, 0, 1, 1], [], []>} : vector<8x128xf32>, vector<128x512xf32>, vector<8x512xf32> -> vector<8x512xf32>
    %83 = arith.addf %80, %82 : vector<8x512xf32>
    %84 = arith.addf %83, %5 : vector<8x512xf32>
    %85 = vector.extract_strided_slice %84 {offsets = [0, 0], sizes = [8, 384], strides = [1, 1]} : vector<8x512xf32> to vector<8x384xf32>
    %86 = arith.negf %85 : vector<8x384xf32>
    %87 = math.exp %86 : vector<8x384xf32>
    %cst_31 = arith.constant 1.000000e+00 : f32
    %88 = vector.broadcast %cst_31 : f32 to vector<8x384xf32>
    %89 = arith.addf %88, %87 : vector<8x384xf32>
    %90 = arith.divf %88, %89 : vector<8x384xf32>
    %91 = vector.extract_strided_slice %84 {offsets = [0, 384], sizes = [8, 128], strides = [1, 1]} : vector<8x512xf32> to vector<8x128xf32>
    %92 = math.tanh %91 : vector<8x128xf32>
    %93 = vector.extract_strided_slice %90 {offsets = [0, 0], sizes = [8, 128], strides = [1, 1]} : vector<8x384xf32> to vector<8x128xf32>
    %94 = vector.extract_strided_slice %90 {offsets = [0, 128], sizes = [8, 128], strides = [1, 1]} : vector<8x384xf32> to vector<8x128xf32>
    %95 = vector.extract_strided_slice %90 {offsets = [0, 256], sizes = [8, 128], strides = [1, 1]} : vector<8x384xf32> to vector<8x128xf32>
    %96 = arith.mulf %94, %51 : vector<8x128xf32>
    %97 = arith.mulf %93, %92 : vector<8x128xf32>
    %98 = arith.addf %96, %97 : vector<8x128xf32>
    %99 = math.tanh %98 : vector<8x128xf32>
    %100 = arith.mulf %95, %99 : vector<8x128xf32>
    %c0_32 = arith.constant 0 : index
    %c2 = arith.constant 2 : index
    %101 = vector.load %arg1[%c0_32, %c2] : memref<8x8xf32, #tpu.memory_space<vmem>>, vector<8x1xf32>
    %c0_33 = arith.constant 0 : index
    %c0_34 = arith.constant 0 : index
    %102 = vector.load %arg2[%c0_33, %c0_34] : memref<1x512xf32, #tpu.memory_space<vmem>>, vector<1x512xf32>
    %103 = vector.broadcast %101 : vector<8x1xf32> to vector<8x512xf32>
    %104 = vector.broadcast %102 : vector<1x512xf32> to vector<8x512xf32>
    %105 = arith.mulf %103, %104 : vector<8x512xf32>
    %106 = arith.addf %105, %2 : vector<8x512xf32>
    %c0_35 = arith.constant 0 : index
    %c0_36 = arith.constant 0 : index
    %107 = vector.load %arg4[%c0_35, %c0_36] : memref<128x512xf32, #tpu.memory_space<vmem>>, vector<128x512xf32>
    %cst_37 = arith.constant dense<0.000000e+00> : vector<8x512xf32>
    %108 = tpu.matmul %78, %107, %cst_37 {dimension_numbers = #tpu.dot_dimension_numbers<[1], [0], [0], [1], [0, 0, 1, 1], [], []>} : vector<8x128xf32>, vector<128x512xf32>, vector<8x512xf32> -> vector<8x512xf32>
    %109 = arith.addf %106, %108 : vector<8x512xf32>
    %110 = vector.extract_strided_slice %109 {offsets = [0, 0], sizes = [8, 384], strides = [1, 1]} : vector<8x512xf32> to vector<8x384xf32>
    %111 = arith.negf %110 : vector<8x384xf32>
    %112 = math.exp %111 : vector<8x384xf32>
    %cst_38 = arith.constant 1.000000e+00 : f32
    %113 = vector.broadcast %cst_38 : f32 to vector<8x384xf32>
    %114 = arith.addf %113, %112 : vector<8x384xf32>
    %115 = arith.divf %113, %114 : vector<8x384xf32>
    %116 = vector.extract_strided_slice %109 {offsets = [0, 384], sizes = [8, 128], strides = [1, 1]} : vector<8x512xf32> to vector<8x128xf32>
    %117 = math.tanh %116 : vector<8x128xf32>
    %118 = vector.extract_strided_slice %115 {offsets = [0, 0], sizes = [8, 128], strides = [1, 1]} : vector<8x384xf32> to vector<8x128xf32>
    %119 = vector.extract_strided_slice %115 {offsets = [0, 128], sizes = [8, 128], strides = [1, 1]} : vector<8x384xf32> to vector<8x128xf32>
    %120 = vector.extract_strided_slice %115 {offsets = [0, 256], sizes = [8, 128], strides = [1, 1]} : vector<8x384xf32> to vector<8x128xf32>
    %121 = arith.mulf %119, %76 : vector<8x128xf32>
    %122 = arith.mulf %118, %117 : vector<8x128xf32>
    %123 = arith.addf %121, %122 : vector<8x128xf32>
    %124 = math.tanh %123 : vector<8x128xf32>
    %125 = arith.mulf %120, %124 : vector<8x128xf32>
    %c0_39 = arith.constant 0 : index
    %c0_40 = arith.constant 0 : index
    %126 = vector.load %arg5[%c0_39, %c0_40] : memref<128x512xf32, #tpu.memory_space<vmem>>, vector<128x512xf32>
    %cst_41 = arith.constant dense<0.000000e+00> : vector<8x512xf32>
    %127 = tpu.matmul %125, %126, %cst_41 {dimension_numbers = #tpu.dot_dimension_numbers<[1], [0], [0], [1], [0, 0, 1, 1], [], []>} : vector<8x128xf32>, vector<128x512xf32>, vector<8x512xf32> -> vector<8x512xf32>
    %c0_42 = arith.constant 0 : index
    %c0_43 = arith.constant 0 : index
    %128 = vector.load %arg6[%c0_42, %c0_43] : memref<128x512xf32, #tpu.memory_space<vmem>>, vector<128x512xf32>
    %cst_44 = arith.constant dense<0.000000e+00> : vector<8x512xf32>
    %129 = tpu.matmul %100, %128, %cst_44 {dimension_numbers = #tpu.dot_dimension_numbers<[1], [0], [0], [1], [0, 0, 1, 1], [], []>} : vector<8x128xf32>, vector<128x512xf32>, vector<8x512xf32> -> vector<8x512xf32>
    %130 = arith.addf %127, %129 : vector<8x512xf32>
    %131 = arith.addf %130, %5 : vector<8x512xf32>
    %132 = vector.extract_strided_slice %131 {offsets = [0, 0], sizes = [8, 384], strides = [1, 1]} : vector<8x512xf32> to vector<8x384xf32>
    %133 = arith.negf %132 : vector<8x384xf32>
    %134 = math.exp %133 : vector<8x384xf32>
    %cst_45 = arith.constant 1.000000e+00 : f32
    %135 = vector.broadcast %cst_45 : f32 to vector<8x384xf32>
    %136 = arith.addf %135, %134 : vector<8x384xf32>
    %137 = arith.divf %135, %136 : vector<8x384xf32>
    %138 = vector.extract_strided_slice %131 {offsets = [0, 384], sizes = [8, 128], strides = [1, 1]} : vector<8x512xf32> to vector<8x128xf32>
    %139 = math.tanh %138 : vector<8x128xf32>
    %140 = vector.extract_strided_slice %137 {offsets = [0, 0], sizes = [8, 128], strides = [1, 1]} : vector<8x384xf32> to vector<8x128xf32>
    %141 = vector.extract_strided_slice %137 {offsets = [0, 128], sizes = [8, 128], strides = [1, 1]} : vector<8x384xf32> to vector<8x128xf32>
    %142 = vector.extract_strided_slice %137 {offsets = [0, 256], sizes = [8, 128], strides = [1, 1]} : vector<8x384xf32> to vector<8x128xf32>
    %143 = arith.mulf %141, %98 : vector<8x128xf32>
    %144 = arith.mulf %140, %139 : vector<8x128xf32>
    %145 = arith.addf %143, %144 : vector<8x128xf32>
    %146 = math.tanh %145 : vector<8x128xf32>
    %147 = arith.mulf %142, %146 : vector<8x128xf32>
    %c0_46 = arith.constant 0 : index
    %c3 = arith.constant 3 : index
    %148 = vector.load %arg1[%c0_46, %c3] : memref<8x8xf32, #tpu.memory_space<vmem>>, vector<8x1xf32>
    %c0_47 = arith.constant 0 : index
    %c0_48 = arith.constant 0 : index
    %149 = vector.load %arg2[%c0_47, %c0_48] : memref<1x512xf32, #tpu.memory_space<vmem>>, vector<1x512xf32>
    %150 = vector.broadcast %148 : vector<8x1xf32> to vector<8x512xf32>
    %151 = vector.broadcast %149 : vector<1x512xf32> to vector<8x512xf32>
    %152 = arith.mulf %150, %151 : vector<8x512xf32>
    %153 = arith.addf %152, %2 : vector<8x512xf32>
    %c0_49 = arith.constant 0 : index
    %c0_50 = arith.constant 0 : index
    %154 = vector.load %arg4[%c0_49, %c0_50] : memref<128x512xf32, #tpu.memory_space<vmem>>, vector<128x512xf32>
    %cst_51 = arith.constant dense<0.000000e+00> : vector<8x512xf32>
    %155 = tpu.matmul %125, %154, %cst_51 {dimension_numbers = #tpu.dot_dimension_numbers<[1], [0], [0], [1], [0, 0, 1, 1], [], []>} : vector<8x128xf32>, vector<128x512xf32>, vector<8x512xf32> -> vector<8x512xf32>
    %156 = arith.addf %153, %155 : vector<8x512xf32>
    %157 = vector.extract_strided_slice %156 {offsets = [0, 0], sizes = [8, 384], strides = [1, 1]} : vector<8x512xf32> to vector<8x384xf32>
    %158 = arith.negf %157 : vector<8x384xf32>
    %159 = math.exp %158 : vector<8x384xf32>
    %cst_52 = arith.constant 1.000000e+00 : f32
    %160 = vector.broadcast %cst_52 : f32 to vector<8x384xf32>
    %161 = arith.addf %160, %159 : vector<8x384xf32>
    %162 = arith.divf %160, %161 : vector<8x384xf32>
    %163 = vector.extract_strided_slice %156 {offsets = [0, 384], sizes = [8, 128], strides = [1, 1]} : vector<8x512xf32> to vector<8x128xf32>
    %164 = math.tanh %163 : vector<8x128xf32>
    %165 = vector.extract_strided_slice %162 {offsets = [0, 0], sizes = [8, 128], strides = [1, 1]} : vector<8x384xf32> to vector<8x128xf32>
    %166 = vector.extract_strided_slice %162 {offsets = [0, 128], sizes = [8, 128], strides = [1, 1]} : vector<8x384xf32> to vector<8x128xf32>
    %167 = vector.extract_strided_slice %162 {offsets = [0, 256], sizes = [8, 128], strides = [1, 1]} : vector<8x384xf32> to vector<8x128xf32>
    %168 = arith.mulf %166, %123 : vector<8x128xf32>
    %169 = arith.mulf %165, %164 : vector<8x128xf32>
    %170 = arith.addf %168, %169 : vector<8x128xf32>
    %171 = math.tanh %170 : vector<8x128xf32>
    %172 = arith.mulf %167, %171 : vector<8x128xf32>
    %c0_53 = arith.constant 0 : index
    %c0_54 = arith.constant 0 : index
    %173 = vector.load %arg5[%c0_53, %c0_54] : memref<128x512xf32, #tpu.memory_space<vmem>>, vector<128x512xf32>
    %cst_55 = arith.constant dense<0.000000e+00> : vector<8x512xf32>
    %174 = tpu.matmul %172, %173, %cst_55 {dimension_numbers = #tpu.dot_dimension_numbers<[1], [0], [0], [1], [0, 0, 1, 1], [], []>} : vector<8x128xf32>, vector<128x512xf32>, vector<8x512xf32> -> vector<8x512xf32>
    %c0_56 = arith.constant 0 : index
    %c0_57 = arith.constant 0 : index
    %175 = vector.load %arg6[%c0_56, %c0_57] : memref<128x512xf32, #tpu.memory_space<vmem>>, vector<128x512xf32>
    %cst_58 = arith.constant dense<0.000000e+00> : vector<8x512xf32>
    %176 = tpu.matmul %147, %175, %cst_58 {dimension_numbers = #tpu.dot_dimension_numbers<[1], [0], [0], [1], [0, 0, 1, 1], [], []>} : vector<8x128xf32>, vector<128x512xf32>, vector<8x512xf32> -> vector<8x512xf32>
    %177 = arith.addf %174, %176 : vector<8x512xf32>
    %178 = arith.addf %177, %5 : vector<8x512xf32>
    %179 = vector.extract_strided_slice %178 {offsets = [0, 0], sizes = [8, 384], strides = [1, 1]} : vector<8x512xf32> to vector<8x384xf32>
    %180 = arith.negf %179 : vector<8x384xf32>
    %181 = math.exp %180 : vector<8x384xf32>
    %cst_59 = arith.constant 1.000000e+00 : f32
    %182 = vector.broadcast %cst_59 : f32 to vector<8x384xf32>
    %183 = arith.addf %182, %181 : vector<8x384xf32>
    %184 = arith.divf %182, %183 : vector<8x384xf32>
    %185 = vector.extract_strided_slice %178 {offsets = [0, 384], sizes = [8, 128], strides = [1, 1]} : vector<8x512xf32> to vector<8x128xf32>
    %186 = math.tanh %185 : vector<8x128xf32>
    %187 = vector.extract_strided_slice %184 {offsets = [0, 0], sizes = [8, 128], strides = [1, 1]} : vector<8x384xf32> to vector<8x128xf32>
    %188 = vector.extract_strided_slice %184 {offsets = [0, 128], sizes = [8, 128], strides = [1, 1]} : vector<8x384xf32> to vector<8x128xf32>
    %189 = vector.extract_strided_slice %184 {offsets = [0, 256], sizes = [8, 128], strides = [1, 1]} : vector<8x384xf32> to vector<8x128xf32>
    %190 = arith.mulf %188, %145 : vector<8x128xf32>
    %191 = arith.mulf %187, %186 : vector<8x128xf32>
    %192 = arith.addf %190, %191 : vector<8x128xf32>
    %193 = math.tanh %192 : vector<8x128xf32>
    %194 = arith.mulf %189, %193 : vector<8x128xf32>
    %c0_60 = arith.constant 0 : index
    %c4 = arith.constant 4 : index
    %195 = vector.load %arg1[%c0_60, %c4] : memref<8x8xf32, #tpu.memory_space<vmem>>, vector<8x1xf32>
    %c0_61 = arith.constant 0 : index
    %c0_62 = arith.constant 0 : index
    %196 = vector.load %arg2[%c0_61, %c0_62] : memref<1x512xf32, #tpu.memory_space<vmem>>, vector<1x512xf32>
    %197 = vector.broadcast %195 : vector<8x1xf32> to vector<8x512xf32>
    %198 = vector.broadcast %196 : vector<1x512xf32> to vector<8x512xf32>
    %199 = arith.mulf %197, %198 : vector<8x512xf32>
    %200 = arith.addf %199, %2 : vector<8x512xf32>
    %c0_63 = arith.constant 0 : index
    %c0_64 = arith.constant 0 : index
    %201 = vector.load %arg4[%c0_63, %c0_64] : memref<128x512xf32, #tpu.memory_space<vmem>>, vector<128x512xf32>
    %cst_65 = arith.constant dense<0.000000e+00> : vector<8x512xf32>
    %202 = tpu.matmul %172, %201, %cst_65 {dimension_numbers = #tpu.dot_dimension_numbers<[1], [0], [0], [1], [0, 0, 1, 1], [], []>} : vector<8x128xf32>, vector<128x512xf32>, vector<8x512xf32> -> vector<8x512xf32>
    %203 = arith.addf %200, %202 : vector<8x512xf32>
    %204 = vector.extract_strided_slice %203 {offsets = [0, 0], sizes = [8, 384], strides = [1, 1]} : vector<8x512xf32> to vector<8x384xf32>
    %205 = arith.negf %204 : vector<8x384xf32>
    %206 = math.exp %205 : vector<8x384xf32>
    %cst_66 = arith.constant 1.000000e+00 : f32
    %207 = vector.broadcast %cst_66 : f32 to vector<8x384xf32>
    %208 = arith.addf %207, %206 : vector<8x384xf32>
    %209 = arith.divf %207, %208 : vector<8x384xf32>
    %210 = vector.extract_strided_slice %203 {offsets = [0, 384], sizes = [8, 128], strides = [1, 1]} : vector<8x512xf32> to vector<8x128xf32>
    %211 = math.tanh %210 : vector<8x128xf32>
    %212 = vector.extract_strided_slice %209 {offsets = [0, 0], sizes = [8, 128], strides = [1, 1]} : vector<8x384xf32> to vector<8x128xf32>
    %213 = vector.extract_strided_slice %209 {offsets = [0, 128], sizes = [8, 128], strides = [1, 1]} : vector<8x384xf32> to vector<8x128xf32>
    %214 = vector.extract_strided_slice %209 {offsets = [0, 256], sizes = [8, 128], strides = [1, 1]} : vector<8x384xf32> to vector<8x128xf32>
    %215 = arith.mulf %213, %170 : vector<8x128xf32>
    %216 = arith.mulf %212, %211 : vector<8x128xf32>
    %217 = arith.addf %215, %216 : vector<8x128xf32>
    %218 = math.tanh %217 : vector<8x128xf32>
    %219 = arith.mulf %214, %218 : vector<8x128xf32>
    %c0_67 = arith.constant 0 : index
    %c0_68 = arith.constant 0 : index
    %220 = vector.load %arg5[%c0_67, %c0_68] : memref<128x512xf32, #tpu.memory_space<vmem>>, vector<128x512xf32>
    %cst_69 = arith.constant dense<0.000000e+00> : vector<8x512xf32>
    %221 = tpu.matmul %219, %220, %cst_69 {dimension_numbers = #tpu.dot_dimension_numbers<[1], [0], [0], [1], [0, 0, 1, 1], [], []>} : vector<8x128xf32>, vector<128x512xf32>, vector<8x512xf32> -> vector<8x512xf32>
    %c0_70 = arith.constant 0 : index
    %c0_71 = arith.constant 0 : index
    %222 = vector.load %arg6[%c0_70, %c0_71] : memref<128x512xf32, #tpu.memory_space<vmem>>, vector<128x512xf32>
    %cst_72 = arith.constant dense<0.000000e+00> : vector<8x512xf32>
    %223 = tpu.matmul %194, %222, %cst_72 {dimension_numbers = #tpu.dot_dimension_numbers<[1], [0], [0], [1], [0, 0, 1, 1], [], []>} : vector<8x128xf32>, vector<128x512xf32>, vector<8x512xf32> -> vector<8x512xf32>
    %224 = arith.addf %221, %223 : vector<8x512xf32>
    %225 = arith.addf %224, %5 : vector<8x512xf32>
    %226 = vector.extract_strided_slice %225 {offsets = [0, 0], sizes = [8, 384], strides = [1, 1]} : vector<8x512xf32> to vector<8x384xf32>
    %227 = arith.negf %226 : vector<8x384xf32>
    %228 = math.exp %227 : vector<8x384xf32>
    %cst_73 = arith.constant 1.000000e+00 : f32
    %229 = vector.broadcast %cst_73 : f32 to vector<8x384xf32>
    %230 = arith.addf %229, %228 : vector<8x384xf32>
    %231 = arith.divf %229, %230 : vector<8x384xf32>
    %232 = vector.extract_strided_slice %225 {offsets = [0, 384], sizes = [8, 128], strides = [1, 1]} : vector<8x512xf32> to vector<8x128xf32>
    %233 = math.tanh %232 : vector<8x128xf32>
    %234 = vector.extract_strided_slice %231 {offsets = [0, 0], sizes = [8, 128], strides = [1, 1]} : vector<8x384xf32> to vector<8x128xf32>
    %235 = vector.extract_strided_slice %231 {offsets = [0, 128], sizes = [8, 128], strides = [1, 1]} : vector<8x384xf32> to vector<8x128xf32>
    %236 = vector.extract_strided_slice %231 {offsets = [0, 256], sizes = [8, 128], strides = [1, 1]} : vector<8x384xf32> to vector<8x128xf32>
    %237 = arith.mulf %235, %192 : vector<8x128xf32>
    %238 = arith.mulf %234, %233 : vector<8x128xf32>
    %239 = arith.addf %237, %238 : vector<8x128xf32>
    %240 = math.tanh %239 : vector<8x128xf32>
    %241 = arith.mulf %236, %240 : vector<8x128xf32>
    %c0_74 = arith.constant 0 : index
    %c5 = arith.constant 5 : index
    %242 = vector.load %arg1[%c0_74, %c5] : memref<8x8xf32, #tpu.memory_space<vmem>>, vector<8x1xf32>
    %c0_75 = arith.constant 0 : index
    %c0_76 = arith.constant 0 : index
    %243 = vector.load %arg2[%c0_75, %c0_76] : memref<1x512xf32, #tpu.memory_space<vmem>>, vector<1x512xf32>
    %244 = vector.broadcast %242 : vector<8x1xf32> to vector<8x512xf32>
    %245 = vector.broadcast %243 : vector<1x512xf32> to vector<8x512xf32>
    %246 = arith.mulf %244, %245 : vector<8x512xf32>
    %247 = arith.addf %246, %2 : vector<8x512xf32>
    %c0_77 = arith.constant 0 : index
    %c0_78 = arith.constant 0 : index
    %248 = vector.load %arg4[%c0_77, %c0_78] : memref<128x512xf32, #tpu.memory_space<vmem>>, vector<128x512xf32>
    %cst_79 = arith.constant dense<0.000000e+00> : vector<8x512xf32>
    %249 = tpu.matmul %219, %248, %cst_79 {dimension_numbers = #tpu.dot_dimension_numbers<[1], [0], [0], [1], [0, 0, 1, 1], [], []>} : vector<8x128xf32>, vector<128x512xf32>, vector<8x512xf32> -> vector<8x512xf32>
    %250 = arith.addf %247, %249 : vector<8x512xf32>
    %251 = vector.extract_strided_slice %250 {offsets = [0, 0], sizes = [8, 384], strides = [1, 1]} : vector<8x512xf32> to vector<8x384xf32>
    %252 = arith.negf %251 : vector<8x384xf32>
    %253 = math.exp %252 : vector<8x384xf32>
    %cst_80 = arith.constant 1.000000e+00 : f32
    %254 = vector.broadcast %cst_80 : f32 to vector<8x384xf32>
    %255 = arith.addf %254, %253 : vector<8x384xf32>
    %256 = arith.divf %254, %255 : vector<8x384xf32>
    %257 = vector.extract_strided_slice %250 {offsets = [0, 384], sizes = [8, 128], strides = [1, 1]} : vector<8x512xf32> to vector<8x128xf32>
    %258 = math.tanh %257 : vector<8x128xf32>
    %259 = vector.extract_strided_slice %256 {offsets = [0, 0], sizes = [8, 128], strides = [1, 1]} : vector<8x384xf32> to vector<8x128xf32>
    %260 = vector.extract_strided_slice %256 {offsets = [0, 128], sizes = [8, 128], strides = [1, 1]} : vector<8x384xf32> to vector<8x128xf32>
    %261 = vector.extract_strided_slice %256 {offsets = [0, 256], sizes = [8, 128], strides = [1, 1]} : vector<8x384xf32> to vector<8x128xf32>
    %262 = arith.mulf %260, %217 : vector<8x128xf32>
    %263 = arith.mulf %259, %258 : vector<8x128xf32>
    %264 = arith.addf %262, %263 : vector<8x128xf32>
    %265 = math.tanh %264 : vector<8x128xf32>
    %266 = arith.mulf %261, %265 : vector<8x128xf32>
    %c0_81 = arith.constant 0 : index
    %c0_82 = arith.constant 0 : index
    %267 = vector.load %arg5[%c0_81, %c0_82] : memref<128x512xf32, #tpu.memory_space<vmem>>, vector<128x512xf32>
    %cst_83 = arith.constant dense<0.000000e+00> : vector<8x512xf32>
    %268 = tpu.matmul %266, %267, %cst_83 {dimension_numbers = #tpu.dot_dimension_numbers<[1], [0], [0], [1], [0, 0, 1, 1], [], []>} : vector<8x128xf32>, vector<128x512xf32>, vector<8x512xf32> -> vector<8x512xf32>
    %c0_84 = arith.constant 0 : index
    %c0_85 = arith.constant 0 : index
    %269 = vector.load %arg6[%c0_84, %c0_85] : memref<128x512xf32, #tpu.memory_space<vmem>>, vector<128x512xf32>
    %cst_86 = arith.constant dense<0.000000e+00> : vector<8x512xf32>
    %270 = tpu.matmul %241, %269, %cst_86 {dimension_numbers = #tpu.dot_dimension_numbers<[1], [0], [0], [1], [0, 0, 1, 1], [], []>} : vector<8x128xf32>, vector<128x512xf32>, vector<8x512xf32> -> vector<8x512xf32>
    %271 = arith.addf %268, %270 : vector<8x512xf32>
    %272 = arith.addf %271, %5 : vector<8x512xf32>
    %273 = vector.extract_strided_slice %272 {offsets = [0, 0], sizes = [8, 384], strides = [1, 1]} : vector<8x512xf32> to vector<8x384xf32>
    %274 = arith.negf %273 : vector<8x384xf32>
    %275 = math.exp %274 : vector<8x384xf32>
    %cst_87 = arith.constant 1.000000e+00 : f32
    %276 = vector.broadcast %cst_87 : f32 to vector<8x384xf32>
    %277 = arith.addf %276, %275 : vector<8x384xf32>
    %278 = arith.divf %276, %277 : vector<8x384xf32>
    %279 = vector.extract_strided_slice %272 {offsets = [0, 384], sizes = [8, 128], strides = [1, 1]} : vector<8x512xf32> to vector<8x128xf32>
    %280 = math.tanh %279 : vector<8x128xf32>
    %281 = vector.extract_strided_slice %278 {offsets = [0, 0], sizes = [8, 128], strides = [1, 1]} : vector<8x384xf32> to vector<8x128xf32>
    %282 = vector.extract_strided_slice %278 {offsets = [0, 128], sizes = [8, 128], strides = [1, 1]} : vector<8x384xf32> to vector<8x128xf32>
    %283 = vector.extract_strided_slice %278 {offsets = [0, 256], sizes = [8, 128], strides = [1, 1]} : vector<8x384xf32> to vector<8x128xf32>
    %284 = arith.mulf %282, %239 : vector<8x128xf32>
    %285 = arith.mulf %281, %280 : vector<8x128xf32>
    %286 = arith.addf %284, %285 : vector<8x128xf32>
    %287 = math.tanh %286 : vector<8x128xf32>
    %288 = arith.mulf %283, %287 : vector<8x128xf32>
    %c0_88 = arith.constant 0 : index
    %c6 = arith.constant 6 : index
    %289 = vector.load %arg1[%c0_88, %c6] : memref<8x8xf32, #tpu.memory_space<vmem>>, vector<8x1xf32>
    %c0_89 = arith.constant 0 : index
    %c0_90 = arith.constant 0 : index
    %290 = vector.load %arg2[%c0_89, %c0_90] : memref<1x512xf32, #tpu.memory_space<vmem>>, vector<1x512xf32>
    %291 = vector.broadcast %289 : vector<8x1xf32> to vector<8x512xf32>
    %292 = vector.broadcast %290 : vector<1x512xf32> to vector<8x512xf32>
    %293 = arith.mulf %291, %292 : vector<8x512xf32>
    %294 = arith.addf %293, %2 : vector<8x512xf32>
    %c0_91 = arith.constant 0 : index
    %c0_92 = arith.constant 0 : index
    %295 = vector.load %arg4[%c0_91, %c0_92] : memref<128x512xf32, #tpu.memory_space<vmem>>, vector<128x512xf32>
    %cst_93 = arith.constant dense<0.000000e+00> : vector<8x512xf32>
    %296 = tpu.matmul %266, %295, %cst_93 {dimension_numbers = #tpu.dot_dimension_numbers<[1], [0], [0], [1], [0, 0, 1, 1], [], []>} : vector<8x128xf32>, vector<128x512xf32>, vector<8x512xf32> -> vector<8x512xf32>
    %297 = arith.addf %294, %296 : vector<8x512xf32>
    %298 = vector.extract_strided_slice %297 {offsets = [0, 0], sizes = [8, 384], strides = [1, 1]} : vector<8x512xf32> to vector<8x384xf32>
    %299 = arith.negf %298 : vector<8x384xf32>
    %300 = math.exp %299 : vector<8x384xf32>
    %cst_94 = arith.constant 1.000000e+00 : f32
    %301 = vector.broadcast %cst_94 : f32 to vector<8x384xf32>
    %302 = arith.addf %301, %300 : vector<8x384xf32>
    %303 = arith.divf %301, %302 : vector<8x384xf32>
    %304 = vector.extract_strided_slice %297 {offsets = [0, 384], sizes = [8, 128], strides = [1, 1]} : vector<8x512xf32> to vector<8x128xf32>
    %305 = math.tanh %304 : vector<8x128xf32>
    %306 = vector.extract_strided_slice %303 {offsets = [0, 0], sizes = [8, 128], strides = [1, 1]} : vector<8x384xf32> to vector<8x128xf32>
    %307 = vector.extract_strided_slice %303 {offsets = [0, 128], sizes = [8, 128], strides = [1, 1]} : vector<8x384xf32> to vector<8x128xf32>
    %308 = vector.extract_strided_slice %303 {offsets = [0, 256], sizes = [8, 128], strides = [1, 1]} : vector<8x384xf32> to vector<8x128xf32>
    %309 = arith.mulf %307, %264 : vector<8x128xf32>
    %310 = arith.mulf %306, %305 : vector<8x128xf32>
    %311 = arith.addf %309, %310 : vector<8x128xf32>
    %312 = math.tanh %311 : vector<8x128xf32>
    %313 = arith.mulf %308, %312 : vector<8x128xf32>
    %c0_95 = arith.constant 0 : index
    %c0_96 = arith.constant 0 : index
    %314 = vector.load %arg5[%c0_95, %c0_96] : memref<128x512xf32, #tpu.memory_space<vmem>>, vector<128x512xf32>
    %cst_97 = arith.constant dense<0.000000e+00> : vector<8x512xf32>
    %315 = tpu.matmul %313, %314, %cst_97 {dimension_numbers = #tpu.dot_dimension_numbers<[1], [0], [0], [1], [0, 0, 1, 1], [], []>} : vector<8x128xf32>, vector<128x512xf32>, vector<8x512xf32> -> vector<8x512xf32>
    %c0_98 = arith.constant 0 : index
    %c0_99 = arith.constant 0 : index
    %316 = vector.load %arg6[%c0_98, %c0_99] : memref<128x512xf32, #tpu.memory_space<vmem>>, vector<128x512xf32>
    %cst_100 = arith.constant dense<0.000000e+00> : vector<8x512xf32>
    %317 = tpu.matmul %288, %316, %cst_100 {dimension_numbers = #tpu.dot_dimension_numbers<[1], [0], [0], [1], [0, 0, 1, 1], [], []>} : vector<8x128xf32>, vector<128x512xf32>, vector<8x512xf32> -> vector<8x512xf32>
    %318 = arith.addf %315, %317 : vector<8x512xf32>
    %319 = arith.addf %318, %5 : vector<8x512xf32>
    %320 = vector.extract_strided_slice %319 {offsets = [0, 0], sizes = [8, 384], strides = [1, 1]} : vector<8x512xf32> to vector<8x384xf32>
    %321 = arith.negf %320 : vector<8x384xf32>
    %322 = math.exp %321 : vector<8x384xf32>
    %cst_101 = arith.constant 1.000000e+00 : f32
    %323 = vector.broadcast %cst_101 : f32 to vector<8x384xf32>
    %324 = arith.addf %323, %322 : vector<8x384xf32>
    %325 = arith.divf %323, %324 : vector<8x384xf32>
    %326 = vector.extract_strided_slice %319 {offsets = [0, 384], sizes = [8, 128], strides = [1, 1]} : vector<8x512xf32> to vector<8x128xf32>
    %327 = math.tanh %326 : vector<8x128xf32>
    %328 = vector.extract_strided_slice %325 {offsets = [0, 0], sizes = [8, 128], strides = [1, 1]} : vector<8x384xf32> to vector<8x128xf32>
    %329 = vector.extract_strided_slice %325 {offsets = [0, 128], sizes = [8, 128], strides = [1, 1]} : vector<8x384xf32> to vector<8x128xf32>
    %330 = vector.extract_strided_slice %325 {offsets = [0, 256], sizes = [8, 128], strides = [1, 1]} : vector<8x384xf32> to vector<8x128xf32>
    %331 = arith.mulf %329, %286 : vector<8x128xf32>
    %332 = arith.mulf %328, %327 : vector<8x128xf32>
    %333 = arith.addf %331, %332 : vector<8x128xf32>
    %334 = math.tanh %333 : vector<8x128xf32>
    %335 = arith.mulf %330, %334 : vector<8x128xf32>
    %c0_102 = arith.constant 0 : index
    %c7 = arith.constant 7 : index
    %336 = vector.load %arg1[%c0_102, %c7] : memref<8x8xf32, #tpu.memory_space<vmem>>, vector<8x1xf32>
    %c0_103 = arith.constant 0 : index
    %c0_104 = arith.constant 0 : index
    %337 = vector.load %arg2[%c0_103, %c0_104] : memref<1x512xf32, #tpu.memory_space<vmem>>, vector<1x512xf32>
    %338 = vector.broadcast %336 : vector<8x1xf32> to vector<8x512xf32>
    %339 = vector.broadcast %337 : vector<1x512xf32> to vector<8x512xf32>
    %340 = arith.mulf %338, %339 : vector<8x512xf32>
    %341 = arith.addf %340, %2 : vector<8x512xf32>
    %c0_105 = arith.constant 0 : index
    %c0_106 = arith.constant 0 : index
    %342 = vector.load %arg4[%c0_105, %c0_106] : memref<128x512xf32, #tpu.memory_space<vmem>>, vector<128x512xf32>
    %cst_107 = arith.constant dense<0.000000e+00> : vector<8x512xf32>
    %343 = tpu.matmul %313, %342, %cst_107 {dimension_numbers = #tpu.dot_dimension_numbers<[1], [0], [0], [1], [0, 0, 1, 1], [], []>} : vector<8x128xf32>, vector<128x512xf32>, vector<8x512xf32> -> vector<8x512xf32>
    %344 = arith.addf %341, %343 : vector<8x512xf32>
    %345 = vector.extract_strided_slice %344 {offsets = [0, 0], sizes = [8, 384], strides = [1, 1]} : vector<8x512xf32> to vector<8x384xf32>
    %346 = arith.negf %345 : vector<8x384xf32>
    %347 = math.exp %346 : vector<8x384xf32>
    %cst_108 = arith.constant 1.000000e+00 : f32
    %348 = vector.broadcast %cst_108 : f32 to vector<8x384xf32>
    %349 = arith.addf %348, %347 : vector<8x384xf32>
    %350 = arith.divf %348, %349 : vector<8x384xf32>
    %351 = vector.extract_strided_slice %344 {offsets = [0, 384], sizes = [8, 128], strides = [1, 1]} : vector<8x512xf32> to vector<8x128xf32>
    %352 = math.tanh %351 : vector<8x128xf32>
    %353 = vector.extract_strided_slice %350 {offsets = [0, 0], sizes = [8, 128], strides = [1, 1]} : vector<8x384xf32> to vector<8x128xf32>
    %354 = vector.extract_strided_slice %350 {offsets = [0, 128], sizes = [8, 128], strides = [1, 1]} : vector<8x384xf32> to vector<8x128xf32>
    %355 = vector.extract_strided_slice %350 {offsets = [0, 256], sizes = [8, 128], strides = [1, 1]} : vector<8x384xf32> to vector<8x128xf32>
    %356 = arith.mulf %354, %311 : vector<8x128xf32>
    %357 = arith.mulf %353, %352 : vector<8x128xf32>
    %358 = arith.addf %356, %357 : vector<8x128xf32>
    %359 = math.tanh %358 : vector<8x128xf32>
    %360 = arith.mulf %355, %359 : vector<8x128xf32>
    %c0_109 = arith.constant 0 : index
    %c0_110 = arith.constant 0 : index
    %361 = vector.load %arg5[%c0_109, %c0_110] : memref<128x512xf32, #tpu.memory_space<vmem>>, vector<128x512xf32>
    %cst_111 = arith.constant dense<0.000000e+00> : vector<8x512xf32>
    %362 = tpu.matmul %360, %361, %cst_111 {dimension_numbers = #tpu.dot_dimension_numbers<[1], [0], [0], [1], [0, 0, 1, 1], [], []>} : vector<8x128xf32>, vector<128x512xf32>, vector<8x512xf32> -> vector<8x512xf32>
    %c0_112 = arith.constant 0 : index
    %c0_113 = arith.constant 0 : index
    %363 = vector.load %arg6[%c0_112, %c0_113] : memref<128x512xf32, #tpu.memory_space<vmem>>, vector<128x512xf32>
    %cst_114 = arith.constant dense<0.000000e+00> : vector<8x512xf32>
    %364 = tpu.matmul %335, %363, %cst_114 {dimension_numbers = #tpu.dot_dimension_numbers<[1], [0], [0], [1], [0, 0, 1, 1], [], []>} : vector<8x128xf32>, vector<128x512xf32>, vector<8x512xf32> -> vector<8x512xf32>
    %365 = arith.addf %362, %364 : vector<8x512xf32>
    %366 = arith.addf %365, %5 : vector<8x512xf32>
    %367 = vector.extract_strided_slice %366 {offsets = [0, 0], sizes = [8, 384], strides = [1, 1]} : vector<8x512xf32> to vector<8x384xf32>
    %368 = arith.negf %367 : vector<8x384xf32>
    %369 = math.exp %368 : vector<8x384xf32>
    %cst_115 = arith.constant 1.000000e+00 : f32
    %370 = vector.broadcast %cst_115 : f32 to vector<8x384xf32>
    %371 = arith.addf %370, %369 : vector<8x384xf32>
    %372 = arith.divf %370, %371 : vector<8x384xf32>
    %373 = vector.extract_strided_slice %366 {offsets = [0, 384], sizes = [8, 128], strides = [1, 1]} : vector<8x512xf32> to vector<8x128xf32>
    %374 = math.tanh %373 : vector<8x128xf32>
    %375 = vector.extract_strided_slice %372 {offsets = [0, 0], sizes = [8, 128], strides = [1, 1]} : vector<8x384xf32> to vector<8x128xf32>
    %376 = vector.extract_strided_slice %372 {offsets = [0, 128], sizes = [8, 128], strides = [1, 1]} : vector<8x384xf32> to vector<8x128xf32>
    %377 = vector.extract_strided_slice %372 {offsets = [0, 256], sizes = [8, 128], strides = [1, 1]} : vector<8x384xf32> to vector<8x128xf32>
    %378 = arith.mulf %376, %333 : vector<8x128xf32>
    %379 = arith.mulf %375, %374 : vector<8x128xf32>
    %380 = arith.addf %378, %379 : vector<8x128xf32>
    %381 = math.tanh %380 : vector<8x128xf32>
    %382 = arith.mulf %377, %381 : vector<8x128xf32>
    %c0_116 = arith.constant 0 : index
    %c0_117 = arith.constant 0 : index
    %383 = vector.load %arg8[%c0_116, %c0_117] : memref<1x128xf32, #tpu.memory_space<vmem>>, vector<1x128xf32>
    %384 = vector.broadcast %383 : vector<1x128xf32> to vector<8x128xf32>
    %385 = arith.mulf %382, %384 : vector<8x128xf32>
    %cst_118 = arith.constant dense<0.000000e+00> : vector<8xf32>
    %386 = vector.multi_reduction <add>, %385, %cst_118 [1] : vector<8x128xf32> to vector<8xf32>
    %387 = vector.shape_cast %386 : vector<8xf32> to vector<8x1xf32>
    %c0_119 = arith.constant 0 : index
    %c0_120 = arith.constant 0 : index
    %388 = vector.load %arg9[%c0_119, %c0_120] : memref<1x1xf32, #tpu.memory_space<vmem>>, vector<1x1xf32>
    %389 = vector.broadcast %388 : vector<1x1xf32> to vector<8x1xf32>
    %390 = arith.addf %387, %389 : vector<8x1xf32>
    %391 = arith.negf %390 : vector<8x1xf32>
    %392 = math.exp %391 : vector<8x1xf32>
    %cst_121 = arith.constant 1.000000e+00 : f32
    %393 = vector.broadcast %cst_121 : f32 to vector<8x1xf32>
    %394 = arith.addf %393, %392 : vector<8x1xf32>
    %395 = arith.divf %393, %394 : vector<8x1xf32>
    %c0_122 = arith.constant 0 : index
    %c0_123 = arith.constant 0 : index
    %396 = vector.load %arg10[%c0_122, %c0_123] : memref<8x1xf32, #tpu.memory_space<vmem>>, vector<8x1xf32>
    tpu.vector_store %arg10[%c0_122, %c0_123], %395 {strides = array<i32>} : memref<8x1xf32, #tpu.memory_space<vmem>>, vector<8x1xf32>,
    return
  }
  func.func @transform_0(%arg0: i32) -> (i32, i32) {
    %c0_i32 = arith.constant 0 : i32
    %c0_i32_0 = arith.constant 0 : i32
    return %arg0, %c0_i32 : i32, i32
  }
  func.func @transform_1(%arg0: i32) -> (i32, i32) {
    %c0_i32 = arith.constant 0 : i32
    %c0_i32_0 = arith.constant 0 : i32
    %c0_i32_1 = arith.constant 0 : i32
    return %c0_i32, %c0_i32_0 : i32, i32
  }
  func.func @transform_2(%arg0: i32) -> (i32, i32) {
    %c0_i32 = arith.constant 0 : i32
    %c0_i32_0 = arith.constant 0 : i32
    %c0_i32_1 = arith.constant 0 : i32
    return %c0_i32, %c0_i32_0 : i32, i32
  }
  func.func @transform_3(%arg0: i32) -> (i32, i32) {
    %c0_i32 = arith.constant 0 : i32
    %c0_i32_0 = arith.constant 0 : i32
    %c0_i32_1 = arith.constant 0 : i32
    return %c0_i32, %c0_i32_0 : i32, i32
  }
  func.func @transform_4(%arg0: i32) -> (i32, i32) {
    %c0_i32 = arith.constant 0 : i32
    %c0_i32_0 = arith.constant 0 : i32
    %c0_i32_1 = arith.constant 0 : i32
    return %c0_i32, %c0_i32_0 : i32, i32
  }
  func.func @transform_5(%arg0: i32) -> (i32, i32) {
    %c0_i32 = arith.constant 0 : i32
    %c0_i32_0 = arith.constant 0 : i32
    %c0_i32_1 = arith.constant 0 : i32
    return %c0_i32, %c0_i32_0 : i32, i32
  }
  func.func @transform_6(%arg0: i32) -> (i32, i32) {
    %c0_i32 = arith.constant 0 : i32
    %c0_i32_0 = arith.constant 0 : i32
    %c0_i32_1 = arith.constant 0 : i32
    return %c0_i32, %c0_i32_0 : i32, i32
  }
  func.func @transform_7(%arg0: i32) -> (i32, i32) {
    %c0_i32 = arith.constant 0 : i32
    %c0_i32_0 = arith.constant 0 : i32
    %c0_i32_1 = arith.constant 0 : i32
    return %c0_i32, %c0_i32_0 : i32, i32
  }
  func.func @transform_8(%arg0: i32) -> (i32, i32) {
    %c0_i32 = arith.constant 0 : i32
    %c0_i32_0 = arith.constant 0 : i32
    %c0_i32_1 = arith.constant 0 : i32
    return %c0_i32, %c0_i32_0 : i32, i32
  }
  func.func @transform_9(%arg0: i32) -> (i32, i32) {
    %c0_i32 = arith.constant 0 : i32
    %c0_i32_0 = arith.constant 0 : i32
    return %arg0, %c0_i32 : i32, i32
  }
}

</mosaic_0001>

<bundles_post_ra>
// kernel: tpu_custom_call.1
= control target key start
LH: loop header
LB: loop body
LE: loop exit
PB: predicated region body
PF: predicated region fallthrough
CT: control target
= control target key end

     0   :  { %s7693_s0 = inlined_call_operand.hbm [shape: f32[8,8], index: 0, kind: input, shape index: {}]   ;;  %s7694_s1 = inlined_call_operand.vmem [shape: f32[1,512], index: 1, kind: input, shape index: {}]   ;;  %s7695_s2 = inlined_call_operand.vmem [shape: f32[1,512], index: 2, kind: input, shape index: {}]   ;;  %s7696_s3 = inlined_call_operand.hbm [shape: f32[128,512], index: 3, kind: input, shape index: {}]   ;;  %s7697_s4 = inlined_call_operand.hbm [shape: f32[128,512], index: 4, kind: input, shape index: {}]   ;;  %s7698_s5 = inlined_call_operand.hbm [shape: f32[128,512], index: 5, kind: input, shape index: {}]   ;;  %s7699_s6 = inlined_call_operand.vmem [shape: f32[1,512], index: 6, kind: input, shape index: {}]   ;;  %s7700_s7 = inlined_call_operand.vmem [shape: f32[1,128], index: 7, kind: input, shape index: {}]   ;;  %s7701_s8 = inlined_call_operand.<no memory space> [shape: f32[1,1], index: 8, kind: input, shape index: {}]   ;;  %s7702_s9 = inlined_call_operand.vmem [shape: f32[8,1], index: 9, kind: output, shape index: {}]  }
   0x1   :  { %v14_v0 = vstv %s7701_s8 }
   0x2   :  { %15 = vst [vmem:[#allocation2] sm:$0x1] %v14_v0 }
   0x3   :  { %16 = vsyncpa [#allocation4], 0 }
   0x4   :  { %17 = vsyncpa [#allocation6], 0 }
   0x5   :  { %18 = vsyncpa [#allocation9], 0  ;;  %s6331_s11 = smov [#allocation5]   ;;  %s6237_s15 = scalar_lea.hbm %s7696_s3, 8192 }
   0x6   :  { %s38_s12 = sshll.u32 %s6331_s11, 4  ;;  %p6238_p0 = scmp.ne.s32.totalorder %s7696_s3, %s6237_s15  ;;  %s39_s12 = int_to_ptr.vmem [resolvable:$true] %s38_s12 }
   0x7   :  { %p6241_p1 = scmp.lt.u32.totalorder %s6237_s15, %s7696_s3 }
   0x9   :  { %p6243_p2 = pnand %p6241_p1, %p6238_p0 }
   0xb   :  { %6246 = shalt.err (!%p6243_p2)
}
   0xc   :  { %s6247_s8 = scalar_lea.vmem %s39_s12, 8192  ;;  %p6252_p4 = scmp.lt.s32.totalorder %s39_s12, %s39_s12 }
   0xd   :  { %p6248_p3 = scmp.ne.s32.totalorder %s39_s12, %s6247_s8  ;;  %p6253_p5 = scmp.lt.s32.totalorder %s6247_s8, %s6247_s8 }
   0xf   :  { %p6254_p6 = por %p6253_p5, %p6252_p4 }
  0x11   :  { %p6255_p7 = pnand %p6254_p6, %p6248_p3 }
  0x13   :  { %6258 = shalt.err (!%p6255_p7)
}
  0x14   :  { %s6332_s20 = smov 512   ;;  %s6333_s21 = smov 32  }
  0x15   :  { %44 = dma.hbm_to_vmem [thread:$0]  %s7696_s3, 8192, %s39_s12, [#allocation6], %s6332_s20, %s6332_s20, %s6333_s21  }
  0x16   :  { %s6334_s24 = smov [#allocation3]   ;;  %s6335_s26 = smov [#allocation7]  }
  0x17   :  { %s25_s25 = sshll.u32 %s6334_s24, 4  ;;  %s50_s27 = sshll.u32 %s6335_s26, 4  ;;  %s26_s25 = int_to_ptr.vmem [resolvable:$true] %s25_s25  ;;  %s51_s27 = int_to_ptr.vmem [resolvable:$true] %s50_s27 }
  0x18   :  { %s6259_s30 = scalar_lea.hbm %s7693_s0, 128 }
  0x19   :  { %p6260_p8 = scmp.ne.s32.totalorder %s7693_s0, %s6259_s30  ;;  %p6263_p9 = scmp.lt.u32.totalorder %s6259_s30, %s7693_s0 }
  0x1b   :  { %p6265_p10 = pnand %p6263_p9, %p6260_p8 }
  0x1d   :  { %6268 = shalt.err (!%p6265_p10)
}
  0x1e   :  { %s6269_s3 = scalar_lea.vmem %s26_s25, 128  ;;  %p6274_p12 = scmp.lt.s32.totalorder %s26_s25, %s26_s25 }
  0x1f   :  { %p6270_p11 = scmp.ne.s32.totalorder %s26_s25, %s6269_s3  ;;  %p6275_p13 = scmp.lt.s32.totalorder %s6269_s3, %s6269_s3 }
  0x21   :  { %p6276_p0 = por %p6275_p13, %p6274_p12 }
  0x23   :  { %p6277_p1 = pnand %p6276_p0, %p6270_p11 }
  0x25   :  { %6280 = shalt.err (!%p6277_p1)
}
  0x26   :  { %28 = dma.hbm_to_vmem [thread:$0]  %s7693_s0, 128, %s26_s25, [#allocation4]  }
  0x27   :  { %s6281_s18 = scalar_lea.hbm %s7697_s4, 8192 }
  0x28   :  { %p6282_p2 = scmp.ne.s32.totalorder %s7697_s4, %s6281_s18  ;;  %p6285_p3 = scmp.lt.u32.totalorder %s6281_s18, %s7697_s4 }
  0x2a   :  { %p6287_p4 = pnand %p6285_p3, %p6282_p2 }
  0x2c   :  { %6290 = shalt.err (!%p6287_p4)
}
  0x2d   :  { %s6291_s24 = scalar_lea.vmem %s51_s27, 8192  ;;  %p6296_p6 = scmp.lt.s32.totalorder %s51_s27, %s51_s27 }
  0x2e   :  { %p6292_p5 = scmp.ne.s32.totalorder %s51_s27, %s6291_s24  ;;  %p6297_p7 = scmp.lt.s32.totalorder %s6291_s24, %s6291_s24 }
  0x30   :  { %p6298_p8 = por %p6297_p7, %p6296_p6 }
  0x32   :  { %p6299_p9 = pnand %p6298_p8, %p6292_p5 }
  0x34   :  { %6302 = shalt.err (!%p6299_p9)
}
  0x35   :  { %56 = dma.hbm_to_vmem [thread:$0]  %s7697_s4, 8192, %s51_s27, [#allocation6], %s6332_s20, %s6332_s20, %s6333_s21  }
  0x36   :  { %s6336_s26 = smov [#allocation8]   ;;  %s6303_s10 = scalar_lea.hbm %s7698_s5, 8192 }
  0x37   :  { %s62_s28 = sshll.u32 %s6336_s26, 4  ;;  %p6304_p10 = scmp.ne.s32.totalorder %s7698_s5, %s6303_s10  ;;  %s63_s28 = int_to_ptr.vmem [resolvable:$true] %s62_s28 }
  0x38   :  { %p6307_p11 = scmp.lt.u32.totalorder %s6303_s10, %s7698_s5 }
  0x3a   :  { %p6309_p12 = pnand %p6307_p11, %p6304_p10 }
  0x3c   :  { %6312 = shalt.err (!%p6309_p12)
}
  0x3d   :  { %s6313_s12 = scalar_lea.vmem %s63_s28, 8192  ;;  %p6318_p0 = scmp.lt.s32.totalorder %s63_s28, %s63_s28 }
  0x3e   :  { %p6314_p13 = scmp.ne.s32.totalorder %s63_s28, %s6313_s12  ;;  %p6319_p1 = scmp.lt.s32.totalorder %s6313_s12, %s6313_s12 }
  0x40   :  { %p6320_p2 = por %p6319_p1, %p6318_p0 }
  0x42   :  { %p6321_p3 = pnand %p6320_p2, %p6314_p13 }
  0x44   :  { %6324 = shalt.err (!%p6321_p3)
}
  0x45   :  { %68 = dma.hbm_to_vmem [thread:$0]  %s7698_s5, 8192, %s63_s28, [#allocation9], %s6332_s20, %s6332_s20, %s6333_s21  }
  0x46   :  { %6325 = dma.done.wait [#allocation4], 128  }
  0x47   :  { %6326 = vsyncadd [#allocation4], 4294967168 }
  0x48   :  { %6327 = dma.done.wait [#allocation6], 16384  }
  0x49   :  { %6328 = vsyncadd [#allocation6], 4294950912 }
  0x4a   :  { %6329 = dma.done.wait [#allocation9], 8192  }
  0x4b   :  { %6330 = vsyncadd [#allocation9], 4294959104  ;;  %v7703_v1 = vmov 0.0   ;;  %v6338_v2 = vmov 0   ;;  %v168_v3 = vld [vmem:[#allocation5 + $0x8] sm:$0xff]  ;;  %v170_v5 = vld [vmem:[#allocation5 + $0x18] sm:$0xff] }
  0x4c   :  { %295 = vmatprep.mubr.f32.mxu0 %v7703_v1  ;;  %366 = vmatprep.mubr.f32.mxu1 %v7703_v1  ;;  %v172_v4 = vld [vmem:[#allocation5 + $0x28] sm:$0xff]  ;;  %v174_v7 = vld [vmem:[#allocation5 + $0x38] sm:$0xff]  ;;  %v167_v8 = vld [vmem:[#allocation5] sm:$0xff]  ;;  %vm4323_vm0 = vcmask 7168  }
  0x4d   :  { %5966 = vset.pattern.permute.xlu0 %v6338_v2  ;;  %v6458_v6 = vpack.c.bf16 %v172_v4, %v168_v3  ;;  %v171_v9 = vld [vmem:[#allocation5 + $0x20] sm:$0xff]  ;;  %v6460_v10 = vpack.c.bf16 %v174_v7, %v170_v5  ;;  %v169_v12 = vld [vmem:[#allocation5 + $0x10] sm:$0xff]  ;;  %v176_v14 = vld [vmem:[#allocation5 + $0x48] sm:$0xff] }
  0x4e   :  { %v6462_v11 = vpack.c.bf16 %v171_v9, %v167_v8  ;;  %v173_v13 = vld [vmem:[#allocation5 + $0x30] sm:$0xff]  ;;  %v180_v16 = vld [vmem:[#allocation5 + $0x68] sm:$0xff]  ;;  %v178_v17 = vld [vmem:[#allocation5 + $0x58] sm:$0xff] }
  0x4f   :  { %7916 = vst [vmem:[#allocation13_spill] sm:$0xff] %v6458_v6  ;;  %7917 = vst [vmem:[#allocation14_spill] sm:$0xff] %v6460_v10  ;;  %4384 = vmatprep.subr.bf16.mxu0 %v6458_v6  ;;  %v6465_v15 = vpack.c.bf16 %v173_v13, %v169_v12  ;;  %v182_v18 = vld [vmem:[#allocation5 + $0x78] sm:$0xff]  ;;  %4416 = vmatprep.subr.bf16.mxu1 %v6460_v10  ;;  %v6469_v19 = vpack.c.bf16 %v180_v16, %v176_v14  ;;  %v175_v21 = vld [vmem:[#allocation5 + $0x40] sm:$0xff] }
  0x50   :  { %4386 = vmatpush1.bf16.msra.mxu0 %v6462_v11  ;;  %v6471_v20 = vpack.c.bf16 %v182_v18, %v178_v17  ;;  %v179_v22 = vld [vmem:[#allocation5 + $0x60] sm:$0xff]  ;;  %v177_v23 = vld [vmem:[#allocation5 + $0x50] sm:$0xff]  ;;  %v184_v26 = vld [vmem:[#allocation5 + $0x88] sm:$0xff] }
  0x51   :  { %4418 = vmatpush1.bf16.msra.mxu1 %v6465_v15  ;;  %v6474_v24 = vpack.c.bf16 %v179_v22, %v175_v21  ;;  %v181_v25 = vld [vmem:[#allocation5 + $0x70] sm:$0xff]  ;;  %v188_v27 = vld [vmem:[#allocation5 + $0xa8] sm:$0xff]  ;;  %4388 = vmatprep.subr.bf16.mxu0 %v6469_v19  ;;  %v186_v30 = vld [vmem:[#allocation5 + $0x98] sm:$0xff] }
  0x52   :  { %7918 = vst [vmem:[#allocation15_spill] sm:$0xff] %v6471_v20  ;;  %4420 = vmatprep.subr.bf16.mxu1 %v6471_v20  ;;  %v6478_v28 = vpack.c.bf16 %v181_v25, %v177_v23  ;;  %v6480_v29 = vpack.c.bf16 %v188_v27, %v184_v26  ;;  %v190_v31 = vld [vmem:[#allocation5 + $0xb8] sm:$0xff]  ;;  %v183_v32 = vld [vmem:[#allocation5 + $0x80] sm:$0xff]  ;;  %v185_v35 = vld [vmem:[#allocation5 + $0x90] sm:$0xff] }
  0x53   :  { %7919 = vst [vmem:[#allocation16_spill] sm:$0xff] %v6474_v24  ;;  %v6482_v33 = vpack.c.bf16 %v190_v31, %v186_v30  ;;  %v187_v34 = vld [vmem:[#allocation5 + $0xa0] sm:$0xff]  ;;  %v189_v36 = vld [vmem:[#allocation5 + $0xb0] sm:$0xff]  ;;  %v192_v38 = vld [vmem:[#allocation5 + $0xc8] sm:$0xff] }
  0x54   :  { %7920 = vst [vmem:[#allocation17_spill] sm:$0xff] %v6478_v28  ;;  %7921 = vst [vmem:[#allocation18_spill] sm:$0xff] %v6480_v29  ;;  %4390 = vmatpush1.bf16.msra.mxu0 %v6474_v24  ;;  %v6485_v37 = vpack.c.bf16 %v187_v34, %v183_v32  ;;  %v196_v39 = vld [vmem:[#allocation5 + $0xe8] sm:$0xff]  ;;  %v194_v40 = vld [vmem:[#allocation5 + $0xd8] sm:$0xff]  ;;  %v6489_v41 = vpack.c.bf16 %v189_v36, %v185_v35 }
  0x55   :  { %7922 = vst [vmem:[#allocation19_spill] sm:$0xff] %v6482_v33  ;;  %4422 = vmatpush1.bf16.msra.mxu1 %v6478_v28  ;;  %4392 = vmatprep.subr.bf16.mxu0 %v6480_v29  ;;  %v6491_v42 = vpack.c.bf16 %v196_v39, %v192_v38  ;;  %v198_v43 = vld [vmem:[#allocation5 + $0xf8] sm:$0xff]  ;;  %v191_v44 = vld [vmem:[#allocation5 + $0xc0] sm:$0xff]  ;;  %v193_v47 = vld [vmem:[#allocation5 + $0xd0] sm:$0xff] }
  0x56   :  { %7923 = vst [vmem:[#allocation20_spill] sm:$0xff] %v6485_v37  ;;  %7924 = vst [vmem:[#allocation21_spill] sm:$0xff] %v6489_v41  ;;  %v195_v45 = vld [vmem:[#allocation5 + $0xe0] sm:$0xff]  ;;  %4424 = vmatprep.subr.bf16.mxu1 %v6482_v33  ;;  %v6494_v46 = vpack.c.bf16 %v198_v43, %v194_v40  ;;  %v197_v48 = vld [vmem:[#allocation5 + $0xf0] sm:$0xff] }
  0x57   :  { %7925 = vst [vmem:[#allocation22_spill] sm:$0xff] %v6491_v42  ;;  %v200_v49 = vld [vmem:[#allocation5 + $0x108] sm:$0xff]  ;;  %v202_v51 = vld [vmem:[#allocation5 + $0x118] sm:$0xff]  ;;  %v6497_v53 = vpack.c.bf16 %v195_v45, %v191_v44  ;;  %v6501_v54 = vpack.c.bf16 %v197_v48, %v193_v47  ;;  %v199_v56 = vld [vmem:[#allocation5 + $0x100] sm:$0xff] }
  0x58   :  { %7926 = vst [vmem:[#allocation23_spill] sm:$0xff] %v6494_v46  ;;  %v204_v50 = vld [vmem:[#allocation5 + $0x128] sm:$0xff]  ;;  %v206_v52 = vld [vmem:[#allocation5 + $0x138] sm:$0xff]  ;;  %4394 = vmatpush1.bf16.msra.mxu0 %v6485_v37  ;;  %v203_v57 = vld [vmem:[#allocation5 + $0x120] sm:$0xff] }
  0x59   :  { %7927 = vst [vmem:[#allocation24_spill] sm:$0xff] %v6497_v53  ;;  %4426 = vmatpush1.bf16.msra.mxu1 %v6489_v41  ;;  %4396 = vmatprep.subr.bf16.mxu0 %v6491_v42  ;;  %7928 = vst [vmem:[#allocation25_spill] sm:$0xff] %v6501_v54  ;;  %v6503_v55 = vpack.c.bf16 %v204_v50, %v200_v49  ;;  %v201_v58 = vld [vmem:[#allocation5 + $0x110] sm:$0xff]  ;;  %v6506_v59 = vpack.c.bf16 %v206_v52, %v202_v51  ;;  %v208_v61 = vld [vmem:[#allocation5 + $0x148] sm:$0xff] }
  0x5a   :  { %4428 = vmatprep.subr.bf16.mxu1 %v6494_v46  ;;  %v205_v60 = vld [vmem:[#allocation5 + $0x130] sm:$0xff]  ;;  %v212_v62 = vld [vmem:[#allocation5 + $0x168] sm:$0xff]  ;;  %v210_v63 = vld [vmem:[#allocation5 + $0x158] sm:$0xff]  ;;  %v6509_v2 = vpack.c.bf16 %v203_v57, %v199_v56 }
  0x5b   :  { %7929 = vst [vmem:[#allocation26_spill] sm:$0xff] %v6503_v55  ;;  %7930 = vst [vmem:[#allocation27_spill] sm:$0xff] %v6506_v59  ;;  %v214_v0 = vld [vmem:[#allocation5 + $0x178] sm:$0xff]  ;;  %v6513_v3 = vpack.c.bf16 %v205_v60, %v201_v58  ;;  %v6515_v4 = vpack.c.bf16 %v212_v62, %v208_v61  ;;  %v207_v5 = vld [vmem:[#allocation5 + $0x140] sm:$0xff] }
  0x5c   :  { %4398 = vmatpush1.bf16.msra.mxu0 %v6497_v53  ;;  %7931 = vst [vmem:[#allocation28_spill] sm:$0xff] %v6509_v2  ;;  %v211_v7 = vld [vmem:[#allocation5 + $0x160] sm:$0xff]  ;;  %v209_v8 = vld [vmem:[#allocation5 + $0x150] sm:$0xff]  ;;  %v6518_v9 = vpack.c.bf16 %v214_v0, %v210_v63  ;;  %v216_v13 = vld [vmem:[#allocation5 + $0x188] sm:$0xff] }
  0x5d   :  { %4430 = vmatpush1.bf16.msra.mxu1 %v6501_v54  ;;  %4400 = vmatprep.subr.bf16.mxu0 %v6503_v55  ;;  %7932 = vst [vmem:[#allocation29_spill] sm:$0xff] %v6513_v3  ;;  %7933 = vst [vmem:[#allocation30_spill] sm:$0xff] %v6515_v4  ;;  %v213_v12 = vld [vmem:[#allocation5 + $0x170] sm:$0xff]  ;;  %v220_v14 = vld [vmem:[#allocation5 + $0x1a8] sm:$0xff]  ;;  %v6521_v18 = vpack.c.bf16 %v211_v7, %v207_v5 }
  0x5e   :  { %4432 = vmatprep.subr.bf16.mxu1 %v6506_v59  ;;  %7934 = vst [vmem:[#allocation31_spill] sm:$0xff] %v6518_v9  ;;  %v218_v16 = vld [vmem:[#allocation5 + $0x198] sm:$0xff]  ;;  %v215_v21 = vld [vmem:[#allocation5 + $0x180] sm:$0xff]  ;;  %v6525_v22 = vpack.c.bf16 %v213_v12, %v209_v8  ;;  %v6527_v23 = vpack.c.bf16 %v220_v14, %v216_v13  ;;  %v217_v26 = vld [vmem:[#allocation5 + $0x190] sm:$0xff] }
  0x5f   :  { %v222_v17 = vld [vmem:[#allocation5 + $0x1b8] sm:$0xff]  ;;  %7935 = vst [vmem:[#allocation32_spill] sm:$0xff] %v6521_v18  ;;  %v219_v25 = vld [vmem:[#allocation5 + $0x1a0] sm:$0xff]  ;;  %v221_v31 = vld [vmem:[#allocation5 + $0x1b0] sm:$0xff] }
  0x60   :  { %4402 = vmatpush1.bf16.msra.mxu0 %v6509_v2  ;;  %7936 = vst [vmem:[#allocation33_spill] sm:$0xff] %v6525_v22  ;;  %7937 = vst [vmem:[#allocation34_spill] sm:$0xff] %v6527_v23  ;;  %v6529_v27 = vld [vmem:[#allocation3] sm:$0xff]  ;;  %v6532_v30 = vpack.c.bf16 %v222_v17, %v218_v16  ;;  %v224_v32 = vld [vmem:[#allocation5 + $0x1c8] sm:$0xff]  ;;  %v6536_v38 = vpack.c.bf16 %v219_v25, %v215_v21  ;;  %v6540_v39 = vpack.c.bf16 %v221_v31, %v217_v26 }
  0x61   :  { %4434 = vmatpush1.bf16.msra.mxu1 %v6513_v3  ;;  %4404 = vmatprep.subr.bf16.mxu0 %v6515_v4  ;;  %7938 = vst [vmem:[#allocation35_spill] sm:$0xff] %v6529_v27  ;;  %v228_v34 = vld [vmem:[#allocation5 + $0x1e8] sm:$0xff]  ;;  %v226_v35 = vld [vmem:[#allocation5 + $0x1d8] sm:$0xff]  ;;  %v223_v43 = vld [vmem:[#allocation5 + $0x1c0] sm:$0xff] }
  0x62   :  { %4436 = vmatprep.subr.bf16.mxu1 %v6518_v9  ;;  %7939 = vst [vmem:[#allocation36_spill] sm:$0xff] %v6532_v30  ;;  %135 = vperm.xlu0 %5966, %v6529_v27   ;;  %v230_v36 = vld [vmem:[#allocation5 + $0x1f8] sm:$0xff]  ;;  %7940 = vst [vmem:[#allocation37_spill] sm:$0xff] %v6536_v38  ;;  %v6542_v40 = vpack.c.bf16 %v228_v34, %v224_v32  ;;  %v227_v44 = vld [vmem:[#allocation5 + $0x1e0] sm:$0xff] }
  0x63   :  { %7941 = vst [vmem:[#allocation38_spill] sm:$0xff] %v6540_v39  ;;  %v225_v45 = vld [vmem:[#allocation5 + $0x1d0] sm:$0xff]  ;;  %v6545_v47 = vpack.c.bf16 %v230_v36, %v226_v35  ;;  %v466_v49 = vld [vmem:[#allocation8 + $0x8] sm:$0xff]  ;;  %v468_v51 = vld [vmem:[#allocation8 + $0x18] sm:$0xff]  ;;  %v6548_v56 = vpack.c.bf16 %v227_v44, %v223_v43 }
  0x64   :  { %4406 = vmatpush1.bf16.msra.mxu0 %v6521_v18  ;;  %7942 = vst [vmem:[#allocation39_spill] sm:$0xff] %v6542_v40  ;;  %v229_v48 = vld [vmem:[#allocation5 + $0x1f0] sm:$0xff]  ;;  %v470_v50 = vld [vmem:[#allocation8 + $0x28] sm:$0xff]  ;;  %v472_v52 = vld [vmem:[#allocation8 + $0x38] sm:$0xff] }
  0x65   :  { %4438 = vmatpush1.bf16.msra.mxu1 %v6525_v22  ;;  %4408 = vmatprep.subr.bf16.mxu0 %v6527_v23  ;;  %7943 = vst [vmem:[#allocation40_spill] sm:$0xff] %v6545_v47  ;;  %7944 = vst [vmem:[#allocation41_spill] sm:$0xff] %v6548_v56  ;;  %v6552_v57 = vpack.c.bf16 %v229_v48, %v225_v45  ;;  %v6554_v58 = vpack.c.bf16 %v470_v50, %v466_v49  ;;  %v465_v60 = vld [vmem:[#allocation8] sm:$0xff]  ;;  %v467_v62 = vld [vmem:[#allocation8 + $0x10] sm:$0xff] }
  0x66   :  { %4440 = vmatprep.subr.bf16.mxu1 %v6532_v30  ;;  %v469_v61 = vld [vmem:[#allocation8 + $0x20] sm:$0xff]  ;;  %v6557_v63 = vpack.c.bf16 %v472_v52, %v468_v51  ;;  %v471_v0 = vld [vmem:[#allocation8 + $0x30] sm:$0xff]  ;;  %v474_v5 = vld [vmem:[#allocation8 + $0x48] sm:$0xff] }
  0x67   :  { %7945 = vst [vmem:[#allocation42_spill] sm:$0xff] %v6552_v57  ;;  %7946 = vst [vmem:[#allocation43_spill] sm:$0xff] %v6554_v58  ;;  %v478_v7 = vld [vmem:[#allocation8 + $0x68] sm:$0xff]  ;;  %v476_v8 = vld [vmem:[#allocation8 + $0x58] sm:$0xff]  ;;  %v6560_v13 = vpack.c.bf16 %v469_v61, %v465_v60  ;;  %v6564_v14 = vpack.c.bf16 %v471_v0, %v467_v62 }
  0x68   :  { %4410 = vmatpush1.bf16.msra.mxu0 %v6536_v38  ;;  %7947 = vst [vmem:[#allocation44_spill] sm:$0xff] %v6557_v63  ;;  %v480_v12 = vld [vmem:[#allocation8 + $0x78] sm:$0xff]  ;;  %v6566_v16 = vpack.c.bf16 %v478_v7, %v474_v5  ;;  %v473_v17 = vld [vmem:[#allocation8 + $0x40] sm:$0xff]  ;;  %v475_v25 = vld [vmem:[#allocation8 + $0x50] sm:$0xff] }
  0x69   :  { %4442 = vmatpush1.bf16.msra.mxu1 %v6540_v39  ;;  %4412 = vmatprep.subr.bf16.mxu0 %v6542_v40  ;;  %7948 = vst [vmem:[#allocation45_spill] sm:$0xff] %v6560_v13  ;;  %7949 = vst [vmem:[#allocation46_spill] sm:$0xff] %v6564_v14  ;;  %v477_v21 = vld [vmem:[#allocation8 + $0x60] sm:$0xff]  ;;  %v6569_v26 = vpack.c.bf16 %v480_v12, %v476_v8  ;;  %v479_v31 = vld [vmem:[#allocation8 + $0x70] sm:$0xff] }
  0x6a   :  { %4444 = vmatprep.subr.bf16.mxu1 %v6545_v47  ;;  %7950 = vst [vmem:[#allocation47_spill] sm:$0xff] %v6566_v16  ;;  %v482_v32 = vld [vmem:[#allocation8 + $0x88] sm:$0xff]  ;;  %v484_v35 = vld [vmem:[#allocation8 + $0x98] sm:$0xff]  ;;  %v6574_v43 = vpack.c.bf16 %v477_v21, %v473_v17  ;;  %v6578_v44 = vpack.c.bf16 %v479_v31, %v475_v25  ;;  %v481_v48 = vld [vmem:[#allocation8 + $0x80] sm:$0xff] }
  0x6b   :  { %7951 = vst [vmem:[#allocation48_spill] sm:$0xff] %v6569_v26  ;;  %v486_v34 = vld [vmem:[#allocation8 + $0xa8] sm:$0xff]  ;;  %v488_v36 = vld [vmem:[#allocation8 + $0xb8] sm:$0xff]  ;;  %v485_v49 = vld [vmem:[#allocation8 + $0xa0] sm:$0xff] }
  0x6c   :  { %4414 = vmatpush1.bf16.msra.mxu0 %v6548_v56  ;;  %7952 = vst [vmem:[#allocation49_spill] sm:$0xff] %v6574_v43  ;;  %7953 = vst [vmem:[#allocation50_spill] sm:$0xff] %v6578_v44  ;;  %v6580_v45 = vpack.c.bf16 %v486_v34, %v482_v32  ;;  %v483_v50 = vld [vmem:[#allocation8 + $0x90] sm:$0xff]  ;;  %v6583_v51 = vpack.c.bf16 %v488_v36, %v484_v35  ;;  %v490_v60 = vld [vmem:[#allocation8 + $0xc8] sm:$0xff]  ;;  %v6588_v5 = vpack.c.bf16 %v485_v49, %v481_v48 }
  0x6d   :  { %4446 = vmatpush1.bf16.msra.mxu1 %v6552_v57  ;;  %4448 = vmatprep.subr.bf16.mxu0 %v6554_v58  ;;  %v487_v52 = vld [vmem:[#allocation8 + $0xb0] sm:$0xff]  ;;  %v494_v61 = vld [vmem:[#allocation8 + $0xe8] sm:$0xff]  ;;  %v492_v62 = vld [vmem:[#allocation8 + $0xd8] sm:$0xff] }
  0x6e   :  { %4480 = vmatprep.subr.bf16.mxu1 %v6557_v63  ;;  %7954 = vst [vmem:[#allocation51_spill] sm:$0xff] %v6580_v45  ;;  %7955 = vst [vmem:[#allocation52_spill] sm:$0xff] %v6583_v51  ;;  %v496_v0 = vld [vmem:[#allocation8 + $0xf8] sm:$0xff]  ;;  %v6592_v7 = vpack.c.bf16 %v487_v52, %v483_v50  ;;  %v6594_v8 = vpack.c.bf16 %v494_v61, %v490_v60  ;;  %v489_v12 = vld [vmem:[#allocation8 + $0xc0] sm:$0xff] }
  0x6f   :  { %296 = vmatmul.mubr.f32.vlgmr.msra.gmra.mrb[0].mxu0 %v7703_v1  ;;  %7956 = vst [vmem:[#allocation53_spill] sm:$0xff] %v6588_v5  ;;  %v493_v17 = vld [vmem:[#allocation8 + $0xe0] sm:$0xff]  ;;  %v491_v21 = vld [vmem:[#allocation8 + $0xd0] sm:$0xff]  ;;  %v6597_v25 = vpack.c.bf16 %v496_v0, %v492_v62  ;;  %v498_v32 = vld [vmem:[#allocation8 + $0x108] sm:$0xff] }
  0x70   :  { %367 = vmatmul.mubr.f32.vlgmr.msra.gmra.mrb[0].mxu1 %v7703_v1  ;;  %4450 = vmatpush1.bf16.msra.mxu0 %v6560_v13  ;;  %7957 = vst [vmem:[#allocation54_spill] sm:$0xff] %v6592_v7  ;;  %7958 = vst [vmem:[#allocation55_spill] sm:$0xff] %v6594_v8  ;;  %v495_v31 = vld [vmem:[#allocation8 + $0xf0] sm:$0xff]  ;;  %v502_v34 = vld [vmem:[#allocation8 + $0x128] sm:$0xff]  ;;  %v6600_v48 = vpack.c.bf16 %v493_v17, %v489_v12 }
  0x71   :  { %4482 = vmatpush1.bf16.msra.mxu1 %v6564_v14  ;;  %4452 = vmatprep.subr.bf16.mxu0 %v6566_v16  ;;  %7959 = vst [vmem:[#allocation56_spill] sm:$0xff] %v6597_v25  ;;  %v500_v35 = vld [vmem:[#allocation8 + $0x118] sm:$0xff]  ;;  %v6604_v49 = vpack.c.bf16 %v495_v31, %v491_v21  ;;  %v6606_v50 = vpack.c.bf16 %v502_v34, %v498_v32  ;;  %v497_v52 = vld [vmem:[#allocation8 + $0x100] sm:$0xff]  ;;  %v499_v62 = vld [vmem:[#allocation8 + $0x110] sm:$0xff] }
  0x72   :  { %4484 = vmatprep.subr.bf16.mxu1 %v6569_v26  ;;  %593 = vmatprep.mubr.f32.mxu0 %v7703_v1  ;;  %v504_v36 = vld [vmem:[#allocation8 + $0x138] sm:$0xff]  ;;  %7960 = vst [vmem:[#allocation57_spill] sm:$0xff] %v6600_v48  ;;  %v501_v60 = vld [vmem:[#allocation8 + $0x120] sm:$0xff]  ;;  %v503_v0 = vld [vmem:[#allocation8 + $0x130] sm:$0xff] }
  0x73   :  { %664 = vmatprep.mubr.f32.mxu1 %v7703_v1  ;;  %7961 = vst [vmem:[#allocation58_spill] sm:$0xff] %v6604_v49  ;;  %7962 = vst [vmem:[#allocation59_spill] sm:$0xff] %v6606_v50  ;;  %v6609_v61 = vpack.c.bf16 %v504_v36, %v500_v35  ;;  %v6612_v12 = vpack.c.bf16 %v501_v60, %v497_v52  ;;  %v6616_v17 = vpack.c.bf16 %v503_v0, %v499_v62  ;;  %v506_v21 = vld [vmem:[#allocation8 + $0x148] sm:$0xff]  ;;  %v508_v32 = vld [vmem:[#allocation8 + $0x158] sm:$0xff] }
  0x74   :  { %4454 = vmatpush1.bf16.msra.mxu0 %v6574_v43  ;;  %v510_v31 = vld [vmem:[#allocation8 + $0x168] sm:$0xff]  ;;  %v512_v35 = vld [vmem:[#allocation8 + $0x178] sm:$0xff]  ;;  %v505_v36 = vld [vmem:[#allocation8 + $0x140] sm:$0xff] }
  0x75   :  { %4486 = vmatpush1.bf16.msra.mxu1 %v6578_v44  ;;  %4456 = vmatprep.subr.bf16.mxu0 %v6580_v45  ;;  %7963 = vst [vmem:[#allocation60_spill] sm:$0xff] %v6609_v61  ;;  %7964 = vst [vmem:[#allocation61_spill] sm:$0xff] %v6612_v12  ;;  %v6621_v34 = vpack.c.bf16 %v510_v31, %v506_v21  ;;  %v509_v52 = vld [vmem:[#allocation8 + $0x160] sm:$0xff]  ;;  %v6623_v60 = vpack.c.bf16 %v512_v35, %v508_v32  ;;  %v507_v62 = vld [vmem:[#allocation8 + $0x150] sm:$0xff] }
  0x76   :  { %4488 = vmatprep.subr.bf16.mxu1 %v6583_v51  ;;  %7965 = vst [vmem:[#allocation62_spill] sm:$0xff] %v6616_v17  ;;  %v6625_v1 = vpack.c.bf16 %v509_v52, %v505_v36  ;;  %v511_v0 = vld [vmem:[#allocation8 + $0x170] sm:$0xff]  ;;  %v518_v21 = vld [vmem:[#allocation8 + $0x1a8] sm:$0xff]  ;;  %v516_v31 = vld [vmem:[#allocation8 + $0x198] sm:$0xff] }
  0x77   :  { %7966 = vst [vmem:[#allocation63_spill] sm:$0xff] %v6621_v34  ;;  %7967 = vst [vmem:[#allocation64_spill] sm:$0xff] %v6623_v60  ;;  %v520_v32 = vld [vmem:[#allocation8 + $0x1b8] sm:$0xff]  ;;  %v513_v35 = vld [vmem:[#allocation8 + $0x180] sm:$0xff] }
  0x78   :  { %4458 = vmatpush1.bf16.msra.mxu0 %v6588_v5  ;;  %7968 = vst [vmem:[#allocation65_spill] sm:$0xff] %v6625_v1  ;;  %v517_v36 = vld [vmem:[#allocation8 + $0x1a0] sm:$0xff]  ;;  %v6635_v52 = vpack.c.bf16 %v520_v32, %v516_v31  ;;  %v528_v31 = vld [vmem:[#allocation8 + $0x1f8] sm:$0xff] }
  0x79   :  { %4490 = vmatpush1.bf16.msra.mxu1 %v6592_v7  ;;  %4460 = vmatprep.subr.bf16.mxu0 %v6594_v8  ;;  %v521_v32 = vld [vmem:[#allocation8 + $0x1c0] sm:$0xff] }
  0x7a   :  { %4492 = vmatprep.subr.bf16.mxu1 %v6597_v25  ;;  %7971 = vst [vmem:[#allocation68_spill] sm:$0xff] %v6635_v52 }
  0x7c   :  { %4462 = vmatpush1.bf16.msra.mxu0 %v6600_v48  ;;  %v437_v48 = vld [vmem:[#allocation7 + $0x120] sm:$0xff] }
  0x7d   :  { %4494 = vmatpush1.bf16.msra.mxu1 %v6604_v49  ;;  %4464 = vmatprep.subr.bf16.mxu0 %v6606_v50  ;;  %v6637_v50 = vpack.c.bf16 %v517_v36, %v513_v35  ;;  %v525_v35 = vld [vmem:[#allocation8 + $0x1e0] sm:$0xff] }
  0x7e   :  { %4496 = vmatprep.subr.bf16.mxu1 %v6609_v61  ;;  %v6628_v61 = vpack.c.bf16 %v511_v0, %v507_v62  ;;  %v515_v62 = vld [vmem:[#allocation8 + $0x190] sm:$0xff] }
  0x7f   :  { %7972 = vst [vmem:[#allocation69_spill] sm:$0xff] %v6637_v50  ;;  %v519_v0 = vld [vmem:[#allocation8 + $0x1b0] sm:$0xff] }
  0x80   :  { %4466 = vmatpush1.bf16.msra.mxu0 %v6612_v12  ;;  %7969 = vst [vmem:[#allocation66_spill] sm:$0xff] %v6628_v61 }
  0x81   :  { %4498 = vmatpush1.bf16.msra.mxu1 %v6616_v17  ;;  %4468 = vmatprep.subr.bf16.mxu0 %v6621_v34  ;;  %v514_v17 = vld [vmem:[#allocation8 + $0x188] sm:$0xff]  ;;  %v6649_v34 = vpack.c.bf16 %v525_v35, %v521_v32  ;;  %v405_v32 = vld [vmem:[#allocation7 + $0x20] sm:$0xff] }
  0x82   :  { %4500 = vmatprep.subr.bf16.mxu1 %v6623_v60  ;;  %v6633_v12 = vpack.c.bf16 %v518_v21, %v514_v17  ;;  %v6640_v60 = vpack.c.bf16 %v519_v0, %v515_v62  ;;  %v526_v17 = vld [vmem:[#allocation8 + $0x1e8] sm:$0xff]  ;;  %v524_v21 = vld [vmem:[#allocation8 + $0x1d8] sm:$0xff]  ;;  %v523_v62 = vld [vmem:[#allocation8 + $0x1d0] sm:$0xff] }
  0x83   :  { %v6647_v36 = vpack.c.bf16 %v528_v31, %v524_v21  ;;  %7976 = vst [vmem:[#allocation73_spill] sm:$0xff] %v6649_v34  ;;  %v527_v0 = vld [vmem:[#allocation8 + $0x1f0] sm:$0xff]  ;;  %v408_v21 = vld [vmem:[#allocation7 + $0x38] sm:$0xff]  ;;  %v401_v31 = vld [vmem:[#allocation7] sm:$0xff] }
  0x84   :  { %4470 = vmatpush1.bf16.msra.mxu0 %v6625_v1  ;;  %7970 = vst [vmem:[#allocation67_spill] sm:$0xff] %v6633_v12  ;;  %7973 = vst [vmem:[#allocation70_spill] sm:$0xff] %v6640_v60 }
  0x85   :  { %4502 = vmatpush1.bf16.msra.mxu1 %v6628_v61  ;;  %4472 = vmatprep.subr.bf16.mxu0 %v6633_v12  ;;  %v522_v61 = vld [vmem:[#allocation8 + $0x1c8] sm:$0xff]  ;;  %7975 = vst [vmem:[#allocation72_spill] sm:$0xff] %v6647_v36  ;;  %v6661_v12 = vpack.c.bf16 %v405_v32, %v401_v31  ;;  %v409_v31 = vld [vmem:[#allocation7 + $0x40] sm:$0xff] }
  0x86   :  { %4504 = vmatprep.subr.bf16.mxu1 %v6635_v52  ;;  %v6645_v1 = vpack.c.bf16 %v526_v17, %v522_v61  ;;  %v6652_v52 = vpack.c.bf16 %v527_v0, %v523_v62  ;;  %v406_v61 = vld [vmem:[#allocation7 + $0x28] sm:$0xff]  ;;  %v404_v17 = vld [vmem:[#allocation7 + $0x18] sm:$0xff]  ;;  %v403_v62 = vld [vmem:[#allocation7 + $0x10] sm:$0xff] }
  0x87   :  { %v6659_v35 = vpack.c.bf16 %v408_v21, %v404_v17  ;;  %7980 = vst [vmem:[#allocation77_spill] sm:$0xff] %v6661_v12  ;;  %v407_v0 = vld [vmem:[#allocation7 + $0x30] sm:$0xff]  ;;  %v416_v21 = vld [vmem:[#allocation7 + $0x78] sm:$0xff]  ;;  %v413_v32 = vld [vmem:[#allocation7 + $0x60] sm:$0xff] }
  0x88   :  { %4474 = vmatpush1.bf16.msra.mxu0 %v6637_v50  ;;  %7974 = vst [vmem:[#allocation71_spill] sm:$0xff] %v6645_v1  ;;  %7977 = vst [vmem:[#allocation74_spill] sm:$0xff] %v6652_v52 }
  0x89   :  { %4506 = vmatpush1.bf16.msra.mxu1 %v6640_v60  ;;  %4476 = vmatprep.subr.bf16.mxu0 %v6645_v1  ;;  %v402_v60 = vld [vmem:[#allocation7 + $0x8] sm:$0xff]  ;;  %7979 = vst [vmem:[#allocation76_spill] sm:$0xff] %v6659_v35 }
  0x8a   :  { %4508 = vmatprep.subr.bf16.mxu1 %v6647_v36  ;;  %v6657_v50 = vpack.c.bf16 %v406_v61, %v402_v60  ;;  %v7981_v36 = vmov 0.0   ;;  %v410_v60 = vld [vmem:[#allocation7 + $0x48] sm:$0xff] }
  0x8b   :  { %v414_v61 = vld [vmem:[#allocation7 + $0x68] sm:$0xff] }
  0x8c   :  { %4478 = vmatpush1.bf16.msra.mxu0 %v6649_v34  ;;  %7978 = vst [vmem:[#allocation75_spill] sm:$0xff] %v6657_v50  ;;  %v6665_v34 = vpack.c.bf16 %v407_v0, %v403_v62  ;;  %v6671_v17 = vpack.c.bf16 %v414_v61, %v410_v60  ;;  %v6675_v62 = vpack.c.bf16 %v413_v32, %v409_v31  ;;  %v411_v0 = vld [vmem:[#allocation7 + $0x50] sm:$0xff]  ;;  %v418_v60 = vld [vmem:[#allocation7 + $0x88] sm:$0xff]  ;;  %v417_v31 = vld [vmem:[#allocation7 + $0x80] sm:$0xff] }
  0x8d   :  { %4510 = vmatpush1.bf16.msra.mxu1 %v6652_v52  ;;  %4512 = vmatprep.subr.bf16.mxu0 %v6657_v50  ;;  %v412_v52 = vld [vmem:[#allocation7 + $0x58] sm:$0xff]  ;;  %v422_v61 = vld [vmem:[#allocation7 + $0xa8] sm:$0xff]  ;;  %v421_v32 = vld [vmem:[#allocation7 + $0xa0] sm:$0xff] }
  0x8e   :  { %7982 = vst [vmem:[#allocation78_spill] sm:$0xff] %v6665_v34  ;;  %4544 = vmatprep.subr.bf16.mxu1 %v6659_v35  ;;  %7983 = vst [vmem:[#allocation79_spill] sm:$0xff] %v6671_v17  ;;  %v6673_v50 = vpack.c.bf16 %v416_v21, %v412_v52  ;;  %v415_v35 = vld [vmem:[#allocation7 + $0x70] sm:$0xff]  ;;  %v6685_v52 = vpack.c.bf16 %v422_v61, %v418_v60  ;;  %v424_v21 = vld [vmem:[#allocation7 + $0xb8] sm:$0xff]  ;;  %v6689_v49 = vpack.c.bf16 %v421_v32, %v417_v31 }
  0x8f   :  { %594 = vmatmul.mubr.f32.vlgmr.msra.gmra.mrb[2].mxu0 %v7981_v36  ;;  %7985 = vst [vmem:[#allocation81_spill] sm:$0xff] %v6675_v62  ;;  %v425_v61 = vld [vmem:[#allocation7 + $0xc0] sm:$0xff] }
  0x90   :  { %665 = vmatmul.mubr.f32.vlgmr.msra.gmra.mrb[2].mxu1 %v7981_v36  ;;  %4514 = vmatpush1.bf16.msra.mxu0 %v6661_v12  ;;  %7984 = vst [vmem:[#allocation80_spill] sm:$0xff] %v6673_v50  ;;  %v6680_v12 = vpack.c.bf16 %v415_v35, %v411_v0  ;;  %7987 = vst [vmem:[#allocation83_spill] sm:$0xff] %v6685_v52  ;;  %v419_v35 = vld [vmem:[#allocation7 + $0x90] sm:$0xff] }
  0x91   :  { %4546 = vmatpush1.bf16.msra.mxu1 %v6665_v34  ;;  %735 = vmatprep.mubr.f32.mxu0 %v7981_v36  ;;  %v420_v34 = vld [vmem:[#allocation7 + $0x98] sm:$0xff]  ;;  %7989 = vst [vmem:[#allocation85_spill] sm:$0xff] %v6689_v49  ;;  %v423_v0 = vld [vmem:[#allocation7 + $0xb0] sm:$0xff] }
  0x92   :  { %806 = vmatprep.mubr.f32.mxu1 %v7981_v36  ;;  %4516 = vmatprep.subr.bf16.mxu0 %v6671_v17  ;;  %7986 = vst [vmem:[#allocation82_spill] sm:$0xff] %v6680_v12  ;;  %v6687_v1 = vpack.c.bf16 %v424_v21, %v420_v34  ;;  %v430_v17 = vld [vmem:[#allocation7 + $0xe8] sm:$0xff]  ;;  %v432_v34 = vld [vmem:[#allocation7 + $0xf8] sm:$0xff]  ;;  %v429_v21 = vld [vmem:[#allocation7 + $0xe0] sm:$0xff] }
  0x93   :  { %4548 = vmatprep.subr.bf16.mxu1 %v6673_v50  ;;  %v6692_v50 = vpack.c.bf16 %v423_v0, %v419_v35  ;;  %v6701_v32 = vpack.c.bf16 %v429_v21, %v425_v61  ;;  %v427_v35 = vld [vmem:[#allocation7 + $0xd0] sm:$0xff] }
  0x94   :  { %4518 = vmatpush1.bf16.msra.mxu0 %v6675_v62  ;;  %7988 = vst [vmem:[#allocation84_spill] sm:$0xff] %v6687_v1  ;;  %v426_v62 = vld [vmem:[#allocation7 + $0xc8] sm:$0xff]  ;;  %v431_v0 = vld [vmem:[#allocation7 + $0xf0] sm:$0xff] }
  0x95   :  { %4550 = vmatpush1.bf16.msra.mxu1 %v6680_v12  ;;  %4520 = vmatprep.subr.bf16.mxu0 %v6685_v52  ;;  %7990 = vst [vmem:[#allocation86_spill] sm:$0xff] %v6692_v50  ;;  %v428_v12 = vld [vmem:[#allocation7 + $0xd8] sm:$0xff]  ;;  %v6697_v60 = vpack.c.bf16 %v430_v17, %v426_v62  ;;  %7993 = vst [vmem:[#allocation89_spill] sm:$0xff] %v6701_v32  ;;  %v438_v52 = vld [vmem:[#allocation7 + $0x128] sm:$0xff] }
  0x96   :  { %4552 = vmatprep.subr.bf16.mxu1 %v6687_v1  ;;  %v6699_v31 = vpack.c.bf16 %v432_v34, %v428_v12  ;;  %v6704_v1 = vpack.c.bf16 %v431_v0, %v427_v35  ;;  %v440_v17 = vld [vmem:[#allocation7 + $0x138] sm:$0xff]  ;;  %v433_v62 = vld [vmem:[#allocation7 + $0x100] sm:$0xff]  ;;  %v435_v21 = vld [vmem:[#allocation7 + $0x110] sm:$0xff] }
  0x97   :  { %7991 = vst [vmem:[#allocation87_spill] sm:$0xff] %v6697_v60  ;;  %v6713_v61 = vpack.c.bf16 %v437_v48, %v433_v62  ;;  %v439_v35 = vld [vmem:[#allocation7 + $0x130] sm:$0xff] }
  0x98   :  { %4522 = vmatpush1.bf16.msra.mxu0 %v6689_v49  ;;  %7992 = vst [vmem:[#allocation88_spill] sm:$0xff] %v6699_v31  ;;  %7994 = vst [vmem:[#allocation90_spill] sm:$0xff] %v6704_v1  ;;  %v434_v49 = vld [vmem:[#allocation7 + $0x108] sm:$0xff]  ;;  %v6717_v0 = vpack.c.bf16 %v439_v35, %v435_v21  ;;  %v443_v62 = vld [vmem:[#allocation7 + $0x150] sm:$0xff] }
  0x99   :  { %4554 = vmatpush1.bf16.msra.mxu1 %v6692_v50  ;;  %4524 = vmatprep.subr.bf16.mxu0 %v6697_v60  ;;  %v436_v50 = vld [vmem:[#allocation7 + $0x118] sm:$0xff]  ;;  %v6709_v12 = vpack.c.bf16 %v438_v52, %v434_v49  ;;  %7997 = vst [vmem:[#allocation93_spill] sm:$0xff] %v6713_v61  ;;  %v445_v52 = vld [vmem:[#allocation7 + $0x160] sm:$0xff]  ;;  %v450_v21 = vld [vmem:[#allocation7 + $0x188] sm:$0xff] }
  0x9a   :  { %4556 = vmatprep.subr.bf16.mxu1 %v6699_v31  ;;  %v6711_v34 = vpack.c.bf16 %v440_v17, %v436_v50  ;;  %7998 = vst [vmem:[#allocation94_spill] sm:$0xff] %v6717_v0  ;;  %v446_v31 = vld [vmem:[#allocation7 + $0x168] sm:$0xff]  ;;  %v444_v60 = vld [vmem:[#allocation7 + $0x158] sm:$0xff]  ;;  %v441_v50 = vld [vmem:[#allocation7 + $0x140] sm:$0xff] }
  0x9b   :  { %7995 = vst [vmem:[#allocation91_spill] sm:$0xff] %v6709_v12  ;;  %v448_v49 = vld [vmem:[#allocation7 + $0x178] sm:$0xff]  ;;  %v6725_v17 = vpack.c.bf16 %v445_v52, %v441_v50  ;;  %v451_v50 = vld [vmem:[#allocation7 + $0x190] sm:$0xff] }
  0x9c   :  { %4526 = vmatpush1.bf16.msra.mxu0 %v6701_v32  ;;  %7996 = vst [vmem:[#allocation92_spill] sm:$0xff] %v6711_v34  ;;  %v442_v32 = vld [vmem:[#allocation7 + $0x148] sm:$0xff]  ;;  %v6723_v48 = vpack.c.bf16 %v448_v49, %v444_v60  ;;  %v449_v60 = vld [vmem:[#allocation7 + $0x180] sm:$0xff] }
  0x9d   :  { %4558 = vmatpush1.bf16.msra.mxu1 %v6704_v1  ;;  %4528 = vmatprep.subr.bf16.mxu0 %v6709_v12  ;;  %v6720_v1 = vpack.c.bf16 %v446_v31, %v442_v32  ;;  %8001 = vst [vmem:[#allocation97_spill] sm:$0xff] %v6725_v17  ;;  %v454_v12 = vld [vmem:[#allocation7 + $0x1a8] sm:$0xff]  ;;  %v456_v31 = vld [vmem:[#allocation7 + $0x1b8] sm:$0xff]  ;;  %v453_v49 = vld [vmem:[#allocation7 + $0x1a0] sm:$0xff] }
  0x9e   :  { %4560 = vmatprep.subr.bf16.mxu1 %v6711_v34  ;;  %8000 = vst [vmem:[#allocation96_spill] sm:$0xff] %v6723_v48  ;;  %v447_v34 = vld [vmem:[#allocation7 + $0x170] sm:$0xff]  ;;  %v6731_v32 = vpack.c.bf16 %v454_v12, %v450_v21  ;;  %v6736_v52 = vpack.c.bf16 %v453_v49, %v449_v60  ;;  %v464_v21 = vld [vmem:[#allocation7 + $0x1f8] sm:$0xff]  ;;  %v461_v60 = vld [vmem:[#allocation7 + $0x1e0] sm:$0xff] }
  0x9f   :  { %7999 = vst [vmem:[#allocation95_spill] sm:$0xff] %v6720_v1  ;;  %v6728_v35 = vpack.c.bf16 %v447_v34, %v443_v62  ;;  %v462_v34 = vld [vmem:[#allocation7 + $0x1e8] sm:$0xff]  ;;  %v459_v49 = vld [vmem:[#allocation7 + $0x1d0] sm:$0xff] }
  0xa0   :  { %4530 = vmatpush1.bf16.msra.mxu0 %v6713_v61  ;;  %v452_v61 = vld [vmem:[#allocation7 + $0x198] sm:$0xff]  ;;  %8003 = vst [vmem:[#allocation99_spill] sm:$0xff] %v6731_v32  ;;  %8005 = vst [vmem:[#allocation101_spill] sm:$0xff] %v6736_v52 }
  0xa1   :  { %4562 = vmatpush1.bf16.msra.mxu1 %v6717_v0  ;;  %4532 = vmatprep.subr.bf16.mxu0 %v6720_v1  ;;  %8002 = vst [vmem:[#allocation98_spill] sm:$0xff] %v6728_v35  ;;  %v6733_v25 = vpack.c.bf16 %v456_v31, %v452_v61  ;;  %v455_v0 = vld [vmem:[#allocation7 + $0x1b0] sm:$0xff]  ;;  %v458_v1 = vld [vmem:[#allocation7 + $0x1c8] sm:$0xff]  ;;  %v460_v61 = vld [vmem:[#allocation7 + $0x1d8] sm:$0xff] }
  0xa2   :  { %4564 = vmatprep.subr.bf16.mxu1 %v6723_v48  ;;  %v6740_v62 = vpack.c.bf16 %v455_v0, %v451_v50  ;;  %v6742_v12 = vpack.c.bf16 %v462_v34, %v458_v1  ;;  %v457_v31 = vld [vmem:[#allocation7 + $0x1c0] sm:$0xff]  ;;  %v6745_v48 = vpack.c.bf16 %v464_v21, %v460_v61  ;;  %v6339_v0 = vmov 1  }
  0xa3   :  { %8004 = vst [vmem:[#allocation100_spill] sm:$0xff] %v6733_v25  ;;  %v6748_v8 = vpack.c.bf16 %v461_v60, %v457_v31  ;;  %5967 = vset.pattern.permute.xlu0 %v6339_v0  ;;  %v89_v50 = vlaneseq }
  0xa4   :  { %4534 = vmatpush1.bf16.msra.mxu0 %v6725_v17  ;;  %8006 = vst [vmem:[#allocation102_spill] sm:$0xff] %v6740_v62  ;;  %8007 = vst [vmem:[#allocation103_spill] sm:$0xff] %v6742_v12  ;;  %v463_v17 = vld [vmem:[#allocation7 + $0x1f0] sm:$0xff]  ;;  %842 = vperm.xlu0 %5967, %v6529_v27  }
  0xa5   :  { %4566 = vmatpush1.bf16.msra.mxu1 %v6728_v35  ;;  %4536 = vmatprep.subr.bf16.mxu0 %v6731_v32  ;;  %8008 = vst [vmem:[#allocation104_spill] sm:$0xff] %v6745_v48  ;;  %8009 = vst [vmem:[#allocation105_spill] sm:$0xff] %v6748_v8  ;;  %v6752_v1 = vpack.c.bf16 %v463_v17, %v459_v49  ;;  %v90_v34 = vshrl.u32 %v89_v50, 7  ;;  %v132_v17 = vld [vmem:[%s7694_s1] sm:$0xf] }
  0xa6   :  { %4568 = vmatprep.subr.bf16.mxu1 %v6733_v25  ;;  %v87_v49 = vld [vmem:[%s7695_s2] sm:$0xf] }
  0xa7   :  { %8010 = vst [vmem:[#allocation106_spill] sm:$0xff] %v6752_v1  ;;  %v6760_v61 = vsub.s32 0, %v90_v34  ;;  %v6765_v21 = vsub.s32 1, %v90_v34  ;;  %v6776_v50 = vsub.s32 2, %v90_v34 }
  0xa8   :  { %4538 = vmatpush1.bf16.msra.mxu0 %v6736_v52 }
  0xa9   :  { %4570 = vmatpush1.bf16.msra.mxu1 %v6740_v62  ;;  %4540 = vmatprep.subr.bf16.mxu0 %v6742_v12  ;;  %8011 = vst [vmem:[#allocation107_spill] sm:$0xff] %v6760_v61  ;;  %8012 = vst [vmem:[#allocation108_spill] sm:$0xff] %v6765_v21  ;;  %v6768_v31 = vrot.slane %v132_v17, %v6760_v61  ;;  %v6774_v0 = vrot.slane %v132_v17, %v6765_v21  ;;  %v6790_v62 = vsub.s32 3, %v90_v34 }
  0xaa   :  { %4572 = vmatprep.subr.bf16.mxu1 %v6745_v48  ;;  %8015 = vst [vmem:[#allocation111_spill] sm:$0xff] %v6776_v50  ;;  %v6787_v48 = vrot.slane %v132_v17, %v6776_v50  ;;  %v6794_v32 = vrot.slane %v87_v49, %v6776_v50 }
  0xab   :  { %8013 = vst [vmem:[#allocation109_spill] sm:$0xff] %v6768_v31  ;;  %8014 = vst [vmem:[#allocation110_spill] sm:$0xff] %v6774_v0 }
  0xac   :  { %4542 = vmatpush1.bf16.msra.mxu0 %v6748_v8  ;;  %8018 = vst [vmem:[#allocation114_spill] sm:$0xff] %v6787_v48 }
  0xad   :  { %4574 = vmatpush1.bf16.msra.mxu1 %v6752_v1  ;;  %4576 = vmatprep.subr.bf16.mxu0 %v6458_v6  ;;  %v6783_v1 = vrot.slane %v87_v49, %v6765_v21 }
  0xae   :  { %4608 = vmatprep.subr.bf16.mxu1 %v6460_v10  ;;  %v6779_v10 = vrot.slane %v87_v49, %v6760_v61 }
  0xaf   :  { %8017 = vst [vmem:[#allocation113_spill] sm:$0xff] %v6783_v1 }
  0xb0   :  { %8016 = vst [vmem:[#allocation112_spill] sm:$0xff] %v6779_v10 }
  0xe1   :  { %v136_v60 = vpop.permute.xlu0 %135 }
  0xe2   :  { %v159_v6 = vmul.f32 %v6768_v31, %v136_v60  ;;  %v160_v8 = vmul.f32 %v6774_v0, %v136_v60  ;;  %v161_v35 = vmul.f32 %v6787_v48, %v136_v60  ;;  %v6798_v0 = vrot.slane %v132_v17, %v6790_v62 }
  0xe4   :  { %v163_v12 = vadd.f32 %v159_v6, %v6779_v10  ;;  %v164_v52 = vadd.f32 %v160_v8, %v6783_v1  ;;  %v165_v6 = vadd.f32 %v161_v35, %v6794_v32  ;;  %v6802_v8 = vrot.slane %v87_v49, %v6790_v62 }
  0xe5   :  { %v162_v1 = vmul.f32 %v6798_v0, %v136_v60 }
 0x142   :  { %v297_v25 = vpop.f32.mrb[0].mxu0 }
 0x143   :  { %v373_v31 = vadd.f32 %v297_v25, %v163_v12  ;;  %v368_v21 = vpop.f32.mrb[0].mxu1  ;;  %v299_v61 = vpop.f32.mrb[1].mxu0  ;;  %v166_v25 = vadd.f32 %v162_v1, %v6802_v8 }
 0x144   :  { %v374_v27 = vadd.f32 %v299_v61, %v164_v52  ;;  %v370_v7 = vpop.f32.mrb[1].mxu1  ;;  %v375_v48 = vadd.f32 %v368_v21, %v165_v6  ;;  %v8021_v6 = vld [vmem:[#allocation55_spill] sm:$0xff] }
 0x145   :  { %v4332_v5 = vmul.f32 -1.442695, %v373_v31  ;;  %v376_v10 = vadd.f32 %v370_v7, %v166_v25  ;;  %v8022_v25 = vld [vmem:[#allocation56_spill] sm:$0xff] }
 0x146   :  { %v4333_v34 = vmul.f32 -1.442695, %v374_v27  ;;  %v4334_v12 = vmul.f32 -1.442695, %v375_v48 }
 0x147   :  { %5975 = vpow2.f32 %v4332_v5 }
 0x148   :  { %5977 = vpow2.f32 %v4333_v34 }
 0x149   :  { %5979 = vpow2.f32 %v4334_v12  ;;  %v8023_v12 = vld [vmem:[#allocation57_spill] sm:$0xff] }
 0x14a   :  { %5981 = vtanh.f32 %v376_v10  ;;  %v8019_v10 = vld [vmem:[#allocation53_spill] sm:$0xff] }
 0x151   :  { %v5976_v17 = vpop.eup %5975 }
 0x152   :  { %v386_v50 = vadd.f32 1.0, %v5976_v17  ;;  %v5978_v52 = vpop.eup %5977  ;;  %v8024_v17 = vld [vmem:[#allocation58_spill] sm:$0xff] }
 0x153   :  { %v387_v35 = vadd.f32 1.0, %v5978_v52  ;;  %v5980_v27 = vpop.eup %5979  ;;  %v8025_v52 = vld [vmem:[#allocation59_spill] sm:$0xff] }
 0x154   :  { %5983 = vrcp.f32 %v386_v50  ;;  %v5982_v5 = vpop.eup %5981  ;;  %v388_v60 = vadd.f32 1.0, %v5980_v27  ;;  %v8020_v50 = vld [vmem:[#allocation54_spill] sm:$0xff]  ;;  %v8027_v27 = vld [vmem:[#allocation61_spill] sm:$0xff] }
 0x155   :  { %5985 = vrcp.f32 %v387_v35  ;;  %v8026_v35 = vld [vmem:[#allocation60_spill] sm:$0xff] }
 0x156   :  { %5987 = vrcp.f32 %v388_v60  ;;  %v8032_v60 = vld [vmem:[#allocation66_spill] sm:$0xff] }
 0x15e   :  { %v5984_v61 = vpop.eup %5983 }
 0x15f   :  { %v397_v31 = vmul.f32 %v5984_v61, %v5982_v5  ;;  %v5986_v49 = vpop.eup %5985  ;;  %v8028_v5 = vld [vmem:[#allocation62_spill] sm:$0xff]  ;;  %v8029_v61 = vld [vmem:[#allocation63_spill] sm:$0xff] }
 0x160   :  { %v396_v34 = vmul.f32 0.0, %v5986_v49  ;;  %v5988_v7 = vpop.eup %5987  ;;  %v8031_v49 = vld [vmem:[#allocation65_spill] sm:$0xff] }
 0x162   :  { %v6806_v21 = vadd.f32 %v397_v31, %v396_v34  ;;  %v8030_v31 = vld [vmem:[#allocation64_spill] sm:$0xff]  ;;  %v8033_v34 = vld [vmem:[#allocation67_spill] sm:$0xff] }
 0x164   :  { %5989 = vtanh.f32 %v6806_v21 }
 0x16e   :  { %v5990_v48 = vpop.eup %5989 }
 0x16f   :  { %v400_v1 = vmul.f32 %v5990_v48, %v5988_v7  ;;  %v8034_v7 = vld [vmem:[#allocation68_spill] sm:$0xff]  ;;  %v8035_v48 = vld [vmem:[#allocation69_spill] sm:$0xff] }
 0x171   :  { %736 = vmatmul.mubr.f32.vlgmr.msra.gmra.mrb[2].mxu0 %v400_v1  ;;  %807 = vmatmul.mubr.f32.vlgmr.msra.gmra.mrb[2].mxu1 %v400_v1 }
 0x172   :  { %4578 = vmatpush1.bf16.msra.mxu0 %v6462_v11  ;;  %4610 = vmatpush1.bf16.msra.mxu1 %v6465_v15 }
 0x173   :  { %4580 = vmatprep.subr.bf16.mxu0 %v6469_v19  ;;  %4612 = vmatprep.subr.bf16.mxu1 %v6471_v20 }
 0x174   :  { %917 = vmatprep.mubr.f32.mxu0 %v7981_v36  ;;  %988 = vmatprep.mubr.f32.mxu1 %v7981_v36 }
 0x176   :  { %4582 = vmatpush1.bf16.msra.mxu0 %v6474_v24  ;;  %4614 = vmatpush1.bf16.msra.mxu1 %v6478_v28 }
 0x177   :  { %4584 = vmatprep.subr.bf16.mxu0 %v6480_v29  ;;  %4616 = vmatprep.subr.bf16.mxu1 %v6482_v33 }
 0x17a   :  { %4586 = vmatpush1.bf16.msra.mxu0 %v6485_v37  ;;  %4618 = vmatpush1.bf16.msra.mxu1 %v6489_v41 }
 0x17b   :  { %4588 = vmatprep.subr.bf16.mxu0 %v6491_v42  ;;  %4620 = vmatprep.subr.bf16.mxu1 %v6494_v46 }
 0x17e   :  { %4590 = vmatpush1.bf16.msra.mxu0 %v6497_v53  ;;  %4622 = vmatpush1.bf16.msra.mxu1 %v6501_v54 }
 0x17f   :  { %4592 = vmatprep.subr.bf16.mxu0 %v6503_v55  ;;  %4624 = vmatprep.subr.bf16.mxu1 %v6506_v59 }
 0x182   :  { %4594 = vmatpush1.bf16.msra.mxu0 %v6509_v2  ;;  %4626 = vmatpush1.bf16.msra.mxu1 %v6513_v3 }
 0x183   :  { %4596 = vmatprep.subr.bf16.mxu0 %v6515_v4  ;;  %4628 = vmatprep.subr.bf16.mxu1 %v6518_v9 }
 0x186   :  { %4598 = vmatpush1.bf16.msra.mxu0 %v6521_v18  ;;  %4630 = vmatpush1.bf16.msra.mxu1 %v6525_v22 }
 0x187   :  { %4600 = vmatprep.subr.bf16.mxu0 %v6527_v23  ;;  %4632 = vmatprep.subr.bf16.mxu1 %v6532_v30 }
 0x18a   :  { %4602 = vmatpush1.bf16.msra.mxu0 %v6536_v38  ;;  %4634 = vmatpush1.bf16.msra.mxu1 %v6540_v39 }
 0x18b   :  { %4604 = vmatprep.subr.bf16.mxu0 %v6542_v40  ;;  %4636 = vmatprep.subr.bf16.mxu1 %v6545_v47 }
 0x18e   :  { %4606 = vmatpush1.bf16.msra.mxu0 %v6548_v56  ;;  %4638 = vmatpush1.bf16.msra.mxu1 %v6552_v57 }
 0x18f   :  { %4640 = vmatprep.subr.bf16.mxu0 %v6554_v58  ;;  %4672 = vmatprep.subr.bf16.mxu1 %v6557_v63 }
 0x191   :  { %918 = vmatmul.mubr.f32.vlgmr.msra.gmra.mrb[4].mxu0 %v400_v1  ;;  %989 = vmatmul.mubr.f32.vlgmr.msra.gmra.mrb[4].mxu1 %v400_v1  ;;  %v8036_v1 = vld [vmem:[#allocation70_spill] sm:$0xff] }
 0x192   :  { %4642 = vmatpush1.bf16.msra.mxu0 %v6560_v13  ;;  %4674 = vmatpush1.bf16.msra.mxu1 %v6564_v14 }
 0x193   :  { %4644 = vmatprep.subr.bf16.mxu0 %v6566_v16  ;;  %4676 = vmatprep.subr.bf16.mxu1 %v6569_v26 }
 0x194   :  { %1087 = vmatprep.mubr.f32.mxu0 %v7981_v36  ;;  %1158 = vmatprep.mubr.f32.mxu1 %v7981_v36 }
 0x196   :  { %4646 = vmatpush1.bf16.msra.mxu0 %v6574_v43  ;;  %4678 = vmatpush1.bf16.msra.mxu1 %v6578_v44 }
 0x197   :  { %4648 = vmatprep.subr.bf16.mxu0 %v6580_v45  ;;  %4680 = vmatprep.subr.bf16.mxu1 %v6583_v51  ;;  %v8055_v45 = vld [vmem:[#allocation114_spill] sm:$0xff] }
 0x19a   :  { %4650 = vmatpush1.bf16.msra.mxu0 %v8019_v10  ;;  %4682 = vmatpush1.bf16.msra.mxu1 %v8020_v50 }
 0x19b   :  { %4652 = vmatprep.subr.bf16.mxu0 %v8021_v6  ;;  %4684 = vmatprep.subr.bf16.mxu1 %v8022_v25 }
 0x19e   :  { %4654 = vmatpush1.bf16.msra.mxu0 %v8023_v12  ;;  %4686 = vmatpush1.bf16.msra.mxu1 %v8024_v17  ;;  %v8048_v12 = vld [vmem:[#allocation111_spill] sm:$0xff] }
 0x19f   :  { %4656 = vmatprep.subr.bf16.mxu0 %v8025_v52  ;;  %4688 = vmatprep.subr.bf16.mxu1 %v8026_v35  ;;  %v8037_v35 = vld [vmem:[#allocation71_spill] sm:$0xff] }
 0x1a2   :  { %4658 = vmatpush1.bf16.msra.mxu0 %v8027_v27  ;;  %4690 = vmatpush1.bf16.msra.mxu1 %v8028_v5  ;;  %v8038_v27 = vld [vmem:[#allocation72_spill] sm:$0xff]  ;;  %v8039_v5 = vld [vmem:[#allocation73_spill] sm:$0xff] }
 0x1a3   :  { %4660 = vmatprep.subr.bf16.mxu0 %v8029_v61  ;;  %4692 = vmatprep.subr.bf16.mxu1 %v8030_v31  ;;  %v8040_v61 = vld [vmem:[#allocation74_spill] sm:$0xff]  ;;  %v8041_v31 = vld [vmem:[#allocation75_spill] sm:$0xff] }
 0x1a6   :  { %4662 = vmatpush1.bf16.msra.mxu0 %v8031_v49  ;;  %4694 = vmatpush1.bf16.msra.mxu1 %v8032_v60  ;;  %v8042_v49 = vld [vmem:[#allocation76_spill] sm:$0xff]  ;;  %v6340_v60 = vmov 2  }
 0x1a7   :  { %4664 = vmatprep.subr.bf16.mxu0 %v8033_v34  ;;  %4696 = vmatprep.subr.bf16.mxu1 %v8034_v7  ;;  %v8043_v34 = vld [vmem:[#allocation35_spill] sm:$0xff] }
 0x1a8   :  { %5968 = vset.pattern.permute.xlu1 %v6340_v60 }
 0x1a9   :  { %1336 = vperm.xlu1 %5968, %v8043_v34  }
 0x1aa   :  { %4666 = vmatpush1.bf16.msra.mxu0 %v8035_v48  ;;  %4698 = vmatpush1.bf16.msra.mxu1 %v8036_v1  ;;  %v109_v1 = vld [vmem:[%s7699_s6] sm:$0xf] }
 0x1ab   :  { %4668 = vmatprep.subr.bf16.mxu0 %v8037_v35  ;;  %4700 = vmatprep.subr.bf16.mxu1 %v8038_v27  ;;  %v8044_v48 = vld [vmem:[#allocation107_spill] sm:$0xff]  ;;  %v8046_v27 = vld [vmem:[#allocation108_spill] sm:$0xff]  ;;  %v6890_v25 = vrot.slane %v109_v1, %v8048_v12  ;;  %v8051_v12 = vld [vmem:[#allocation109_spill] sm:$0xff] }
 0x1ac   :  { %v6882_v35 = vrot.slane %v109_v1, %v8044_v48  ;;  %v6885_v7 = vrot.slane %v109_v1, %v8046_v27  ;;  %v6893_v48 = vrot.slane %v109_v1, %v6790_v62 }
 0x1ad   :  { %8049 = vst [vmem:[#allocation108_spill] sm:$0xff] %v6890_v25 }
 0x1ae   :  { %4670 = vmatpush1.bf16.msra.mxu0 %v8039_v5  ;;  %4702 = vmatpush1.bf16.msra.mxu1 %v8040_v61  ;;  %8045 = vst [vmem:[#allocation35_spill] sm:$0xff] %v6882_v35  ;;  %8047 = vst [vmem:[#allocation107_spill] sm:$0xff] %v6885_v7 }
 0x1af   :  { %4704 = vmatprep.subr.bf16.mxu0 %v8041_v31  ;;  %4736 = vmatprep.subr.bf16.mxu1 %v8042_v49  ;;  %8050 = vst [vmem:[#allocation111_spill] sm:$0xff] %v6893_v48 }
 0x244   :  { %v737_v5 = vpop.f32.mrb[2].mxu0  ;;  %v808_v61 = vpop.f32.mrb[2].mxu1 }
 0x245   :  { %v813_v31 = vadd.f32 %v737_v5, %v6882_v35  ;;  %v739_v52 = vpop.f32.mrb[3].mxu0  ;;  %v810_v49 = vpop.f32.mrb[3].mxu1  ;;  %v815_v27 = vadd.f32 %v808_v61, %v6890_v25  ;;  %v8053_v25 = vld [vmem:[#allocation112_spill] sm:$0xff] }
 0x246   :  { %v814_v60 = vadd.f32 %v739_v52, %v6885_v7  ;;  %v816_v6 = vadd.f32 %v810_v49, %v6893_v48 }
 0x247   :  { %v4335_v17 = vmul.f32 -1.442695, %v813_v31  ;;  %v4337_v50 = vmul.f32 -1.442695, %v815_v27 }
 0x248   :  { %v4336_v34 = vmul.f32 -1.442695, %v814_v60 }
 0x249   :  { %5991 = vpow2.f32 %v4335_v17  ;;  %v843_v17 = vpop.permute.xlu0 %842 }
 0x24a   :  { %5993 = vpow2.f32 %v4336_v34  ;;  %v845_v31 = vmul.f32 %v843_v17, %v8051_v12  ;;  %v8052_v34 = vld [vmem:[#allocation110_spill] sm:$0xff]  ;;  %v847_v12 = vmul.f32 %v843_v17, %v8055_v45 }
 0x24b   :  { %5995 = vtanh.f32 %v816_v6  ;;  %v846_v62 = vmul.f32 %v843_v17, %v8052_v34 }
 0x24c   :  { %5997 = vpow2.f32 %v4337_v50  ;;  %v849_v49 = vadd.f32 %v845_v31, %v8053_v25 }
 0x253   :  { %v5992_v5 = vpop.eup %5991 }
 0x254   :  { %v826_v35 = vadd.f32 1.0, %v5992_v5  ;;  %v5994_v10 = vpop.eup %5993  ;;  %v8054_v5 = vld [vmem:[#allocation113_spill] sm:$0xff] }
 0x255   :  { %v827_v52 = vadd.f32 1.0, %v5994_v10  ;;  %v5996_v60 = vpop.eup %5995  ;;  %v850_v6 = vadd.f32 %v846_v62, %v8054_v5  ;;  %v851_v62 = vadd.f32 %v847_v12, %v6794_v32 }
 0x256   :  { %5999 = vrcp.f32 %v826_v35  ;;  %v5998_v1 = vpop.eup %5997 }
 0x257   :  { %6001 = vrcp.f32 %v827_v52  ;;  %v828_v48 = vadd.f32 1.0, %v5998_v1 }
 0x259   :  { %6003 = vrcp.f32 %v828_v48 }
 0x260   :  { %v6000_v7 = vpop.eup %5999 }
 0x261   :  { %v837_v61 = vmul.f32 %v6000_v7, %v5996_v60  ;;  %v6002_v27 = vpop.eup %6001  ;;  %v848_v60 = vmul.f32 %v843_v17, %v6798_v0  ;;  %v8056_v17 = vld [vmem:[#allocation77_spill] sm:$0xff] }
 0x262   :  { %v836_v51 = vmul.f32 0.0, %v6002_v27 }
 0x264   :  { %v919_v50 = vpop.f32.mrb[4].mxu0  ;;  %v990_v35 = vpop.f32.mrb[4].mxu1  ;;  %v6901_v10 = vadd.f32 %v837_v61, %v836_v51  ;;  %v852_v51 = vadd.f32 %v848_v60, %v6802_v8  ;;  %v8064_v60 = vld [vmem:[#allocation85_spill] sm:$0xff] }
 0x265   :  { %v995_v52 = vadd.f32 %v919_v50, %v849_v49  ;;  %v921_v44 = vpop.f32.mrb[5].mxu0  ;;  %v992_v43 = vpop.f32.mrb[5].mxu1  ;;  %v997_v1 = vadd.f32 %v990_v35, %v851_v62  ;;  %v8059_v35 = vld [vmem:[#allocation80_spill] sm:$0xff]  ;;  %v8065_v62 = vld [vmem:[#allocation86_spill] sm:$0xff] }
 0x266   :  { %v996_v34 = vadd.f32 %v921_v44, %v850_v6  ;;  %6005 = vtanh.f32 %v6901_v10  ;;  %v6004_v61 = vpop.eup %6003  ;;  %v998_v49 = vadd.f32 %v992_v43, %v852_v51  ;;  %v8057_v6 = vld [vmem:[#allocation78_spill] sm:$0xff]  ;;  %v8060_v43 = vld [vmem:[#allocation81_spill] sm:$0xff] }
 0x267   :  { %v4338_v7 = vmul.f32 -1.442695, %v995_v52  ;;  %v4340_v50 = vmul.f32 -1.442695, %v997_v1  ;;  %v8058_v52 = vld [vmem:[#allocation79_spill] sm:$0xff] }
 0x268   :  { %v4339_v31 = vmul.f32 -1.442695, %v996_v34  ;;  %v8066_v1 = vld [vmem:[#allocation87_spill] sm:$0xff] }
 0x269   :  { %6007 = vpow2.f32 %v4338_v7  ;;  %v8062_v7 = vld [vmem:[#allocation83_spill] sm:$0xff] }
 0x26a   :  { %6009 = vpow2.f32 %v4339_v31  ;;  %v8063_v31 = vld [vmem:[#allocation84_spill] sm:$0xff] }
 0x26b   :  { %6011 = vtanh.f32 %v998_v49 }
 0x26c   :  { %6013 = vpow2.f32 %v4340_v50 }
 0x270   :  { %v6006_v27 = vpop.eup %6005 }
 0x271   :  { %v840_v45 = vmul.f32 %v6006_v27, %v6004_v61  ;;  %v8067_v61 = vld [vmem:[#allocation88_spill] sm:$0xff] }
 0x273   :  { %v6008_v48 = vpop.eup %6007  ;;  %1088 = vmatmul.mubr.f32.vlgmr.msra.gmra.mrb[6].mxu0 %v840_v45  ;;  %1159 = vmatmul.mubr.f32.vlgmr.msra.gmra.mrb[6].mxu1 %v840_v45  ;;  %v8061_v45 = vld [vmem:[#allocation82_spill] sm:$0xff] }
 0x274   :  { %v1008_v44 = vadd.f32 1.0, %v6008_v48  ;;  %v6010_v34 = vpop.eup %6009  ;;  %4706 = vmatpush1.bf16.msra.mxu0 %v8056_v17  ;;  %4738 = vmatpush1.bf16.msra.mxu1 %v8057_v6  ;;  %v8068_v48 = vld [vmem:[#allocation89_spill] sm:$0xff] }
 0x275   :  { %v1009_v12 = vadd.f32 1.0, %v6010_v34  ;;  %4708 = vmatprep.subr.bf16.mxu0 %v8058_v52  ;;  %4740 = vmatprep.subr.bf16.mxu1 %v8059_v35  ;;  %v6012_v51 = vpop.eup %6011 }
 0x276   :  { %6015 = vrcp.f32 %v1008_v44  ;;  %1229 = vmatprep.mubr.f32.mxu0 %v7981_v36  ;;  %1300 = vmatprep.mubr.f32.mxu1 %v7981_v36  ;;  %v6014_v49 = vpop.eup %6013  ;;  %v8069_v44 = vld [vmem:[#allocation90_spill] sm:$0xff] }
 0x277   :  { %6017 = vrcp.f32 %v1009_v12  ;;  %v1010_v12 = vadd.f32 1.0, %v6014_v49  ;;  %v8076_v49 = vld [vmem:[#allocation97_spill] sm:$0xff] }
 0x278   :  { %4710 = vmatpush1.bf16.msra.mxu0 %v8060_v43  ;;  %4742 = vmatpush1.bf16.msra.mxu1 %v8061_v45 }
 0x279   :  { %4712 = vmatprep.subr.bf16.mxu0 %v8062_v7  ;;  %4744 = vmatprep.subr.bf16.mxu1 %v8063_v31  ;;  %v8070_v7 = vld [vmem:[#allocation91_spill] sm:$0xff]  ;;  %v8071_v31 = vld [vmem:[#allocation92_spill] sm:$0xff]  ;;  %6019 = vrcp.f32 %v1010_v12 }
 0x27a   :  { %v8083_v12 = vld [vmem:[#allocation104_spill] sm:$0xff] }
 0x27c   :  { %4714 = vmatpush1.bf16.msra.mxu0 %v8064_v60  ;;  %4746 = vmatpush1.bf16.msra.mxu1 %v8065_v62 }
 0x27d   :  { %4716 = vmatprep.subr.bf16.mxu0 %v8066_v1  ;;  %4748 = vmatprep.subr.bf16.mxu1 %v8067_v61  ;;  %v8072_v1 = vld [vmem:[#allocation93_spill] sm:$0xff]  ;;  %v8073_v61 = vld [vmem:[#allocation94_spill] sm:$0xff] }
 0x280   :  { %v6016_v27 = vpop.eup %6015  ;;  %4718 = vmatpush1.bf16.msra.mxu0 %v8068_v48  ;;  %4750 = vmatpush1.bf16.msra.mxu1 %v8069_v44 }
 0x281   :  { %v1019_v50 = vmul.f32 %v6016_v27, %v6012_v51  ;;  %v6018_v34 = vpop.eup %6017  ;;  %4720 = vmatprep.subr.bf16.mxu0 %v8070_v7  ;;  %4752 = vmatprep.subr.bf16.mxu1 %v8071_v31  ;;  %v8074_v51 = vld [vmem:[#allocation95_spill] sm:$0xff]  ;;  %v8075_v27 = vld [vmem:[#allocation96_spill] sm:$0xff]  ;;  %v8077_v7 = vld [vmem:[#allocation98_spill] sm:$0xff] }
 0x282   :  { %v1018_v62 = vmul.f32 %v6018_v34, %v6806_v21  ;;  %v8078_v31 = vld [vmem:[#allocation99_spill] sm:$0xff]  ;;  %v8079_v21 = vld [vmem:[#allocation100_spill] sm:$0xff] }
 0x283   :  { %v8082_v34 = vld [vmem:[#allocation103_spill] sm:$0xff] }
 0x284   :  { %v6927_v60 = vadd.f32 %v1019_v50, %v1018_v62  ;;  %4722 = vmatpush1.bf16.msra.mxu0 %v8072_v1  ;;  %4754 = vmatpush1.bf16.msra.mxu1 %v8073_v61  ;;  %v8080_v62 = vld [vmem:[#allocation101_spill] sm:$0xff]  ;;  %v8081_v50 = vld [vmem:[#allocation102_spill] sm:$0xff] }
 0x285   :  { %4724 = vmatprep.subr.bf16.mxu0 %v8074_v51  ;;  %4756 = vmatprep.subr.bf16.mxu1 %v8075_v27  ;;  %v6020_v51 = vpop.eup %6019  ;;  %v8084_v61 = vld [vmem:[#allocation105_spill] sm:$0xff]  ;;  %v8085_v1 = vld [vmem:[#allocation106_spill] sm:$0xff] }
 0x286   :  { %6021 = vtanh.f32 %v6927_v60 }
 0x288   :  { %4726 = vmatpush1.bf16.msra.mxu0 %v8076_v49  ;;  %4758 = vmatpush1.bf16.msra.mxu1 %v8077_v7  ;;  %v8086_v7 = vld [vmem:[#allocation13_spill] sm:$0xff] }
 0x289   :  { %4728 = vmatprep.subr.bf16.mxu0 %v8078_v31  ;;  %4760 = vmatprep.subr.bf16.mxu1 %v8079_v21  ;;  %v8087_v31 = vld [vmem:[#allocation14_spill] sm:$0xff] }
 0x28c   :  { %4730 = vmatpush1.bf16.msra.mxu0 %v8080_v62  ;;  %4762 = vmatpush1.bf16.msra.mxu1 %v8081_v50 }
 0x28d   :  { %4732 = vmatprep.subr.bf16.mxu0 %v8082_v34  ;;  %4764 = vmatprep.subr.bf16.mxu1 %v8083_v12 }
 0x290   :  { %v6022_v27 = vpop.eup %6021  ;;  %4734 = vmatpush1.bf16.msra.mxu0 %v8084_v61  ;;  %4766 = vmatpush1.bf16.msra.mxu1 %v8085_v1 }
 0x291   :  { %v1022_v49 = vmul.f32 %v6022_v27, %v6020_v51  ;;  %4768 = vmatprep.subr.bf16.mxu0 %v8086_v7  ;;  %4800 = vmatprep.subr.bf16.mxu1 %v8087_v31  ;;  %v8088_v51 = vld [vmem:[#allocation49_spill] sm:$0xff]  ;;  %v8089_v27 = vld [vmem:[#allocation50_spill] sm:$0xff] }
 0x293   :  { %1230 = vmatmul.mubr.f32.vlgmr.msra.gmra.mrb[6].mxu0 %v1022_v49  ;;  %1301 = vmatmul.mubr.f32.vlgmr.msra.gmra.mrb[6].mxu1 %v1022_v49 }
 0x294   :  { %4770 = vmatpush1.bf16.msra.mxu0 %v6462_v11  ;;  %4802 = vmatpush1.bf16.msra.mxu1 %v6465_v15 }
 0x295   :  { %4772 = vmatprep.subr.bf16.mxu0 %v6469_v19  ;;  %4804 = vmatprep.subr.bf16.mxu1 %v6471_v20 }
 0x296   :  { %1411 = vmatprep.mubr.f32.mxu0 %v7981_v36  ;;  %1482 = vmatprep.mubr.f32.mxu1 %v7981_v36 }
 0x298   :  { %4774 = vmatpush1.bf16.msra.mxu0 %v6474_v24  ;;  %4806 = vmatpush1.bf16.msra.mxu1 %v6478_v28 }
 0x299   :  { %4776 = vmatprep.subr.bf16.mxu0 %v6480_v29  ;;  %4808 = vmatprep.subr.bf16.mxu1 %v6482_v33 }
 0x29c   :  { %4778 = vmatpush1.bf16.msra.mxu0 %v6485_v37  ;;  %4810 = vmatpush1.bf16.msra.mxu1 %v6489_v41 }
 0x29d   :  { %4780 = vmatprep.subr.bf16.mxu0 %v6491_v42  ;;  %4812 = vmatprep.subr.bf16.mxu1 %v6494_v46 }
 0x2a0   :  { %4782 = vmatpush1.bf16.msra.mxu0 %v6497_v53  ;;  %4814 = vmatpush1.bf16.msra.mxu1 %v6501_v54 }
 0x2a1   :  { %4784 = vmatprep.subr.bf16.mxu0 %v6503_v55  ;;  %4816 = vmatprep.subr.bf16.mxu1 %v6506_v59 }
 0x2a4   :  { %4786 = vmatpush1.bf16.msra.mxu0 %v6509_v2  ;;  %4818 = vmatpush1.bf16.msra.mxu1 %v6513_v3 }
 0x2a5   :  { %4788 = vmatprep.subr.bf16.mxu0 %v6515_v4  ;;  %4820 = vmatprep.subr.bf16.mxu1 %v6518_v9 }
 0x2a8   :  { %4790 = vmatpush1.bf16.msra.mxu0 %v6521_v18  ;;  %4822 = vmatpush1.bf16.msra.mxu1 %v6525_v22  ;;  %v8121_v18 = vld [vmem:[#allocation109_spill] sm:$0xff] }
 0x2a9   :  { %4792 = vmatprep.subr.bf16.mxu0 %v6527_v23  ;;  %4824 = vmatprep.subr.bf16.mxu1 %v6532_v30 }
 0x2ac   :  { %4794 = vmatpush1.bf16.msra.mxu0 %v6536_v38  ;;  %4826 = vmatpush1.bf16.msra.mxu1 %v6540_v39  ;;  %v8120_v38 = vld [vmem:[#allocation111_spill] sm:$0xff] }
 0x2ad   :  { %4796 = vmatprep.subr.bf16.mxu0 %v6542_v40  ;;  %4828 = vmatprep.subr.bf16.mxu1 %v6545_v47  ;;  %v8118_v40 = vld [vmem:[#allocation107_spill] sm:$0xff] }
 0x2b0   :  { %4798 = vmatpush1.bf16.msra.mxu0 %v6548_v56  ;;  %4830 = vmatpush1.bf16.msra.mxu1 %v6552_v57  ;;  %v8097_v57 = vld [vmem:[#allocation58_spill] sm:$0xff]  ;;  %v8098_v56 = vld [vmem:[#allocation59_spill] sm:$0xff] }
 0x2b1   :  { %4832 = vmatprep.subr.bf16.mxu0 %v6554_v58  ;;  %4864 = vmatprep.subr.bf16.mxu1 %v6557_v63  ;;  %v8090_v58 = vld [vmem:[#allocation51_spill] sm:$0xff]  ;;  %v8091_v63 = vld [vmem:[#allocation52_spill] sm:$0xff] }
 0x2b3   :  { %1412 = vmatmul.mubr.f32.vlgmr.msra.gmra.mrb[8].mxu0 %v1022_v49  ;;  %1483 = vmatmul.mubr.f32.vlgmr.msra.gmra.mrb[8].mxu1 %v1022_v49  ;;  %v8092_v49 = vld [vmem:[#allocation53_spill] sm:$0xff] }
 0x2b4   :  { %4834 = vmatpush1.bf16.msra.mxu0 %v6560_v13  ;;  %4866 = vmatpush1.bf16.msra.mxu1 %v6564_v14  ;;  %v8093_v13 = vld [vmem:[#allocation54_spill] sm:$0xff]  ;;  %v8094_v14 = vld [vmem:[#allocation55_spill] sm:$0xff] }
 0x2b5   :  { %4836 = vmatprep.subr.bf16.mxu0 %v6566_v16  ;;  %4868 = vmatprep.subr.bf16.mxu1 %v6569_v26  ;;  %v8095_v16 = vld [vmem:[#allocation56_spill] sm:$0xff]  ;;  %v8096_v26 = vld [vmem:[#allocation57_spill] sm:$0xff] }
 0x2b6   :  { %1581 = vmatprep.mubr.f32.mxu0 %v7981_v36  ;;  %1652 = vmatprep.mubr.f32.mxu1 %v7981_v36 }
 0x2b8   :  { %4838 = vmatpush1.bf16.msra.mxu0 %v8088_v51  ;;  %4870 = vmatpush1.bf16.msra.mxu1 %v8089_v27  ;;  %v8099_v51 = vld [vmem:[#allocation60_spill] sm:$0xff]  ;;  %v8100_v27 = vld [vmem:[#allocation61_spill] sm:$0xff] }
 0x2b9   :  { %4840 = vmatprep.subr.bf16.mxu0 %v8090_v58  ;;  %4872 = vmatprep.subr.bf16.mxu1 %v8091_v63  ;;  %v8101_v58 = vld [vmem:[#allocation62_spill] sm:$0xff]  ;;  %v8102_v63 = vld [vmem:[#allocation63_spill] sm:$0xff] }
 0x2bc   :  { %4842 = vmatpush1.bf16.msra.mxu0 %v8092_v49  ;;  %4874 = vmatpush1.bf16.msra.mxu1 %v8093_v13  ;;  %v8103_v49 = vld [vmem:[#allocation64_spill] sm:$0xff]  ;;  %v8104_v13 = vld [vmem:[#allocation65_spill] sm:$0xff] }
 0x2bd   :  { %4844 = vmatprep.subr.bf16.mxu0 %v8094_v14  ;;  %4876 = vmatprep.subr.bf16.mxu1 %v8095_v16  ;;  %v8105_v14 = vld [vmem:[#allocation66_spill] sm:$0xff]  ;;  %v8106_v16 = vld [vmem:[#allocation67_spill] sm:$0xff] }
 0x2c0   :  { %4846 = vmatpush1.bf16.msra.mxu0 %v8096_v26  ;;  %4878 = vmatpush1.bf16.msra.mxu1 %v8097_v57  ;;  %v8107_v26 = vld [vmem:[#allocation68_spill] sm:$0xff]  ;;  %v8108_v57 = vld [vmem:[#allocation69_spill] sm:$0xff] }
 0x2c1   :  { %4848 = vmatprep.subr.bf16.mxu0 %v8098_v56  ;;  %4880 = vmatprep.subr.bf16.mxu1 %v8099_v51  ;;  %v8109_v56 = vld [vmem:[#allocation70_spill] sm:$0xff]  ;;  %v8110_v51 = vld [vmem:[#allocation71_spill] sm:$0xff] }
 0x2c4   :  { %4850 = vmatpush1.bf16.msra.mxu0 %v8100_v27  ;;  %4882 = vmatpush1.bf16.msra.mxu1 %v8101_v58  ;;  %v8111_v27 = vld [vmem:[#allocation72_spill] sm:$0xff]  ;;  %v8112_v58 = vld [vmem:[#allocation73_spill] sm:$0xff] }
 0x2c5   :  { %4852 = vmatprep.subr.bf16.mxu0 %v8102_v63  ;;  %4884 = vmatprep.subr.bf16.mxu1 %v8103_v49  ;;  %v8113_v63 = vld [vmem:[#allocation74_spill] sm:$0xff]  ;;  %v8114_v49 = vld [vmem:[#allocation75_spill] sm:$0xff] }
 0x2c8   :  { %4854 = vmatpush1.bf16.msra.mxu0 %v8104_v13  ;;  %4886 = vmatpush1.bf16.msra.mxu1 %v8105_v14  ;;  %v8115_v13 = vld [vmem:[#allocation76_spill] sm:$0xff]  ;;  %v6341_v14 = vmov 3  }
 0x2c9   :  { %4856 = vmatprep.subr.bf16.mxu0 %v8106_v16  ;;  %4888 = vmatprep.subr.bf16.mxu1 %v8107_v26  ;;  %v7014_v16 = vld [vmem:[#allocation3] sm:$0xff]  ;;  %v8117_v26 = vld [vmem:[#allocation35_spill] sm:$0xff] }
 0x2ca   :  { %5969 = vset.pattern.permute.xlu1 %v6341_v14  ;;  %8116 = vst [vmem:[#allocation112_spill] sm:$0xff] %v7014_v16 }
 0x2cb   :  { %1830 = vperm.xlu1 %5969, %v7014_v16  }
 0x2cc   :  { %4858 = vmatpush1.bf16.msra.mxu0 %v8108_v57  ;;  %4890 = vmatpush1.bf16.msra.mxu1 %v8109_v56 }
 0x2cd   :  { %4860 = vmatprep.subr.bf16.mxu0 %v8110_v51  ;;  %4892 = vmatprep.subr.bf16.mxu1 %v8111_v27 }
 0x2d0   :  { %4862 = vmatpush1.bf16.msra.mxu0 %v8112_v58  ;;  %4894 = vmatpush1.bf16.msra.mxu1 %v8113_v63 }
 0x2d1   :  { %4896 = vmatprep.subr.bf16.mxu0 %v8114_v49  ;;  %4928 = vmatprep.subr.bf16.mxu1 %v8115_v13  ;;  %v8119_v49 = vld [vmem:[#allocation108_spill] sm:$0xff] }
 0x366   :  { %v1231_v57 = vpop.f32.mrb[6].mxu0  ;;  %v1302_v56 = vpop.f32.mrb[6].mxu1 }
 0x367   :  { %v1307_v51 = vadd.f32 %v1231_v57, %v8117_v26  ;;  %v1233_v47 = vpop.f32.mrb[7].mxu0  ;;  %v1304_v27 = vpop.f32.mrb[7].mxu1  ;;  %v1309_v13 = vadd.f32 %v1302_v56, %v8119_v49 }
 0x368   :  { %v1308_v58 = vadd.f32 %v1233_v47, %v8118_v40  ;;  %v1310_v14 = vadd.f32 %v1304_v27, %v8120_v38  ;;  %v1337_v26 = vpop.permute.xlu1 %1336 }
 0x369   :  { %v4341_v39 = vmul.f32 -1.442695, %v1307_v51  ;;  %v4343_v30 = vmul.f32 -1.442695, %v1309_v13  ;;  %v1339_v47 = vmul.f32 %v1337_v26, %v8121_v18  ;;  %v8123_v18 = vld [vmem:[#allocation114_spill] sm:$0xff] }
 0x36a   :  { %v4342_v63 = vmul.f32 -1.442695, %v1308_v58  ;;  %v8122_v58 = vld [vmem:[#allocation110_spill] sm:$0xff]  ;;  %v1341_v49 = vmul.f32 %v1337_v26, %v8123_v18 }
 0x36b   :  { %6023 = vpow2.f32 %v4341_v39  ;;  %v1340_v39 = vmul.f32 %v1337_v26, %v8122_v58  ;;  %v1343_v27 = vadd.f32 %v1339_v47, %v8053_v25 }
 0x36c   :  { %6025 = vpow2.f32 %v4342_v63 }
 0x36d   :  { %6027 = vtanh.f32 %v1310_v14 }
 0x36e   :  { %6029 = vpow2.f32 %v4343_v30 }
 0x375   :  { %v6024_v23 = vpop.eup %6023 }
 0x376   :  { %v1320_v22 = vadd.f32 1.0, %v6024_v23  ;;  %v6026_v16 = vpop.eup %6025  ;;  %v1344_v23 = vadd.f32 %v1340_v39, %v8054_v5 }
 0x377   :  { %v1321_v57 = vadd.f32 1.0, %v6026_v16  ;;  %v6028_v51 = vpop.eup %6027 }
 0x378   :  { %6031 = vrcp.f32 %v1320_v22  ;;  %v6030_v63 = vpop.eup %6029 }
 0x379   :  { %6033 = vrcp.f32 %v1321_v57  ;;  %v1322_v38 = vadd.f32 1.0, %v6030_v63 }
 0x37b   :  { %6035 = vrcp.f32 %v1322_v38 }
 0x382   :  { %v6032_v40 = vpop.eup %6031 }
 0x383   :  { %v1331_v56 = vmul.f32 %v6032_v40, %v6028_v51  ;;  %v6034_v13 = vpop.eup %6033  ;;  %v1342_v51 = vmul.f32 %v1337_v26, %v6798_v0 }
 0x384   :  { %v1330_v30 = vmul.f32 %v6034_v13, %v6901_v10  ;;  %v1345_v10 = vadd.f32 %v1341_v49, %v6794_v32  ;;  %v8124_v49 = vld [vmem:[#allocation83_spill] sm:$0xff] }
 0x385   :  { %v1346_v39 = vadd.f32 %v1342_v51, %v6802_v8 }
 0x386   :  { %v1413_v22 = vpop.f32.mrb[8].mxu0  ;;  %v1484_v16 = vpop.f32.mrb[8].mxu1  ;;  %v7026_v14 = vadd.f32 %v1331_v56, %v1330_v30 }
 0x387   :  { %v1489_v57 = vadd.f32 %v1413_v22, %v1343_v27  ;;  %v1415_v9 = vpop.f32.mrb[9].mxu0  ;;  %v1486_v58 = vpop.f32.mrb[9].mxu1  ;;  %v1491_v63 = vadd.f32 %v1484_v16, %v1345_v10  ;;  %v8127_v16 = vld [vmem:[#allocation86_spill] sm:$0xff] }
 0x388   :  { %v1490_v4 = vadd.f32 %v1415_v9, %v1344_v23  ;;  %6037 = vtanh.f32 %v7026_v14  ;;  %v6036_v56 = vpop.eup %6035  ;;  %v1492_v27 = vadd.f32 %v1486_v58, %v1346_v39  ;;  %v8125_v58 = vld [vmem:[#allocation84_spill] sm:$0xff]  ;;  %v8126_v23 = vld [vmem:[#allocation85_spill] sm:$0xff] }
 0x389   :  { %v4344_v40 = vmul.f32 -1.442695, %v1489_v57  ;;  %v4346_v30 = vmul.f32 -1.442695, %v1491_v63 }
 0x38a   :  { %v4345_v47 = vmul.f32 -1.442695, %v1490_v4 }
 0x38b   :  { %6039 = vpow2.f32 %v4344_v40  ;;  %v8128_v40 = vld [vmem:[#allocation87_spill] sm:$0xff] }
 0x38c   :  { %6041 = vpow2.f32 %v4345_v47  ;;  %v8129_v47 = vld [vmem:[#allocation88_spill] sm:$0xff] }
 0x38d   :  { %6043 = vtanh.f32 %v1492_v27  ;;  %v8130_v27 = vld [vmem:[#allocation91_spill] sm:$0xff] }
 0x38e   :  { %6045 = vpow2.f32 %v4346_v30 }
 0x392   :  { %v6038_v13 = vpop.eup %6037 }
 0x393   :  { %v1334_v22 = vmul.f32 %v6038_v13, %v6036_v56  ;;  %v8131_v13 = vld [vmem:[#allocation92_spill] sm:$0xff] }
 0x395   :  { %v6040_v38 = vpop.eup %6039  ;;  %1582 = vmatmul.mubr.f32.vlgmr.msra.gmra.mrb[10].mxu0 %v1334_v22  ;;  %1653 = vmatmul.mubr.f32.vlgmr.msra.gmra.mrb[10].mxu1 %v1334_v22 }
 0x396   :  { %v1502_v9 = vadd.f32 1.0, %v6040_v38  ;;  %v6042_v4 = vpop.eup %6041  ;;  %4898 = vmatpush1.bf16.msra.mxu0 %v8056_v17  ;;  %4930 = vmatpush1.bf16.msra.mxu1 %v8057_v6  ;;  %v8132_v38 = vld [vmem:[#allocation93_spill] sm:$0xff] }
 0x397   :  { %v1503_v26 = vadd.f32 1.0, %v6042_v4  ;;  %4900 = vmatprep.subr.bf16.mxu0 %v8058_v52  ;;  %4932 = vmatprep.subr.bf16.mxu1 %v8059_v35  ;;  %v6044_v57 = vpop.eup %6043  ;;  %v8134_v4 = vld [vmem:[#allocation95_spill] sm:$0xff] }
 0x398   :  { %6047 = vrcp.f32 %v1502_v9  ;;  %1723 = vmatprep.mubr.f32.mxu0 %v7981_v36  ;;  %1794 = vmatprep.mubr.f32.mxu1 %v7981_v36  ;;  %v6046_v51 = vpop.eup %6045  ;;  %v8133_v9 = vld [vmem:[#allocation94_spill] sm:$0xff] }
 0x399   :  { %6049 = vrcp.f32 %v1503_v26  ;;  %v1504_v56 = vadd.f32 1.0, %v6046_v51  ;;  %v8135_v26 = vld [vmem:[#allocation96_spill] sm:$0xff]  ;;  %v8137_v51 = vld [vmem:[#allocation98_spill] sm:$0xff] }
 0x39a   :  { %4902 = vmatpush1.bf16.msra.mxu0 %v8060_v43  ;;  %4934 = vmatpush1.bf16.msra.mxu1 %v8061_v45 }
 0x39b   :  { %4904 = vmatprep.subr.bf16.mxu0 %v8124_v49  ;;  %4936 = vmatprep.subr.bf16.mxu1 %v8125_v58  ;;  %6051 = vrcp.f32 %v1504_v56  ;;  %v8139_v56 = vld [vmem:[#allocation30_spill] sm:$0xff] }
 0x39e   :  { %4906 = vmatpush1.bf16.msra.mxu0 %v8126_v23  ;;  %4938 = vmatpush1.bf16.msra.mxu1 %v8127_v16 }
 0x39f   :  { %4908 = vmatprep.subr.bf16.mxu0 %v8128_v40  ;;  %4940 = vmatprep.subr.bf16.mxu1 %v8129_v47 }
 0x3a2   :  { %v6048_v10 = vpop.eup %6047  ;;  %4910 = vmatpush1.bf16.msra.mxu0 %v8068_v48  ;;  %4942 = vmatpush1.bf16.msra.mxu1 %v8069_v44 }
 0x3a3   :  { %v1513_v39 = vmul.f32 %v6048_v10, %v6044_v57  ;;  %v6050_v63 = vpop.eup %6049  ;;  %4912 = vmatprep.subr.bf16.mxu0 %v8130_v27  ;;  %4944 = vmatprep.subr.bf16.mxu1 %v8131_v13  ;;  %v8136_v57 = vld [vmem:[#allocation97_spill] sm:$0xff]  ;;  %v8138_v10 = vld [vmem:[#allocation99_spill] sm:$0xff] }
 0x3a4   :  { %v1512_v30 = vmul.f32 %v6050_v63, %v6927_v60 }
 0x3a5   :  { %v6052_v60 = vpop.eup %6051 }
 0x3a6   :  { %v7052_v22 = vadd.f32 %v1513_v39, %v1512_v30  ;;  %4914 = vmatpush1.bf16.msra.mxu0 %v8132_v38  ;;  %4946 = vmatpush1.bf16.msra.mxu1 %v8133_v9  ;;  %v8140_v30 = vld [vmem:[#allocation31_spill] sm:$0xff] }
 0x3a7   :  { %4916 = vmatprep.subr.bf16.mxu0 %v8134_v4  ;;  %4948 = vmatprep.subr.bf16.mxu1 %v8135_v26 }
 0x3a8   :  { %6053 = vtanh.f32 %v7052_v22 }
 0x3aa   :  { %4918 = vmatpush1.bf16.msra.mxu0 %v8136_v57  ;;  %4950 = vmatpush1.bf16.msra.mxu1 %v8137_v51 }
 0x3ab   :  { %4920 = vmatprep.subr.bf16.mxu0 %v8138_v10  ;;  %4952 = vmatprep.subr.bf16.mxu1 %v8079_v21 }
 0x3ae   :  { %4922 = vmatpush1.bf16.msra.mxu0 %v8080_v62  ;;  %4954 = vmatpush1.bf16.msra.mxu1 %v8081_v50 }
 0x3af   :  { %4924 = vmatprep.subr.bf16.mxu0 %v8082_v34  ;;  %4956 = vmatprep.subr.bf16.mxu1 %v8083_v12 }
 0x3b2   :  { %v6054_v39 = vpop.eup %6053  ;;  %4926 = vmatpush1.bf16.msra.mxu0 %v8084_v61  ;;  %4958 = vmatpush1.bf16.msra.mxu1 %v8085_v1 }
 0x3b3   :  { %4960 = vmatprep.subr.bf16.mxu0 %v8086_v7  ;;  %4992 = vmatprep.subr.bf16.mxu1 %v8087_v31  ;;  %v1516_v63 = vmul.f32 %v6054_v39, %v6052_v60  ;;  %v8141_v60 = vld [vmem:[#allocation32_spill] sm:$0xff]  ;;  %v8142_v39 = vld [vmem:[#allocation33_spill] sm:$0xff] }
 0x3b5   :  { %1724 = vmatmul.mubr.f32.vlgmr.msra.gmra.mrb[10].mxu0 %v1516_v63  ;;  %1795 = vmatmul.mubr.f32.vlgmr.msra.gmra.mrb[10].mxu1 %v1516_v63 }
 0x3b6   :  { %4962 = vmatpush1.bf16.msra.mxu0 %v6462_v11  ;;  %4994 = vmatpush1.bf16.msra.mxu1 %v6465_v15 }
 0x3b7   :  { %4964 = vmatprep.subr.bf16.mxu0 %v6469_v19  ;;  %4996 = vmatprep.subr.bf16.mxu1 %v6471_v20 }
 0x3b8   :  { %1905 = vmatprep.mubr.f32.mxu0 %v7981_v36  ;;  %1976 = vmatprep.mubr.f32.mxu1 %v7981_v36 }
 0x3ba   :  { %4966 = vmatpush1.bf16.msra.mxu0 %v6474_v24  ;;  %4998 = vmatpush1.bf16.msra.mxu1 %v6478_v28  ;;  %v8190_v24 = vld [vmem:[#allocation109_spill] sm:$0xff] }
 0x3bb   :  { %4968 = vmatprep.subr.bf16.mxu0 %v6480_v29  ;;  %5000 = vmatprep.subr.bf16.mxu1 %v6482_v33  ;;  %v8189_v33 = vld [vmem:[#allocation111_spill] sm:$0xff] }
 0x3be   :  { %4970 = vmatpush1.bf16.msra.mxu0 %v6485_v37  ;;  %5002 = vmatpush1.bf16.msra.mxu1 %v6489_v41  ;;  %v8187_v41 = vld [vmem:[#allocation107_spill] sm:$0xff] }
 0x3bf   :  { %4972 = vmatprep.subr.bf16.mxu0 %v6491_v42  ;;  %5004 = vmatprep.subr.bf16.mxu1 %v6494_v46  ;;  %v8143_v46 = vld [vmem:[#allocation34_spill] sm:$0xff] }
 0x3c2   :  { %4974 = vmatpush1.bf16.msra.mxu0 %v6497_v53  ;;  %5006 = vmatpush1.bf16.msra.mxu1 %v6501_v54  ;;  %v8144_v53 = vld [vmem:[#allocation36_spill] sm:$0xff]  ;;  %v8145_v54 = vld [vmem:[#allocation37_spill] sm:$0xff] }
 0x3c3   :  { %4976 = vmatprep.subr.bf16.mxu0 %v6503_v55  ;;  %5008 = vmatprep.subr.bf16.mxu1 %v6506_v59  ;;  %v8146_v55 = vld [vmem:[#allocation38_spill] sm:$0xff]  ;;  %v8147_v59 = vld [vmem:[#allocation39_spill] sm:$0xff] }
 0x3c6   :  { %4978 = vmatpush1.bf16.msra.mxu0 %v6509_v2  ;;  %5010 = vmatpush1.bf16.msra.mxu1 %v6513_v3  ;;  %v8148_v2 = vld [vmem:[#allocation40_spill] sm:$0xff]  ;;  %v8149_v3 = vld [vmem:[#allocation41_spill] sm:$0xff] }
 0x3c7   :  { %4980 = vmatprep.subr.bf16.mxu0 %v8139_v56  ;;  %5012 = vmatprep.subr.bf16.mxu1 %v8140_v30  ;;  %v8150_v56 = vld [vmem:[#allocation42_spill] sm:$0xff]  ;;  %v8151_v30 = vld [vmem:[#allocation43_spill] sm:$0xff] }
 0x3ca   :  { %4982 = vmatpush1.bf16.msra.mxu0 %v8141_v60  ;;  %5014 = vmatpush1.bf16.msra.mxu1 %v8142_v39  ;;  %v8152_v60 = vld [vmem:[#allocation44_spill] sm:$0xff]  ;;  %v8186_v39 = vld [vmem:[#allocation35_spill] sm:$0xff] }
 0x3cb   :  { %4984 = vmatprep.subr.bf16.mxu0 %v8143_v46  ;;  %5016 = vmatprep.subr.bf16.mxu1 %v8144_v53  ;;  %v8153_v46 = vld [vmem:[#allocation45_spill] sm:$0xff]  ;;  %v8154_v53 = vld [vmem:[#allocation46_spill] sm:$0xff] }
 0x3ce   :  { %4986 = vmatpush1.bf16.msra.mxu0 %v8145_v54  ;;  %5018 = vmatpush1.bf16.msra.mxu1 %v8146_v55  ;;  %v8155_v54 = vld [vmem:[#allocation47_spill] sm:$0xff]  ;;  %v8156_v55 = vld [vmem:[#allocation48_spill] sm:$0xff] }
 0x3cf   :  { %4988 = vmatprep.subr.bf16.mxu0 %v8147_v59  ;;  %5020 = vmatprep.subr.bf16.mxu1 %v8148_v2  ;;  %v8166_v2 = vld [vmem:[#allocation58_spill] sm:$0xff]  ;;  %v8167_v59 = vld [vmem:[#allocation59_spill] sm:$0xff] }
 0x3d2   :  { %4990 = vmatpush1.bf16.msra.mxu0 %v8149_v3  ;;  %5022 = vmatpush1.bf16.msra.mxu1 %v8150_v56  ;;  %v8157_v3 = vld [vmem:[#allocation49_spill] sm:$0xff]  ;;  %v8158_v56 = vld [vmem:[#allocation50_spill] sm:$0xff] }
 0x3d3   :  { %5024 = vmatprep.subr.bf16.mxu0 %v8151_v30  ;;  %5056 = vmatprep.subr.bf16.mxu1 %v8152_v60  ;;  %v8159_v30 = vld [vmem:[#allocation51_spill] sm:$0xff]  ;;  %v8160_v60 = vld [vmem:[#allocation52_spill] sm:$0xff] }
 0x3d5   :  { %1906 = vmatmul.mubr.f32.vlgmr.msra.gmra.mrb[12].mxu0 %v1516_v63  ;;  %1977 = vmatmul.mubr.f32.vlgmr.msra.gmra.mrb[12].mxu1 %v1516_v63  ;;  %v8161_v63 = vld [vmem:[#allocation53_spill] sm:$0xff] }
 0x3d6   :  { %5026 = vmatpush1.bf16.msra.mxu0 %v8153_v46  ;;  %5058 = vmatpush1.bf16.msra.mxu1 %v8154_v53  ;;  %v8162_v46 = vld [vmem:[#allocation54_spill] sm:$0xff]  ;;  %v8163_v53 = vld [vmem:[#allocation55_spill] sm:$0xff] }
 0x3d7   :  { %5028 = vmatprep.subr.bf16.mxu0 %v8155_v54  ;;  %5060 = vmatprep.subr.bf16.mxu1 %v8156_v55  ;;  %v8164_v54 = vld [vmem:[#allocation56_spill] sm:$0xff]  ;;  %v8165_v55 = vld [vmem:[#allocation57_spill] sm:$0xff] }
 0x3d8   :  { %2075 = vmatprep.mubr.f32.mxu0 %v7981_v36  ;;  %2146 = vmatprep.mubr.f32.mxu1 %v7981_v36 }
 0x3da   :  { %5030 = vmatpush1.bf16.msra.mxu0 %v8157_v3  ;;  %5062 = vmatpush1.bf16.msra.mxu1 %v8158_v56  ;;  %v8168_v3 = vld [vmem:[#allocation60_spill] sm:$0xff]  ;;  %v8169_v56 = vld [vmem:[#allocation61_spill] sm:$0xff] }
 0x3db   :  { %5032 = vmatprep.subr.bf16.mxu0 %v8159_v30  ;;  %5064 = vmatprep.subr.bf16.mxu1 %v8160_v60  ;;  %v8170_v30 = vld [vmem:[#allocation62_spill] sm:$0xff]  ;;  %v8171_v60 = vld [vmem:[#allocation63_spill] sm:$0xff] }
 0x3de   :  { %5034 = vmatpush1.bf16.msra.mxu0 %v8161_v63  ;;  %5066 = vmatpush1.bf16.msra.mxu1 %v8162_v46  ;;  %v8172_v63 = vld [vmem:[#allocation64_spill] sm:$0xff]  ;;  %v8173_v46 = vld [vmem:[#allocation65_spill] sm:$0xff] }
 0x3df   :  { %5036 = vmatprep.subr.bf16.mxu0 %v8163_v53  ;;  %5068 = vmatprep.subr.bf16.mxu1 %v8164_v54  ;;  %v8174_v53 = vld [vmem:[#allocation66_spill] sm:$0xff]  ;;  %v8175_v54 = vld [vmem:[#allocation67_spill] sm:$0xff] }
 0x3e2   :  { %5038 = vmatpush1.bf16.msra.mxu0 %v8165_v55  ;;  %5070 = vmatpush1.bf16.msra.mxu1 %v8166_v2  ;;  %v8176_v55 = vld [vmem:[#allocation68_spill] sm:$0xff]  ;;  %v8177_v2 = vld [vmem:[#allocation69_spill] sm:$0xff] }
 0x3e3   :  { %5040 = vmatprep.subr.bf16.mxu0 %v8167_v59  ;;  %5072 = vmatprep.subr.bf16.mxu1 %v8168_v3  ;;  %v8178_v59 = vld [vmem:[#allocation70_spill] sm:$0xff]  ;;  %v8179_v3 = vld [vmem:[#allocation71_spill] sm:$0xff] }
 0x3e6   :  { %5042 = vmatpush1.bf16.msra.mxu0 %v8169_v56  ;;  %5074 = vmatpush1.bf16.msra.mxu1 %v8170_v30  ;;  %v8180_v56 = vld [vmem:[#allocation72_spill] sm:$0xff]  ;;  %v8181_v30 = vld [vmem:[#allocation73_spill] sm:$0xff] }
 0x3e7   :  { %5044 = vmatprep.subr.bf16.mxu0 %v8171_v60  ;;  %5076 = vmatprep.subr.bf16.mxu1 %v8172_v63  ;;  %v8182_v60 = vld [vmem:[#allocation74_spill] sm:$0xff]  ;;  %v8183_v63 = vld [vmem:[#allocation75_spill] sm:$0xff] }
 0x3ea   :  { %5046 = vmatpush1.bf16.msra.mxu0 %v8173_v46  ;;  %5078 = vmatpush1.bf16.msra.mxu1 %v8174_v53  ;;  %v8184_v46 = vld [vmem:[#allocation76_spill] sm:$0xff]  ;;  %v6342_v53 = vmov 4  }
 0x3eb   :  { %5048 = vmatprep.subr.bf16.mxu0 %v8175_v54  ;;  %5080 = vmatprep.subr.bf16.mxu1 %v8176_v55  ;;  %v8185_v54 = vld [vmem:[#allocation112_spill] sm:$0xff] }
 0x3ec   :  { %5970 = vset.pattern.permute.xlu1 %v6342_v53 }
 0x3ed   :  { %2324 = vperm.xlu1 %5970, %v8185_v54  }
 0x3ee   :  { %5050 = vmatpush1.bf16.msra.mxu0 %v8177_v2  ;;  %5082 = vmatpush1.bf16.msra.mxu1 %v8178_v59 }
 0x3ef   :  { %5052 = vmatprep.subr.bf16.mxu0 %v8179_v3  ;;  %5084 = vmatprep.subr.bf16.mxu1 %v8180_v56 }
 0x3f2   :  { %5054 = vmatpush1.bf16.msra.mxu0 %v8181_v30  ;;  %5086 = vmatpush1.bf16.msra.mxu1 %v8182_v60  ;;  %v8188_v60 = vld [vmem:[#allocation108_spill] sm:$0xff] }
 0x3f3   :  { %5088 = vmatprep.subr.bf16.mxu0 %v8183_v63  ;;  %5120 = vmatprep.subr.bf16.mxu1 %v8184_v46 }
 0x488   :  { %v1725_v55 = vpop.f32.mrb[10].mxu0  ;;  %v1796_v2 = vpop.f32.mrb[10].mxu1 }
 0x489   :  { %v1801_v59 = vadd.f32 %v1725_v55, %v8186_v39  ;;  %v1727_v42 = vpop.f32.mrb[11].mxu0  ;;  %v1798_v3 = vpop.f32.mrb[11].mxu1  ;;  %v1803_v63 = vadd.f32 %v1796_v2, %v8188_v60 }
 0x48a   :  { %v1802_v56 = vadd.f32 %v1727_v42, %v8187_v41  ;;  %v1804_v46 = vadd.f32 %v1798_v3, %v8189_v33  ;;  %v1831_v39 = vpop.permute.xlu1 %1830 }
 0x48b   :  { %v4347_v37 = vmul.f32 -1.442695, %v1801_v59  ;;  %v4349_v29 = vmul.f32 -1.442695, %v1803_v63  ;;  %v1833_v42 = vmul.f32 %v1831_v39, %v8190_v24  ;;  %v1835_v24 = vmul.f32 %v1831_v39, %v8123_v18 }
 0x48c   :  { %v4348_v30 = vmul.f32 -1.442695, %v1802_v56  ;;  %v8191_v56 = vld [vmem:[#allocation110_spill] sm:$0xff] }
 0x48d   :  { %6055 = vpow2.f32 %v4347_v37  ;;  %v1834_v37 = vmul.f32 %v1831_v39, %v8191_v56  ;;  %v1837_v3 = vadd.f32 %v1833_v42, %v8053_v25 }
 0x48e   :  { %6057 = vpow2.f32 %v4348_v30 }
 0x48f   :  { %6059 = vtanh.f32 %v1804_v46  ;;  %v1838_v46 = vadd.f32 %v1834_v37, %v8054_v5 }
 0x490   :  { %6061 = vpow2.f32 %v4349_v29 }
 0x497   :  { %v6056_v53 = vpop.eup %6055 }
 0x498   :  { %v1814_v28 = vadd.f32 1.0, %v6056_v53  ;;  %v6058_v54 = vpop.eup %6057 }
 0x499   :  { %v1815_v55 = vadd.f32 1.0, %v6058_v54  ;;  %v6060_v59 = vpop.eup %6059 }
 0x49a   :  { %6063 = vrcp.f32 %v1814_v28  ;;  %v6062_v30 = vpop.eup %6061 }
 0x49b   :  { %6065 = vrcp.f32 %v1815_v55  ;;  %v1816_v33 = vadd.f32 1.0, %v6062_v30 }
 0x49d   :  { %6067 = vrcp.f32 %v1816_v33 }
 0x4a4   :  { %v6064_v41 = vpop.eup %6063 }
 0x4a5   :  { %v1825_v2 = vmul.f32 %v6064_v41, %v6060_v59  ;;  %v6066_v63 = vpop.eup %6065  ;;  %v1836_v59 = vmul.f32 %v1831_v39, %v6798_v0 }
 0x4a6   :  { %v1824_v29 = vmul.f32 %v6066_v63, %v7026_v14  ;;  %v1839_v14 = vadd.f32 %v1835_v24, %v6794_v32 }
 0x4a7   :  { %v1840_v37 = vadd.f32 %v1836_v59, %v6802_v8 }
 0x4a8   :  { %v1907_v28 = vpop.f32.mrb[12].mxu0  ;;  %v1978_v54 = vpop.f32.mrb[12].mxu1  ;;  %v7149_v53 = vadd.f32 %v1825_v2, %v1824_v29 }
 0x4a9   :  { %v1983_v55 = vadd.f32 %v1907_v28, %v1837_v3  ;;  %v1909_v60 = vpop.f32.mrb[13].mxu0  ;;  %v1980_v56 = vpop.f32.mrb[13].mxu1  ;;  %v1985_v30 = vadd.f32 %v1978_v54, %v1839_v14 }
 0x4aa   :  { %v1984_v20 = vadd.f32 %v1909_v60, %v1838_v46  ;;  %6069 = vtanh.f32 %v7149_v53  ;;  %v6068_v2 = vpop.eup %6067  ;;  %v1986_v3 = vadd.f32 %v1980_v56, %v1840_v37 }
 0x4ab   :  { %v4350_v41 = vmul.f32 -1.442695, %v1983_v55  ;;  %v4352_v29 = vmul.f32 -1.442695, %v1985_v30  ;;  %v8192_v30 = vld [vmem:[#allocation15_spill] sm:$0xff] }
 0x4ac   :  { %v4351_v42 = vmul.f32 -1.442695, %v1984_v20 }
 0x4ad   :  { %6071 = vpow2.f32 %v4350_v41 }
 0x4ae   :  { %6073 = vpow2.f32 %v4351_v42 }
 0x4af   :  { %6075 = vtanh.f32 %v1986_v3  ;;  %v8194_v3 = vld [vmem:[#allocation17_spill] sm:$0xff] }
 0x4b0   :  { %6077 = vpow2.f32 %v4352_v29  ;;  %v8196_v29 = vld [vmem:[#allocation19_spill] sm:$0xff] }
 0x4b4   :  { %v6070_v63 = vpop.eup %6069 }
 0x4b5   :  { %v1828_v28 = vmul.f32 %v6070_v63, %v6068_v2  ;;  %v8193_v2 = vld [vmem:[#allocation16_spill] sm:$0xff]  ;;  %v8195_v63 = vld [vmem:[#allocation18_spill] sm:$0xff] }
 0x4b7   :  { %v6072_v33 = vpop.eup %6071  ;;  %2076 = vmatmul.mubr.f32.vlgmr.msra.gmra.mrb[14].mxu0 %v1828_v28  ;;  %2147 = vmatmul.mubr.f32.vlgmr.msra.gmra.mrb[14].mxu1 %v1828_v28  ;;  %v8197_v28 = vld [vmem:[#allocation20_spill] sm:$0xff] }
 0x4b8   :  { %v1996_v60 = vadd.f32 1.0, %v6072_v33  ;;  %v6074_v20 = vpop.eup %6073  ;;  %5090 = vmatpush1.bf16.msra.mxu0 %v8056_v17  ;;  %5122 = vmatpush1.bf16.msra.mxu1 %v8057_v6  ;;  %v8198_v33 = vld [vmem:[#allocation21_spill] sm:$0xff] }
 0x4b9   :  { %v1997_v24 = vadd.f32 1.0, %v6074_v20  ;;  %5092 = vmatprep.subr.bf16.mxu0 %v8058_v52  ;;  %5124 = vmatprep.subr.bf16.mxu1 %v8059_v35  ;;  %v6076_v39 = vpop.eup %6075  ;;  %v8200_v20 = vld [vmem:[#allocation23_spill] sm:$0xff] }
 0x4ba   :  { %6079 = vrcp.f32 %v1996_v60  ;;  %2217 = vmatprep.mubr.f32.mxu0 %v7981_v36  ;;  %2288 = vmatprep.mubr.f32.mxu1 %v7981_v36  ;;  %v6078_v56 = vpop.eup %6077  ;;  %v8199_v60 = vld [vmem:[#allocation22_spill] sm:$0xff] }
 0x4bb   :  { %6081 = vrcp.f32 %v1997_v24  ;;  %v1998_v41 = vadd.f32 1.0, %v6078_v56  ;;  %v8201_v24 = vld [vmem:[#allocation24_spill] sm:$0xff]  ;;  %v8203_v56 = vld [vmem:[#allocation26_spill] sm:$0xff] }
 0x4bc   :  { %5094 = vmatpush1.bf16.msra.mxu0 %v8060_v43  ;;  %5126 = vmatpush1.bf16.msra.mxu1 %v8061_v45 }
 0x4bd   :  { %5096 = vmatprep.subr.bf16.mxu0 %v8124_v49  ;;  %5128 = vmatprep.subr.bf16.mxu1 %v8125_v58  ;;  %6083 = vrcp.f32 %v1998_v41  ;;  %v8207_v41 = vld [vmem:[#allocation30_spill] sm:$0xff] }
 0x4c0   :  { %5098 = vmatpush1.bf16.msra.mxu0 %v8126_v23  ;;  %5130 = vmatpush1.bf16.msra.mxu1 %v8127_v16 }
 0x4c1   :  { %5100 = vmatprep.subr.bf16.mxu0 %v8128_v40  ;;  %5132 = vmatprep.subr.bf16.mxu1 %v8129_v47 }
 0x4c4   :  { %v6080_v46 = vpop.eup %6079  ;;  %5102 = vmatpush1.bf16.msra.mxu0 %v8068_v48  ;;  %5134 = vmatpush1.bf16.msra.mxu1 %v8069_v44 }
 0x4c5   :  { %v2007_v54 = vmul.f32 %v6080_v46, %v6076_v39  ;;  %v6082_v55 = vpop.eup %6081  ;;  %5104 = vmatprep.subr.bf16.mxu0 %v8130_v27  ;;  %5136 = vmatprep.subr.bf16.mxu1 %v8131_v13  ;;  %v8202_v39 = vld [vmem:[#allocation25_spill] sm:$0xff]  ;;  %v8204_v46 = vld [vmem:[#allocation27_spill] sm:$0xff] }
 0x4c6   :  { %v2006_v42 = vmul.f32 %v6082_v55, %v7052_v22  ;;  %v8206_v55 = vld [vmem:[#allocation29_spill] sm:$0xff] }
 0x4c7   :  { %v6084_v22 = vpop.eup %6083 }
 0x4c8   :  { %v7175_v59 = vadd.f32 %v2007_v54, %v2006_v42  ;;  %5106 = vmatpush1.bf16.msra.mxu0 %v8132_v38  ;;  %5138 = vmatpush1.bf16.msra.mxu1 %v8133_v9  ;;  %v8205_v54 = vld [vmem:[#allocation28_spill] sm:$0xff]  ;;  %v8208_v42 = vld [vmem:[#allocation31_spill] sm:$0xff] }
 0x4c9   :  { %5108 = vmatprep.subr.bf16.mxu0 %v8134_v4  ;;  %5140 = vmatprep.subr.bf16.mxu1 %v8135_v26 }
 0x4ca   :  { %6085 = vtanh.f32 %v7175_v59 }
 0x4cc   :  { %5110 = vmatpush1.bf16.msra.mxu0 %v8136_v57  ;;  %5142 = vmatpush1.bf16.msra.mxu1 %v8137_v51 }
 0x4cd   :  { %5112 = vmatprep.subr.bf16.mxu0 %v8138_v10  ;;  %5144 = vmatprep.subr.bf16.mxu1 %v8079_v21 }
 0x4d0   :  { %5114 = vmatpush1.bf16.msra.mxu0 %v8080_v62  ;;  %5146 = vmatpush1.bf16.msra.mxu1 %v8081_v50 }
 0x4d1   :  { %5116 = vmatprep.subr.bf16.mxu0 %v8082_v34  ;;  %5148 = vmatprep.subr.bf16.mxu1 %v8083_v12 }
 0x4d4   :  { %v6086_v14 = vpop.eup %6085  ;;  %5118 = vmatpush1.bf16.msra.mxu0 %v8084_v61  ;;  %5150 = vmatpush1.bf16.msra.mxu1 %v8085_v1 }
 0x4d5   :  { %v2010_v37 = vmul.f32 %v6086_v14, %v6084_v22  ;;  %5152 = vmatprep.subr.bf16.mxu0 %v8086_v7  ;;  %5184 = vmatprep.subr.bf16.mxu1 %v8087_v31  ;;  %v8209_v22 = vld [vmem:[#allocation32_spill] sm:$0xff]  ;;  %v8210_v14 = vld [vmem:[#allocation33_spill] sm:$0xff] }
 0x4d7   :  { %2218 = vmatmul.mubr.f32.vlgmr.msra.gmra.mrb[14].mxu0 %v2010_v37  ;;  %2289 = vmatmul.mubr.f32.vlgmr.msra.gmra.mrb[14].mxu1 %v2010_v37 }
 0x4d8   :  { %5154 = vmatpush1.bf16.msra.mxu0 %v6462_v11  ;;  %5186 = vmatpush1.bf16.msra.mxu1 %v6465_v15 }
 0x4d9   :  { %5156 = vmatprep.subr.bf16.mxu0 %v6469_v19  ;;  %5188 = vmatprep.subr.bf16.mxu1 %v8192_v30 }
 0x4da   :  { %2399 = vmatprep.mubr.f32.mxu0 %v7981_v36  ;;  %2470 = vmatprep.mubr.f32.mxu1 %v7981_v36 }
 0x4dc   :  { %5158 = vmatpush1.bf16.msra.mxu0 %v8193_v2  ;;  %5190 = vmatpush1.bf16.msra.mxu1 %v8194_v3  ;;  %v8258_v2 = vld [vmem:[#allocation109_spill] sm:$0xff] }
 0x4dd   :  { %5160 = vmatprep.subr.bf16.mxu0 %v8195_v63  ;;  %5192 = vmatprep.subr.bf16.mxu1 %v8196_v29  ;;  %v8257_v29 = vld [vmem:[#allocation111_spill] sm:$0xff] }
 0x4e0   :  { %5162 = vmatpush1.bf16.msra.mxu0 %v8197_v28  ;;  %5194 = vmatpush1.bf16.msra.mxu1 %v8198_v33  ;;  %v8255_v33 = vld [vmem:[#allocation107_spill] sm:$0xff] }
 0x4e1   :  { %5164 = vmatprep.subr.bf16.mxu0 %v8199_v60  ;;  %5196 = vmatprep.subr.bf16.mxu1 %v8200_v20  ;;  %v8211_v20 = vld [vmem:[#allocation34_spill] sm:$0xff] }
 0x4e4   :  { %5166 = vmatpush1.bf16.msra.mxu0 %v8201_v24  ;;  %5198 = vmatpush1.bf16.msra.mxu1 %v8202_v39  ;;  %v8212_v24 = vld [vmem:[#allocation36_spill] sm:$0xff]  ;;  %v8213_v39 = vld [vmem:[#allocation37_spill] sm:$0xff] }
 0x4e5   :  { %5168 = vmatprep.subr.bf16.mxu0 %v8203_v56  ;;  %5200 = vmatprep.subr.bf16.mxu1 %v8204_v46  ;;  %v8214_v56 = vld [vmem:[#allocation38_spill] sm:$0xff]  ;;  %v8215_v46 = vld [vmem:[#allocation39_spill] sm:$0xff] }
 0x4e8   :  { %5170 = vmatpush1.bf16.msra.mxu0 %v8205_v54  ;;  %5202 = vmatpush1.bf16.msra.mxu1 %v8206_v55  ;;  %v8216_v54 = vld [vmem:[#allocation40_spill] sm:$0xff]  ;;  %v8217_v55 = vld [vmem:[#allocation41_spill] sm:$0xff] }
 0x4e9   :  { %5172 = vmatprep.subr.bf16.mxu0 %v8207_v41  ;;  %5204 = vmatprep.subr.bf16.mxu1 %v8208_v42  ;;  %v8218_v41 = vld [vmem:[#allocation42_spill] sm:$0xff]  ;;  %v8219_v42 = vld [vmem:[#allocation43_spill] sm:$0xff] }
 0x4ec   :  { %5174 = vmatpush1.bf16.msra.mxu0 %v8209_v22  ;;  %5206 = vmatpush1.bf16.msra.mxu1 %v8210_v14  ;;  %v8220_v22 = vld [vmem:[#allocation44_spill] sm:$0xff]  ;;  %v8254_v14 = vld [vmem:[#allocation35_spill] sm:$0xff] }
 0x4ed   :  { %5176 = vmatprep.subr.bf16.mxu0 %v8211_v20  ;;  %5208 = vmatprep.subr.bf16.mxu1 %v8212_v24  ;;  %v8221_v20 = vld [vmem:[#allocation45_spill] sm:$0xff]  ;;  %v8222_v24 = vld [vmem:[#allocation46_spill] sm:$0xff] }
 0x4f0   :  { %5178 = vmatpush1.bf16.msra.mxu0 %v8213_v39  ;;  %5210 = vmatpush1.bf16.msra.mxu1 %v8214_v56  ;;  %v8223_v39 = vld [vmem:[#allocation47_spill] sm:$0xff]  ;;  %v8224_v56 = vld [vmem:[#allocation48_spill] sm:$0xff] }
 0x4f1   :  { %5180 = vmatprep.subr.bf16.mxu0 %v8215_v46  ;;  %5212 = vmatprep.subr.bf16.mxu1 %v8216_v54  ;;  %v8234_v54 = vld [vmem:[#allocation58_spill] sm:$0xff]  ;;  %v8235_v46 = vld [vmem:[#allocation59_spill] sm:$0xff] }
 0x4f4   :  { %5182 = vmatpush1.bf16.msra.mxu0 %v8217_v55  ;;  %5214 = vmatpush1.bf16.msra.mxu1 %v8218_v41  ;;  %v8225_v55 = vld [vmem:[#allocation49_spill] sm:$0xff]  ;;  %v8226_v41 = vld [vmem:[#allocation50_spill] sm:$0xff] }
 0x4f5   :  { %5216 = vmatprep.subr.bf16.mxu0 %v8219_v42  ;;  %5248 = vmatprep.subr.bf16.mxu1 %v8220_v22  ;;  %v8227_v42 = vld [vmem:[#allocation51_spill] sm:$0xff]  ;;  %v8228_v22 = vld [vmem:[#allocation52_spill] sm:$0xff] }
 0x4f7   :  { %2400 = vmatmul.mubr.f32.vlgmr.msra.gmra.mrb[16].mxu0 %v2010_v37  ;;  %2471 = vmatmul.mubr.f32.vlgmr.msra.gmra.mrb[16].mxu1 %v2010_v37  ;;  %v8229_v37 = vld [vmem:[#allocation53_spill] sm:$0xff] }
 0x4f8   :  { %5218 = vmatpush1.bf16.msra.mxu0 %v8221_v20  ;;  %5250 = vmatpush1.bf16.msra.mxu1 %v8222_v24  ;;  %v8230_v20 = vld [vmem:[#allocation54_spill] sm:$0xff]  ;;  %v8231_v24 = vld [vmem:[#allocation55_spill] sm:$0xff] }
 0x4f9   :  { %5220 = vmatprep.subr.bf16.mxu0 %v8223_v39  ;;  %5252 = vmatprep.subr.bf16.mxu1 %v8224_v56  ;;  %v8232_v39 = vld [vmem:[#allocation56_spill] sm:$0xff]  ;;  %v8233_v56 = vld [vmem:[#allocation57_spill] sm:$0xff] }
 0x4fa   :  { %2569 = vmatprep.mubr.f32.mxu0 %v7981_v36  ;;  %2640 = vmatprep.mubr.f32.mxu1 %v7981_v36 }
 0x4fc   :  { %5222 = vmatpush1.bf16.msra.mxu0 %v8225_v55  ;;  %5254 = vmatpush1.bf16.msra.mxu1 %v8226_v41  ;;  %v8236_v55 = vld [vmem:[#allocation60_spill] sm:$0xff]  ;;  %v8237_v41 = vld [vmem:[#allocation61_spill] sm:$0xff] }
 0x4fd   :  { %5224 = vmatprep.subr.bf16.mxu0 %v8227_v42  ;;  %5256 = vmatprep.subr.bf16.mxu1 %v8228_v22  ;;  %v8238_v42 = vld [vmem:[#allocation62_spill] sm:$0xff]  ;;  %v8239_v22 = vld [vmem:[#allocation63_spill] sm:$0xff] }
 0x500   :  { %5226 = vmatpush1.bf16.msra.mxu0 %v8229_v37  ;;  %5258 = vmatpush1.bf16.msra.mxu1 %v8230_v20  ;;  %v8240_v37 = vld [vmem:[#allocation64_spill] sm:$0xff]  ;;  %v8241_v20 = vld [vmem:[#allocation65_spill] sm:$0xff] }
 0x501   :  { %5228 = vmatprep.subr.bf16.mxu0 %v8231_v24  ;;  %5260 = vmatprep.subr.bf16.mxu1 %v8232_v39  ;;  %v8242_v24 = vld [vmem:[#allocation66_spill] sm:$0xff]  ;;  %v8243_v39 = vld [vmem:[#allocation67_spill] sm:$0xff] }
 0x504   :  { %5230 = vmatpush1.bf16.msra.mxu0 %v8233_v56  ;;  %5262 = vmatpush1.bf16.msra.mxu1 %v8234_v54  ;;  %v8244_v56 = vld [vmem:[#allocation68_spill] sm:$0xff]  ;;  %v8245_v54 = vld [vmem:[#allocation69_spill] sm:$0xff] }
 0x505   :  { %5232 = vmatprep.subr.bf16.mxu0 %v8235_v46  ;;  %5264 = vmatprep.subr.bf16.mxu1 %v8236_v55  ;;  %v8246_v46 = vld [vmem:[#allocation70_spill] sm:$0xff]  ;;  %v8247_v55 = vld [vmem:[#allocation71_spill] sm:$0xff] }
 0x508   :  { %5234 = vmatpush1.bf16.msra.mxu0 %v8237_v41  ;;  %5266 = vmatpush1.bf16.msra.mxu1 %v8238_v42  ;;  %v8248_v41 = vld [vmem:[#allocation72_spill] sm:$0xff]  ;;  %v8249_v42 = vld [vmem:[#allocation73_spill] sm:$0xff] }
 0x509   :  { %5236 = vmatprep.subr.bf16.mxu0 %v8239_v22  ;;  %5268 = vmatprep.subr.bf16.mxu1 %v8240_v37  ;;  %v8250_v22 = vld [vmem:[#allocation74_spill] sm:$0xff]  ;;  %v8251_v37 = vld [vmem:[#allocation75_spill] sm:$0xff] }
 0x50c   :  { %5238 = vmatpush1.bf16.msra.mxu0 %v8241_v20  ;;  %5270 = vmatpush1.bf16.msra.mxu1 %v8242_v24  ;;  %v8252_v20 = vld [vmem:[#allocation76_spill] sm:$0xff]  ;;  %v6343_v24 = vmov 5  }
 0x50d   :  { %5240 = vmatprep.subr.bf16.mxu0 %v8243_v39  ;;  %5272 = vmatprep.subr.bf16.mxu1 %v8244_v56  ;;  %v8253_v39 = vld [vmem:[#allocation112_spill] sm:$0xff] }
 0x50e   :  { %5971 = vset.pattern.permute.xlu0 %v6343_v24 }
 0x50f   :  { %2818 = vperm.xlu0 %5971, %v8253_v39  }
 0x510   :  { %5242 = vmatpush1.bf16.msra.mxu0 %v8245_v54  ;;  %5274 = vmatpush1.bf16.msra.mxu1 %v8246_v46 }
 0x511   :  { %5244 = vmatprep.subr.bf16.mxu0 %v8247_v55  ;;  %5276 = vmatprep.subr.bf16.mxu1 %v8248_v41 }
 0x514   :  { %5246 = vmatpush1.bf16.msra.mxu0 %v8249_v42  ;;  %5278 = vmatpush1.bf16.msra.mxu1 %v8250_v22  ;;  %v8256_v22 = vld [vmem:[#allocation108_spill] sm:$0xff] }
 0x515   :  { %5280 = vmatprep.subr.bf16.mxu0 %v8251_v37  ;;  %5312 = vmatprep.subr.bf16.mxu1 %v8252_v20 }
 0x5aa   :  { %v2219_v56 = vpop.f32.mrb[14].mxu0  ;;  %v2290_v54 = vpop.f32.mrb[14].mxu1 }
 0x5ab   :  { %v2295_v46 = vadd.f32 %v2219_v56, %v8254_v14  ;;  %v2221_v60 = vpop.f32.mrb[15].mxu0  ;;  %v2292_v55 = vpop.f32.mrb[15].mxu1  ;;  %v2297_v37 = vadd.f32 %v2290_v54, %v8256_v22 }
 0x5ac   :  { %v2296_v41 = vadd.f32 %v2221_v60, %v8255_v33  ;;  %v2298_v20 = vadd.f32 %v2292_v55, %v8257_v29  ;;  %v2325_v14 = vpop.permute.xlu1 %2324 }
 0x5ad   :  { %v4353_v28 = vmul.f32 -1.442695, %v2295_v46  ;;  %v4355_v63 = vmul.f32 -1.442695, %v2297_v37  ;;  %v2327_v60 = vmul.f32 %v2325_v14, %v8258_v2  ;;  %v2329_v2 = vmul.f32 %v2325_v14, %v8123_v18 }
 0x5ae   :  { %v4354_v42 = vmul.f32 -1.442695, %v2296_v41  ;;  %v8259_v41 = vld [vmem:[#allocation110_spill] sm:$0xff] }
 0x5af   :  { %6087 = vpow2.f32 %v4353_v28  ;;  %v2328_v28 = vmul.f32 %v2325_v14, %v8259_v41  ;;  %v2331_v55 = vadd.f32 %v2327_v60, %v8053_v25 }
 0x5b0   :  { %6089 = vpow2.f32 %v4354_v42 }
 0x5b1   :  { %6091 = vtanh.f32 %v2298_v20  ;;  %v2332_v20 = vadd.f32 %v2328_v28, %v8054_v5 }
 0x5b2   :  { %6093 = vpow2.f32 %v4355_v63 }
 0x5b9   :  { %v6088_v24 = vpop.eup %6087 }
 0x5ba   :  { %v2308_v3 = vadd.f32 1.0, %v6088_v24  ;;  %v6090_v39 = vpop.eup %6089 }
 0x5bb   :  { %v2309_v56 = vadd.f32 1.0, %v6090_v39  ;;  %v6092_v46 = vpop.eup %6091 }
 0x5bc   :  { %6095 = vrcp.f32 %v2308_v3  ;;  %v6094_v42 = vpop.eup %6093 }
 0x5bd   :  { %6097 = vrcp.f32 %v2309_v56  ;;  %v2310_v29 = vadd.f32 1.0, %v6094_v42 }
 0x5bf   :  { %6099 = vrcp.f32 %v2310_v29 }
 0x5c6   :  { %v6096_v33 = vpop.eup %6095 }
 0x5c7   :  { %v2319_v54 = vmul.f32 %v6096_v33, %v6092_v46  ;;  %v6098_v37 = vpop.eup %6097  ;;  %v2330_v46 = vmul.f32 %v2325_v14, %v6798_v0 }
 0x5c8   :  { %v2318_v63 = vmul.f32 %v6098_v37, %v7149_v53  ;;  %v2333_v53 = vadd.f32 %v2329_v2, %v6794_v32 }
 0x5c9   :  { %v2334_v28 = vadd.f32 %v2330_v46, %v6802_v8 }
 0x5ca   :  { %v2401_v3 = vpop.f32.mrb[16].mxu0  ;;  %v2472_v24 = vpop.f32.mrb[16].mxu1  ;;  %v7272_v39 = vadd.f32 %v2319_v54, %v2318_v63 }
 0x5cb   :  { %v2477_v56 = vadd.f32 %v2401_v3, %v2331_v55  ;;  %v2403_v22 = vpop.f32.mrb[17].mxu0  ;;  %v2474_v41 = vpop.f32.mrb[17].mxu1  ;;  %v2479_v42 = vadd.f32 %v2472_v24, %v2333_v53 }
 0x5cc   :  { %v2478_v30 = vadd.f32 %v2403_v22, %v2332_v20  ;;  %6101 = vtanh.f32 %v7272_v39  ;;  %v6100_v54 = vpop.eup %6099  ;;  %v2480_v55 = vadd.f32 %v2474_v41, %v2334_v28 }
 0x5cd   :  { %v4356_v33 = vmul.f32 -1.442695, %v2477_v56  ;;  %v4358_v63 = vmul.f32 -1.442695, %v2479_v42  ;;  %v8260_v42 = vld [vmem:[#allocation15_spill] sm:$0xff] }
 0x5ce   :  { %v4357_v60 = vmul.f32 -1.442695, %v2478_v30 }
 0x5cf   :  { %6103 = vpow2.f32 %v4356_v33 }
 0x5d0   :  { %6105 = vpow2.f32 %v4357_v60 }
 0x5d1   :  { %6107 = vtanh.f32 %v2480_v55  ;;  %v8262_v55 = vld [vmem:[#allocation17_spill] sm:$0xff] }
 0x5d2   :  { %6109 = vpow2.f32 %v4358_v63  ;;  %v8264_v63 = vld [vmem:[#allocation19_spill] sm:$0xff] }
 0x5d6   :  { %v6102_v37 = vpop.eup %6101 }
 0x5d7   :  { %v2322_v3 = vmul.f32 %v6102_v37, %v6100_v54  ;;  %v8261_v54 = vld [vmem:[#allocation16_spill] sm:$0xff]  ;;  %v8263_v37 = vld [vmem:[#allocation18_spill] sm:$0xff] }
 0x5d9   :  { %v6104_v29 = vpop.eup %6103  ;;  %2570 = vmatmul.mubr.f32.vlgmr.msra.gmra.mrb[18].mxu0 %v2322_v3  ;;  %2641 = vmatmul.mubr.f32.vlgmr.msra.gmra.mrb[18].mxu1 %v2322_v3  ;;  %v8265_v3 = vld [vmem:[#allocation20_spill] sm:$0xff] }
 0x5da   :  { %v2490_v22 = vadd.f32 1.0, %v6104_v29  ;;  %v6106_v30 = vpop.eup %6105  ;;  %5282 = vmatpush1.bf16.msra.mxu0 %v8056_v17  ;;  %5314 = vmatpush1.bf16.msra.mxu1 %v8057_v6  ;;  %v8266_v29 = vld [vmem:[#allocation21_spill] sm:$0xff] }
 0x5db   :  { %v2491_v2 = vadd.f32 1.0, %v6106_v30  ;;  %5284 = vmatprep.subr.bf16.mxu0 %v8058_v52  ;;  %5316 = vmatprep.subr.bf16.mxu1 %v8059_v35  ;;  %v6108_v14 = vpop.eup %6107  ;;  %v8268_v30 = vld [vmem:[#allocation23_spill] sm:$0xff] }
 0x5dc   :  { %6111 = vrcp.f32 %v2490_v22  ;;  %2711 = vmatprep.mubr.f32.mxu0 %v7981_v36  ;;  %2782 = vmatprep.mubr.f32.mxu1 %v7981_v36  ;;  %v6110_v41 = vpop.eup %6109  ;;  %v8267_v22 = vld [vmem:[#allocation22_spill] sm:$0xff] }
 0x5dd   :  { %6113 = vrcp.f32 %v2491_v2  ;;  %v2492_v33 = vadd.f32 1.0, %v6110_v41  ;;  %v8269_v2 = vld [vmem:[#allocation24_spill] sm:$0xff]  ;;  %v8271_v41 = vld [vmem:[#allocation26_spill] sm:$0xff] }
 0x5de   :  { %5286 = vmatpush1.bf16.msra.mxu0 %v8060_v43  ;;  %5318 = vmatpush1.bf16.msra.mxu1 %v8061_v45 }
 0x5df   :  { %5288 = vmatprep.subr.bf16.mxu0 %v8124_v49  ;;  %5320 = vmatprep.subr.bf16.mxu1 %v8125_v58  ;;  %6115 = vrcp.f32 %v2492_v33  ;;  %v8275_v33 = vld [vmem:[#allocation30_spill] sm:$0xff] }
 0x5e2   :  { %5290 = vmatpush1.bf16.msra.mxu0 %v8126_v23  ;;  %5322 = vmatpush1.bf16.msra.mxu1 %v8127_v16 }
 0x5e3   :  { %5292 = vmatprep.subr.bf16.mxu0 %v8128_v40  ;;  %5324 = vmatprep.subr.bf16.mxu1 %v8129_v47 }
 0x5e6   :  { %v6112_v20 = vpop.eup %6111  ;;  %5294 = vmatpush1.bf16.msra.mxu0 %v8068_v48  ;;  %5326 = vmatpush1.bf16.msra.mxu1 %v8069_v44 }
 0x5e7   :  { %v2501_v24 = vmul.f32 %v6112_v20, %v6108_v14  ;;  %v6114_v56 = vpop.eup %6113  ;;  %5296 = vmatprep.subr.bf16.mxu0 %v8130_v27  ;;  %5328 = vmatprep.subr.bf16.mxu1 %v8131_v13  ;;  %v8270_v14 = vld [vmem:[#allocation25_spill] sm:$0xff]  ;;  %v8272_v20 = vld [vmem:[#allocation27_spill] sm:$0xff] }
 0x5e8   :  { %v2500_v60 = vmul.f32 %v6114_v56, %v7175_v59  ;;  %v8274_v56 = vld [vmem:[#allocation29_spill] sm:$0xff] }
 0x5e9   :  { %v6116_v59 = vpop.eup %6115 }
 0x5ea   :  { %v7298_v46 = vadd.f32 %v2501_v24, %v2500_v60  ;;  %5298 = vmatpush1.bf16.msra.mxu0 %v8132_v38  ;;  %5330 = vmatpush1.bf16.msra.mxu1 %v8133_v9  ;;  %v8273_v24 = vld [vmem:[#allocation28_spill] sm:$0xff]  ;;  %v8276_v60 = vld [vmem:[#allocation31_spill] sm:$0xff] }
 0x5eb   :  { %5300 = vmatprep.subr.bf16.mxu0 %v8134_v4  ;;  %5332 = vmatprep.subr.bf16.mxu1 %v8135_v26 }
 0x5ec   :  { %6117 = vtanh.f32 %v7298_v46 }
 0x5ee   :  { %5302 = vmatpush1.bf16.msra.mxu0 %v8136_v57  ;;  %5334 = vmatpush1.bf16.msra.mxu1 %v8137_v51 }
 0x5ef   :  { %5304 = vmatprep.subr.bf16.mxu0 %v8138_v10  ;;  %5336 = vmatprep.subr.bf16.mxu1 %v8079_v21 }
 0x5f2   :  { %5306 = vmatpush1.bf16.msra.mxu0 %v8080_v62  ;;  %5338 = vmatpush1.bf16.msra.mxu1 %v8081_v50 }
 0x5f3   :  { %5308 = vmatprep.subr.bf16.mxu0 %v8082_v34  ;;  %5340 = vmatprep.subr.bf16.mxu1 %v8083_v12 }
 0x5f6   :  { %v6118_v53 = vpop.eup %6117  ;;  %5310 = vmatpush1.bf16.msra.mxu0 %v8084_v61  ;;  %5342 = vmatpush1.bf16.msra.mxu1 %v8085_v1 }
 0x5f7   :  { %5344 = vmatprep.subr.bf16.mxu0 %v8086_v7  ;;  %5376 = vmatprep.subr.bf16.mxu1 %v8087_v31  ;;  %v2504_v28 = vmul.f32 %v6118_v53, %v6116_v59  ;;  %v8277_v59 = vld [vmem:[#allocation32_spill] sm:$0xff]  ;;  %v8278_v53 = vld [vmem:[#allocation33_spill] sm:$0xff] }
 0x5f9   :  { %2712 = vmatmul.mubr.f32.vlgmr.msra.gmra.mrb[18].mxu0 %v2504_v28  ;;  %2783 = vmatmul.mubr.f32.vlgmr.msra.gmra.mrb[18].mxu1 %v2504_v28 }
 0x5fa   :  { %5346 = vmatpush1.bf16.msra.mxu0 %v6462_v11  ;;  %5378 = vmatpush1.bf16.msra.mxu1 %v6465_v15 }
 0x5fb   :  { %5348 = vmatprep.subr.bf16.mxu0 %v6469_v19  ;;  %5380 = vmatprep.subr.bf16.mxu1 %v8260_v42 }
 0x5fc   :  { %2893 = vmatprep.mubr.f32.mxu0 %v7981_v36  ;;  %2964 = vmatprep.mubr.f32.mxu1 %v7981_v36 }
 0x5fe   :  { %5350 = vmatpush1.bf16.msra.mxu0 %v8261_v54  ;;  %5382 = vmatpush1.bf16.msra.mxu1 %v8262_v55  ;;  %v8326_v54 = vld [vmem:[#allocation109_spill] sm:$0xff] }
 0x5ff   :  { %5352 = vmatprep.subr.bf16.mxu0 %v8263_v37  ;;  %5384 = vmatprep.subr.bf16.mxu1 %v8264_v63 }
 0x602   :  { %5354 = vmatpush1.bf16.msra.mxu0 %v8265_v3  ;;  %5386 = vmatpush1.bf16.msra.mxu1 %v8266_v29  ;;  %v8325_v3 = vld [vmem:[#allocation111_spill] sm:$0xff] }
 0x603   :  { %5356 = vmatprep.subr.bf16.mxu0 %v8267_v22  ;;  %5388 = vmatprep.subr.bf16.mxu1 %v8268_v30  ;;  %v8279_v30 = vld [vmem:[#allocation34_spill] sm:$0xff]  ;;  %v8323_v22 = vld [vmem:[#allocation107_spill] sm:$0xff] }
 0x606   :  { %5358 = vmatpush1.bf16.msra.mxu0 %v8269_v2  ;;  %5390 = vmatpush1.bf16.msra.mxu1 %v8270_v14  ;;  %v8280_v2 = vld [vmem:[#allocation36_spill] sm:$0xff]  ;;  %v8281_v14 = vld [vmem:[#allocation37_spill] sm:$0xff] }
 0x607   :  { %5360 = vmatprep.subr.bf16.mxu0 %v8271_v41  ;;  %5392 = vmatprep.subr.bf16.mxu1 %v8272_v20  ;;  %v8282_v41 = vld [vmem:[#allocation38_spill] sm:$0xff]  ;;  %v8283_v20 = vld [vmem:[#allocation39_spill] sm:$0xff] }
 0x60a   :  { %5362 = vmatpush1.bf16.msra.mxu0 %v8273_v24  ;;  %5394 = vmatpush1.bf16.msra.mxu1 %v8274_v56  ;;  %v8284_v24 = vld [vmem:[#allocation40_spill] sm:$0xff]  ;;  %v8285_v56 = vld [vmem:[#allocation41_spill] sm:$0xff] }
 0x60b   :  { %5364 = vmatprep.subr.bf16.mxu0 %v8275_v33  ;;  %5396 = vmatprep.subr.bf16.mxu1 %v8276_v60  ;;  %v8286_v33 = vld [vmem:[#allocation42_spill] sm:$0xff]  ;;  %v8287_v60 = vld [vmem:[#allocation43_spill] sm:$0xff] }
 0x60e   :  { %5366 = vmatpush1.bf16.msra.mxu0 %v8277_v59  ;;  %5398 = vmatpush1.bf16.msra.mxu1 %v8278_v53  ;;  %v8288_v59 = vld [vmem:[#allocation44_spill] sm:$0xff] }
 0x60f   :  { %5368 = vmatprep.subr.bf16.mxu0 %v8279_v30  ;;  %5400 = vmatprep.subr.bf16.mxu1 %v8280_v2  ;;  %v8289_v30 = vld [vmem:[#allocation45_spill] sm:$0xff]  ;;  %v8290_v2 = vld [vmem:[#allocation46_spill] sm:$0xff] }
 0x612   :  { %5370 = vmatpush1.bf16.msra.mxu0 %v8281_v14  ;;  %5402 = vmatpush1.bf16.msra.mxu1 %v8282_v41  ;;  %v8291_v14 = vld [vmem:[#allocation47_spill] sm:$0xff]  ;;  %v8292_v41 = vld [vmem:[#allocation48_spill] sm:$0xff] }
 0x613   :  { %5372 = vmatprep.subr.bf16.mxu0 %v8283_v20  ;;  %5404 = vmatprep.subr.bf16.mxu1 %v8284_v24  ;;  %v8302_v24 = vld [vmem:[#allocation58_spill] sm:$0xff]  ;;  %v8303_v20 = vld [vmem:[#allocation59_spill] sm:$0xff] }
 0x616   :  { %5374 = vmatpush1.bf16.msra.mxu0 %v8285_v56  ;;  %5406 = vmatpush1.bf16.msra.mxu1 %v8286_v33  ;;  %v8293_v56 = vld [vmem:[#allocation49_spill] sm:$0xff]  ;;  %v8294_v33 = vld [vmem:[#allocation50_spill] sm:$0xff] }
 0x617   :  { %5408 = vmatprep.subr.bf16.mxu0 %v8287_v60  ;;  %5440 = vmatprep.subr.bf16.mxu1 %v8288_v59  ;;  %v8295_v60 = vld [vmem:[#allocation51_spill] sm:$0xff]  ;;  %v8296_v59 = vld [vmem:[#allocation52_spill] sm:$0xff] }
 0x619   :  { %2894 = vmatmul.mubr.f32.vlgmr.msra.gmra.mrb[20].mxu0 %v2504_v28  ;;  %2965 = vmatmul.mubr.f32.vlgmr.msra.gmra.mrb[20].mxu1 %v2504_v28  ;;  %v8297_v28 = vld [vmem:[#allocation53_spill] sm:$0xff] }
 0x61a   :  { %5410 = vmatpush1.bf16.msra.mxu0 %v8289_v30  ;;  %5442 = vmatpush1.bf16.msra.mxu1 %v8290_v2  ;;  %v8298_v30 = vld [vmem:[#allocation54_spill] sm:$0xff]  ;;  %v8299_v2 = vld [vmem:[#allocation55_spill] sm:$0xff] }
 0x61b   :  { %5412 = vmatprep.subr.bf16.mxu0 %v8291_v14  ;;  %5444 = vmatprep.subr.bf16.mxu1 %v8292_v41  ;;  %v8300_v14 = vld [vmem:[#allocation56_spill] sm:$0xff]  ;;  %v8301_v41 = vld [vmem:[#allocation57_spill] sm:$0xff] }
 0x61c   :  { %3063 = vmatprep.mubr.f32.mxu0 %v7981_v36  ;;  %3134 = vmatprep.mubr.f32.mxu1 %v7981_v36 }
 0x61e   :  { %5414 = vmatpush1.bf16.msra.mxu0 %v8293_v56  ;;  %5446 = vmatpush1.bf16.msra.mxu1 %v8294_v33  ;;  %v8304_v56 = vld [vmem:[#allocation60_spill] sm:$0xff]  ;;  %v8305_v33 = vld [vmem:[#allocation61_spill] sm:$0xff] }
 0x61f   :  { %5416 = vmatprep.subr.bf16.mxu0 %v8295_v60  ;;  %5448 = vmatprep.subr.bf16.mxu1 %v8296_v59  ;;  %v8306_v60 = vld [vmem:[#allocation62_spill] sm:$0xff]  ;;  %v8307_v59 = vld [vmem:[#allocation63_spill] sm:$0xff] }
 0x622   :  { %5418 = vmatpush1.bf16.msra.mxu0 %v8297_v28  ;;  %5450 = vmatpush1.bf16.msra.mxu1 %v8298_v30  ;;  %v8308_v28 = vld [vmem:[#allocation64_spill] sm:$0xff]  ;;  %v8309_v30 = vld [vmem:[#allocation65_spill] sm:$0xff] }
 0x623   :  { %5420 = vmatprep.subr.bf16.mxu0 %v8299_v2  ;;  %5452 = vmatprep.subr.bf16.mxu1 %v8300_v14  ;;  %v8310_v2 = vld [vmem:[#allocation66_spill] sm:$0xff]  ;;  %v8311_v14 = vld [vmem:[#allocation67_spill] sm:$0xff] }
 0x626   :  { %5422 = vmatpush1.bf16.msra.mxu0 %v8301_v41  ;;  %5454 = vmatpush1.bf16.msra.mxu1 %v8302_v24  ;;  %v8312_v41 = vld [vmem:[#allocation68_spill] sm:$0xff]  ;;  %v8313_v24 = vld [vmem:[#allocation69_spill] sm:$0xff] }
 0x627   :  { %5424 = vmatprep.subr.bf16.mxu0 %v8303_v20  ;;  %5456 = vmatprep.subr.bf16.mxu1 %v8304_v56  ;;  %v8314_v20 = vld [vmem:[#allocation70_spill] sm:$0xff]  ;;  %v8315_v56 = vld [vmem:[#allocation71_spill] sm:$0xff] }
 0x62a   :  { %5426 = vmatpush1.bf16.msra.mxu0 %v8305_v33  ;;  %5458 = vmatpush1.bf16.msra.mxu1 %v8306_v60  ;;  %v8316_v33 = vld [vmem:[#allocation72_spill] sm:$0xff]  ;;  %v8317_v60 = vld [vmem:[#allocation73_spill] sm:$0xff] }
 0x62b   :  { %5428 = vmatprep.subr.bf16.mxu0 %v8307_v59  ;;  %5460 = vmatprep.subr.bf16.mxu1 %v8308_v28  ;;  %v8318_v59 = vld [vmem:[#allocation74_spill] sm:$0xff]  ;;  %v8319_v28 = vld [vmem:[#allocation75_spill] sm:$0xff] }
 0x62e   :  { %5430 = vmatpush1.bf16.msra.mxu0 %v8309_v30  ;;  %5462 = vmatpush1.bf16.msra.mxu1 %v8310_v2  ;;  %v8320_v30 = vld [vmem:[#allocation76_spill] sm:$0xff]  ;;  %v6344_v2 = vmov 6  }
 0x62f   :  { %5432 = vmatprep.subr.bf16.mxu0 %v8311_v14  ;;  %5464 = vmatprep.subr.bf16.mxu1 %v8312_v41  ;;  %v7385_v14 = vld [vmem:[#allocation3] sm:$0xff]  ;;  %v8322_v41 = vld [vmem:[#allocation35_spill] sm:$0xff] }
 0x630   :  { %5972 = vset.pattern.permute.xlu1 %v6344_v2  ;;  %8321 = vst [vmem:[#allocation113_spill] sm:$0xff] %v7385_v14 }
 0x631   :  { %3312 = vperm.xlu1 %5972, %v7385_v14  }
 0x632   :  { %5434 = vmatpush1.bf16.msra.mxu0 %v8313_v24  ;;  %5466 = vmatpush1.bf16.msra.mxu1 %v8314_v20 }
 0x633   :  { %5436 = vmatprep.subr.bf16.mxu0 %v8315_v56  ;;  %5468 = vmatprep.subr.bf16.mxu1 %v8316_v33 }
 0x636   :  { %5438 = vmatpush1.bf16.msra.mxu0 %v8317_v60  ;;  %5470 = vmatpush1.bf16.msra.mxu1 %v8318_v59 }
 0x637   :  { %5472 = vmatprep.subr.bf16.mxu0 %v8319_v28  ;;  %5504 = vmatprep.subr.bf16.mxu1 %v8320_v30  ;;  %v8324_v28 = vld [vmem:[#allocation108_spill] sm:$0xff] }
 0x6cc   :  { %v2713_v24 = vpop.f32.mrb[18].mxu0  ;;  %v2784_v20 = vpop.f32.mrb[18].mxu1 }
 0x6cd   :  { %v2789_v56 = vadd.f32 %v2713_v24, %v8322_v41  ;;  %v2715_v53 = vpop.f32.mrb[19].mxu0  ;;  %v2786_v33 = vpop.f32.mrb[19].mxu1  ;;  %v2791_v30 = vadd.f32 %v2784_v20, %v8324_v28 }
 0x6ce   :  { %v2790_v60 = vadd.f32 %v2715_v53, %v8323_v22  ;;  %v2792_v2 = vadd.f32 %v2786_v33, %v8325_v3  ;;  %v2819_v41 = vpop.permute.xlu0 %2818 }
 0x6cf   :  { %v4359_v29 = vmul.f32 -1.442695, %v2789_v56  ;;  %v4361_v63 = vmul.f32 -1.442695, %v2791_v30  ;;  %v2821_v53 = vmul.f32 %v2819_v41, %v8326_v54  ;;  %v2823_v54 = vmul.f32 %v2819_v41, %v8123_v18 }
 0x6d0   :  { %v4360_v59 = vmul.f32 -1.442695, %v2790_v60  ;;  %v8327_v60 = vld [vmem:[#allocation110_spill] sm:$0xff] }
 0x6d1   :  { %6119 = vpow2.f32 %v4359_v29  ;;  %v2822_v29 = vmul.f32 %v2819_v41, %v8327_v60  ;;  %v2825_v33 = vadd.f32 %v2821_v53, %v8053_v25 }
 0x6d2   :  { %6121 = vpow2.f32 %v4360_v59 }
 0x6d3   :  { %6123 = vtanh.f32 %v2792_v2 }
 0x6d4   :  { %6125 = vpow2.f32 %v4361_v63 }
 0x6db   :  { %v6120_v37 = vpop.eup %6119 }
 0x6dc   :  { %v2802_v55 = vadd.f32 1.0, %v6120_v37  ;;  %v6122_v14 = vpop.eup %6121  ;;  %v2826_v37 = vadd.f32 %v2822_v29, %v8054_v5 }
 0x6dd   :  { %v2803_v24 = vadd.f32 1.0, %v6122_v14  ;;  %v6124_v56 = vpop.eup %6123 }
 0x6de   :  { %6127 = vrcp.f32 %v2802_v55  ;;  %v6126_v59 = vpop.eup %6125 }
 0x6df   :  { %6129 = vrcp.f32 %v2803_v24  ;;  %v2804_v3 = vadd.f32 1.0, %v6126_v59 }
 0x6e1   :  { %6131 = vrcp.f32 %v2804_v3 }
 0x6e8   :  { %v6128_v22 = vpop.eup %6127 }
 0x6e9   :  { %v2813_v20 = vmul.f32 %v6128_v22, %v6124_v56  ;;  %v6130_v30 = vpop.eup %6129  ;;  %v2824_v56 = vmul.f32 %v2819_v41, %v6798_v0 }
 0x6ea   :  { %v2812_v63 = vmul.f32 %v6130_v30, %v7272_v39  ;;  %v2827_v39 = vadd.f32 %v2823_v54, %v6794_v32 }
 0x6eb   :  { %v2828_v29 = vadd.f32 %v2824_v56, %v6802_v8 }
 0x6ec   :  { %v2895_v55 = vpop.f32.mrb[20].mxu0  ;;  %v2966_v14 = vpop.f32.mrb[20].mxu1  ;;  %v7397_v2 = vadd.f32 %v2813_v20, %v2812_v63 }
 0x6ed   :  { %v2971_v24 = vadd.f32 %v2895_v55, %v2825_v33  ;;  %v2897_v28 = vpop.f32.mrb[21].mxu0  ;;  %v2968_v60 = vpop.f32.mrb[21].mxu1  ;;  %v2973_v59 = vadd.f32 %v2966_v14, %v2827_v39 }
 0x6ee   :  { %v2972_v42 = vadd.f32 %v2897_v28, %v2826_v37  ;;  %6133 = vtanh.f32 %v7397_v2  ;;  %v6132_v20 = vpop.eup %6131  ;;  %v2974_v33 = vadd.f32 %v2968_v60, %v2828_v29 }
 0x6ef   :  { %v4362_v22 = vmul.f32 -1.442695, %v2971_v24  ;;  %v4364_v63 = vmul.f32 -1.442695, %v2973_v59  ;;  %v8328_v59 = vld [vmem:[#allocation15_spill] sm:$0xff] }
 0x6f0   :  { %v4363_v53 = vmul.f32 -1.442695, %v2972_v42 }
 0x6f1   :  { %6135 = vpow2.f32 %v4362_v22 }
 0x6f2   :  { %6137 = vpow2.f32 %v4363_v53 }
 0x6f3   :  { %6139 = vtanh.f32 %v2974_v33  ;;  %v8330_v33 = vld [vmem:[#allocation17_spill] sm:$0xff] }
 0x6f4   :  { %6141 = vpow2.f32 %v4364_v63  ;;  %v8332_v63 = vld [vmem:[#allocation19_spill] sm:$0xff] }
 0x6f8   :  { %v6134_v30 = vpop.eup %6133 }
 0x6f9   :  { %v2816_v55 = vmul.f32 %v6134_v30, %v6132_v20  ;;  %v8329_v20 = vld [vmem:[#allocation16_spill] sm:$0xff]  ;;  %v8331_v30 = vld [vmem:[#allocation18_spill] sm:$0xff] }
 0x6fb   :  { %v6136_v3 = vpop.eup %6135  ;;  %3064 = vmatmul.mubr.f32.vlgmr.msra.gmra.mrb[22].mxu0 %v2816_v55  ;;  %3135 = vmatmul.mubr.f32.vlgmr.msra.gmra.mrb[22].mxu1 %v2816_v55  ;;  %v8333_v55 = vld [vmem:[#allocation20_spill] sm:$0xff] }
 0x6fc   :  { %v2984_v28 = vadd.f32 1.0, %v6136_v3  ;;  %v6138_v42 = vpop.eup %6137  ;;  %5474 = vmatpush1.bf16.msra.mxu0 %v8056_v17  ;;  %5506 = vmatpush1.bf16.msra.mxu1 %v8057_v6  ;;  %v8334_v3 = vld [vmem:[#allocation21_spill] sm:$0xff] }
 0x6fd   :  { %v2985_v54 = vadd.f32 1.0, %v6138_v42  ;;  %5476 = vmatprep.subr.bf16.mxu0 %v8058_v52  ;;  %5508 = vmatprep.subr.bf16.mxu1 %v8059_v35  ;;  %v6140_v41 = vpop.eup %6139  ;;  %v8336_v42 = vld [vmem:[#allocation23_spill] sm:$0xff] }
 0x6fe   :  { %6143 = vrcp.f32 %v2984_v28  ;;  %3205 = vmatprep.mubr.f32.mxu0 %v7981_v36  ;;  %3276 = vmatprep.mubr.f32.mxu1 %v7981_v36  ;;  %v6142_v60 = vpop.eup %6141  ;;  %v8335_v28 = vld [vmem:[#allocation22_spill] sm:$0xff] }
 0x6ff   :  { %6145 = vrcp.f32 %v2985_v54  ;;  %v2986_v22 = vadd.f32 1.0, %v6142_v60  ;;  %v8337_v54 = vld [vmem:[#allocation24_spill] sm:$0xff]  ;;  %v8339_v60 = vld [vmem:[#allocation26_spill] sm:$0xff] }
 0x700   :  { %5478 = vmatpush1.bf16.msra.mxu0 %v8060_v43  ;;  %5510 = vmatpush1.bf16.msra.mxu1 %v8061_v45 }
 0x701   :  { %5480 = vmatprep.subr.bf16.mxu0 %v8124_v49  ;;  %5512 = vmatprep.subr.bf16.mxu1 %v8125_v58  ;;  %6147 = vrcp.f32 %v2986_v22  ;;  %v8343_v22 = vld [vmem:[#allocation30_spill] sm:$0xff] }
 0x704   :  { %5482 = vmatpush1.bf16.msra.mxu0 %v8126_v23  ;;  %5514 = vmatpush1.bf16.msra.mxu1 %v8127_v16 }
 0x705   :  { %5484 = vmatprep.subr.bf16.mxu0 %v8128_v40  ;;  %5516 = vmatprep.subr.bf16.mxu1 %v8129_v47 }
 0x708   :  { %v6144_v37 = vpop.eup %6143  ;;  %5486 = vmatpush1.bf16.msra.mxu0 %v8068_v48  ;;  %5518 = vmatpush1.bf16.msra.mxu1 %v8069_v44 }
 0x709   :  { %v2995_v14 = vmul.f32 %v6144_v37, %v6140_v41  ;;  %v6146_v24 = vpop.eup %6145  ;;  %5488 = vmatprep.subr.bf16.mxu0 %v8130_v27  ;;  %5520 = vmatprep.subr.bf16.mxu1 %v8131_v13  ;;  %v8338_v41 = vld [vmem:[#allocation25_spill] sm:$0xff]  ;;  %v8340_v37 = vld [vmem:[#allocation27_spill] sm:$0xff] }
 0x70a   :  { %v2994_v53 = vmul.f32 %v6146_v24, %v7298_v46  ;;  %v8342_v24 = vld [vmem:[#allocation29_spill] sm:$0xff] }
 0x70b   :  { %v6148_v46 = vpop.eup %6147 }
 0x70c   :  { %v7423_v56 = vadd.f32 %v2995_v14, %v2994_v53  ;;  %5490 = vmatpush1.bf16.msra.mxu0 %v8132_v38  ;;  %5522 = vmatpush1.bf16.msra.mxu1 %v8133_v9  ;;  %v8341_v14 = vld [vmem:[#allocation28_spill] sm:$0xff]  ;;  %v8344_v53 = vld [vmem:[#allocation31_spill] sm:$0xff] }
 0x70d   :  { %5492 = vmatprep.subr.bf16.mxu0 %v8134_v4  ;;  %5524 = vmatprep.subr.bf16.mxu1 %v8135_v26 }
 0x70e   :  { %6149 = vtanh.f32 %v7423_v56 }
 0x710   :  { %5494 = vmatpush1.bf16.msra.mxu0 %v8136_v57  ;;  %5526 = vmatpush1.bf16.msra.mxu1 %v8137_v51 }
 0x711   :  { %5496 = vmatprep.subr.bf16.mxu0 %v8138_v10  ;;  %5528 = vmatprep.subr.bf16.mxu1 %v8079_v21 }
 0x714   :  { %5498 = vmatpush1.bf16.msra.mxu0 %v8080_v62  ;;  %5530 = vmatpush1.bf16.msra.mxu1 %v8081_v50 }
 0x715   :  { %5500 = vmatprep.subr.bf16.mxu0 %v8082_v34  ;;  %5532 = vmatprep.subr.bf16.mxu1 %v8083_v12 }
 0x718   :  { %v6150_v39 = vpop.eup %6149  ;;  %5502 = vmatpush1.bf16.msra.mxu0 %v8084_v61  ;;  %5534 = vmatpush1.bf16.msra.mxu1 %v8085_v1 }
 0x719   :  { %v2998_v29 = vmul.f32 %v6150_v39, %v6148_v46  ;;  %5536 = vmatprep.subr.bf16.mxu0 %v8086_v7  ;;  %5568 = vmatprep.subr.bf16.mxu1 %v8087_v31  ;;  %v8345_v46 = vld [vmem:[#allocation32_spill] sm:$0xff]  ;;  %v8346_v39 = vld [vmem:[#allocation33_spill] sm:$0xff] }
 0x71b   :  { %3206 = vmatmul.mubr.f32.vlgmr.msra.gmra.mrb[22].mxu0 %v2998_v29  ;;  %3277 = vmatmul.mubr.f32.vlgmr.msra.gmra.mrb[22].mxu1 %v2998_v29 }
 0x71c   :  { %5538 = vmatpush1.bf16.msra.mxu0 %v6462_v11  ;;  %5570 = vmatpush1.bf16.msra.mxu1 %v6465_v15 }
 0x71d   :  { %5540 = vmatprep.subr.bf16.mxu0 %v6469_v19  ;;  %5572 = vmatprep.subr.bf16.mxu1 %v8328_v59 }
 0x71e   :  { %3387 = vmatprep.mubr.f32.mxu0 %v7981_v36  ;;  %3458 = vmatprep.mubr.f32.mxu1 %v7981_v36 }
 0x720   :  { %5542 = vmatpush1.bf16.msra.mxu0 %v8329_v20  ;;  %5574 = vmatpush1.bf16.msra.mxu1 %v8330_v33  ;;  %v8394_v20 = vld [vmem:[#allocation109_spill] sm:$0xff] }
 0x721   :  { %5544 = vmatprep.subr.bf16.mxu0 %v8331_v30  ;;  %5576 = vmatprep.subr.bf16.mxu1 %v8332_v63 }
 0x724   :  { %5546 = vmatpush1.bf16.msra.mxu0 %v8333_v55  ;;  %5578 = vmatpush1.bf16.msra.mxu1 %v8334_v3 }
 0x725   :  { %5548 = vmatprep.subr.bf16.mxu0 %v8335_v28  ;;  %5580 = vmatprep.subr.bf16.mxu1 %v8336_v42  ;;  %v8347_v42 = vld [vmem:[#allocation34_spill] sm:$0xff] }
 0x728   :  { %5550 = vmatpush1.bf16.msra.mxu0 %v8337_v54  ;;  %5582 = vmatpush1.bf16.msra.mxu1 %v8338_v41  ;;  %v8348_v54 = vld [vmem:[#allocation36_spill] sm:$0xff]  ;;  %v8349_v41 = vld [vmem:[#allocation37_spill] sm:$0xff] }
 0x729   :  { %5552 = vmatprep.subr.bf16.mxu0 %v8339_v60  ;;  %5584 = vmatprep.subr.bf16.mxu1 %v8340_v37  ;;  %v8350_v60 = vld [vmem:[#allocation38_spill] sm:$0xff]  ;;  %v8351_v37 = vld [vmem:[#allocation39_spill] sm:$0xff] }
 0x72c   :  { %5554 = vmatpush1.bf16.msra.mxu0 %v8341_v14  ;;  %5586 = vmatpush1.bf16.msra.mxu1 %v8342_v24  ;;  %v8352_v14 = vld [vmem:[#allocation40_spill] sm:$0xff]  ;;  %v8353_v24 = vld [vmem:[#allocation41_spill] sm:$0xff] }
 0x72d   :  { %5556 = vmatprep.subr.bf16.mxu0 %v8343_v22  ;;  %5588 = vmatprep.subr.bf16.mxu1 %v8344_v53  ;;  %v8354_v22 = vld [vmem:[#allocation42_spill] sm:$0xff]  ;;  %v8355_v53 = vld [vmem:[#allocation43_spill] sm:$0xff] }
 0x730   :  { %5558 = vmatpush1.bf16.msra.mxu0 %v8345_v46  ;;  %5590 = vmatpush1.bf16.msra.mxu1 %v8346_v39  ;;  %v8356_v46 = vld [vmem:[#allocation44_spill] sm:$0xff] }
 0x731   :  { %5560 = vmatprep.subr.bf16.mxu0 %v8347_v42  ;;  %5592 = vmatprep.subr.bf16.mxu1 %v8348_v54  ;;  %v8357_v42 = vld [vmem:[#allocation45_spill] sm:$0xff]  ;;  %v8358_v54 = vld [vmem:[#allocation46_spill] sm:$0xff] }
 0x734   :  { %5562 = vmatpush1.bf16.msra.mxu0 %v8349_v41  ;;  %5594 = vmatpush1.bf16.msra.mxu1 %v8350_v60  ;;  %v8359_v41 = vld [vmem:[#allocation47_spill] sm:$0xff]  ;;  %v8360_v60 = vld [vmem:[#allocation48_spill] sm:$0xff] }
 0x735   :  { %5564 = vmatprep.subr.bf16.mxu0 %v8351_v37  ;;  %5596 = vmatprep.subr.bf16.mxu1 %v8352_v14  ;;  %v8370_v14 = vld [vmem:[#allocation58_spill] sm:$0xff]  ;;  %v8371_v37 = vld [vmem:[#allocation59_spill] sm:$0xff] }
 0x738   :  { %5566 = vmatpush1.bf16.msra.mxu0 %v8353_v24  ;;  %5598 = vmatpush1.bf16.msra.mxu1 %v8354_v22  ;;  %v8361_v24 = vld [vmem:[#allocation49_spill] sm:$0xff]  ;;  %v8362_v22 = vld [vmem:[#allocation50_spill] sm:$0xff] }
 0x739   :  { %5600 = vmatprep.subr.bf16.mxu0 %v8355_v53  ;;  %5632 = vmatprep.subr.bf16.mxu1 %v8356_v46  ;;  %v8363_v53 = vld [vmem:[#allocation51_spill] sm:$0xff]  ;;  %v8364_v46 = vld [vmem:[#allocation52_spill] sm:$0xff] }
 0x73b   :  { %3388 = vmatmul.mubr.f32.vlgmr.msra.gmra.mrb[24].mxu0 %v2998_v29  ;;  %3459 = vmatmul.mubr.f32.vlgmr.msra.gmra.mrb[24].mxu1 %v2998_v29  ;;  %v8365_v29 = vld [vmem:[#allocation53_spill] sm:$0xff] }
 0x73c   :  { %5602 = vmatpush1.bf16.msra.mxu0 %v8357_v42  ;;  %5634 = vmatpush1.bf16.msra.mxu1 %v8358_v54  ;;  %v8366_v42 = vld [vmem:[#allocation54_spill] sm:$0xff]  ;;  %v8367_v54 = vld [vmem:[#allocation55_spill] sm:$0xff] }
 0x73d   :  { %5604 = vmatprep.subr.bf16.mxu0 %v8359_v41  ;;  %5636 = vmatprep.subr.bf16.mxu1 %v8360_v60  ;;  %v8368_v41 = vld [vmem:[#allocation56_spill] sm:$0xff]  ;;  %v8369_v60 = vld [vmem:[#allocation57_spill] sm:$0xff] }
 0x73e   :  { %3557 = vmatprep.mubr.f32.mxu0 %v7981_v36  ;;  %3628 = vmatprep.mubr.f32.mxu1 %v7981_v36 }
 0x740   :  { %5606 = vmatpush1.bf16.msra.mxu0 %v8361_v24  ;;  %5638 = vmatpush1.bf16.msra.mxu1 %v8362_v22  ;;  %v8372_v24 = vld [vmem:[#allocation60_spill] sm:$0xff]  ;;  %v8373_v22 = vld [vmem:[#allocation61_spill] sm:$0xff] }
 0x741   :  { %5608 = vmatprep.subr.bf16.mxu0 %v8363_v53  ;;  %5640 = vmatprep.subr.bf16.mxu1 %v8364_v46  ;;  %v8374_v53 = vld [vmem:[#allocation62_spill] sm:$0xff]  ;;  %v8375_v46 = vld [vmem:[#allocation63_spill] sm:$0xff] }
 0x744   :  { %5610 = vmatpush1.bf16.msra.mxu0 %v8365_v29  ;;  %5642 = vmatpush1.bf16.msra.mxu1 %v8366_v42  ;;  %v8376_v29 = vld [vmem:[#allocation64_spill] sm:$0xff]  ;;  %v8377_v42 = vld [vmem:[#allocation65_spill] sm:$0xff] }
 0x745   :  { %5612 = vmatprep.subr.bf16.mxu0 %v8367_v54  ;;  %5644 = vmatprep.subr.bf16.mxu1 %v8368_v41  ;;  %v8378_v54 = vld [vmem:[#allocation66_spill] sm:$0xff]  ;;  %v8379_v41 = vld [vmem:[#allocation67_spill] sm:$0xff] }
 0x748   :  { %5614 = vmatpush1.bf16.msra.mxu0 %v8369_v60  ;;  %5646 = vmatpush1.bf16.msra.mxu1 %v8370_v14  ;;  %v8380_v60 = vld [vmem:[#allocation68_spill] sm:$0xff]  ;;  %v8381_v14 = vld [vmem:[#allocation69_spill] sm:$0xff] }
 0x749   :  { %5616 = vmatprep.subr.bf16.mxu0 %v8371_v37  ;;  %5648 = vmatprep.subr.bf16.mxu1 %v8372_v24  ;;  %v8382_v37 = vld [vmem:[#allocation70_spill] sm:$0xff]  ;;  %v8383_v24 = vld [vmem:[#allocation71_spill] sm:$0xff] }
 0x74c   :  { %5618 = vmatpush1.bf16.msra.mxu0 %v8373_v22  ;;  %5650 = vmatpush1.bf16.msra.mxu1 %v8374_v53  ;;  %v8384_v22 = vld [vmem:[#allocation72_spill] sm:$0xff]  ;;  %v8385_v53 = vld [vmem:[#allocation73_spill] sm:$0xff] }
 0x74d   :  { %5620 = vmatprep.subr.bf16.mxu0 %v8375_v46  ;;  %5652 = vmatprep.subr.bf16.mxu1 %v8376_v29  ;;  %v8386_v46 = vld [vmem:[#allocation74_spill] sm:$0xff]  ;;  %v8387_v29 = vld [vmem:[#allocation75_spill] sm:$0xff] }
 0x750   :  { %5622 = vmatpush1.bf16.msra.mxu0 %v8377_v42  ;;  %5654 = vmatpush1.bf16.msra.mxu1 %v8378_v54  ;;  %v8388_v42 = vld [vmem:[#allocation76_spill] sm:$0xff]  ;;  %v6345_v54 = vmov 7  }
 0x751   :  { %5624 = vmatprep.subr.bf16.mxu0 %v8379_v41  ;;  %5656 = vmatprep.subr.bf16.mxu1 %v8380_v60  ;;  %v8389_v60 = vld [vmem:[#allocation113_spill] sm:$0xff] }
 0x752   :  { %5973 = vset.pattern.permute.xlu1 %v6345_v54  ;;  %5974 = vset.pattern.permute.xlu0 %v6345_v54 }
 0x753   :  { %3806 = vperm.xlu1 %5973, %v8389_v60  }
 0x754   :  { %5626 = vmatpush1.bf16.msra.mxu0 %v8381_v14  ;;  %5658 = vmatpush1.bf16.msra.mxu1 %v8382_v37  ;;  %v8390_v37 = vld [vmem:[#allocation35_spill] sm:$0xff] }
 0x755   :  { %5628 = vmatprep.subr.bf16.mxu0 %v8383_v24  ;;  %5660 = vmatprep.subr.bf16.mxu1 %v8384_v22  ;;  %v8391_v22 = vld [vmem:[#allocation107_spill] sm:$0xff] }
 0x758   :  { %5630 = vmatpush1.bf16.msra.mxu0 %v8385_v53  ;;  %5662 = vmatpush1.bf16.msra.mxu1 %v8386_v46 }
 0x759   :  { %5664 = vmatprep.subr.bf16.mxu0 %v8387_v29  ;;  %5696 = vmatprep.subr.bf16.mxu1 %v8388_v42  ;;  %v8392_v29 = vld [vmem:[#allocation108_spill] sm:$0xff]  ;;  %v8393_v42 = vld [vmem:[#allocation111_spill] sm:$0xff] }
 0x7ee   :  { %v3207_v14 = vpop.f32.mrb[22].mxu0  ;;  %v3278_v41 = vpop.f32.mrb[22].mxu1 }
 0x7ef   :  { %v3283_v39 = vadd.f32 %v3207_v14, %v8390_v37  ;;  %v3209_v24 = vpop.f32.mrb[23].mxu0  ;;  %v3280_v28 = vpop.f32.mrb[23].mxu1  ;;  %v3285_v46 = vadd.f32 %v3278_v41, %v8392_v29 }
 0x7f0   :  { %v3284_v3 = vadd.f32 %v3209_v24, %v8391_v22  ;;  %v3286_v63 = vadd.f32 %v3280_v28, %v8393_v42  ;;  %v3313_v37 = vpop.permute.xlu1 %3312 }
 0x7f1   :  { %v4365_v53 = vmul.f32 -1.442695, %v3283_v39  ;;  %v4367_v30 = vmul.f32 -1.442695, %v3285_v46  ;;  %v3315_v24 = vmul.f32 %v3313_v37, %v8394_v20  ;;  %v3317_v20 = vmul.f32 %v3313_v37, %v8123_v18 }
 0x7f2   :  { %v4366_v55 = vmul.f32 -1.442695, %v3284_v3  ;;  %v8395_v3 = vld [vmem:[#allocation110_spill] sm:$0xff] }
 0x7f3   :  { %6151 = vpow2.f32 %v4365_v53  ;;  %v3316_v53 = vmul.f32 %v3313_v37, %v8395_v3  ;;  %v3319_v28 = vadd.f32 %v3315_v24, %v8053_v25 }
 0x7f4   :  { %6153 = vpow2.f32 %v4366_v55 }
 0x7f5   :  { %6155 = vtanh.f32 %v3286_v63  ;;  %v3320_v63 = vadd.f32 %v3316_v53, %v8054_v5 }
 0x7f6   :  { %6157 = vpow2.f32 %v4367_v30 }
 0x7fd   :  { %v6152_v54 = vpop.eup %6151 }
 0x7fe   :  { %v3296_v33 = vadd.f32 1.0, %v6152_v54  ;;  %v6154_v60 = vpop.eup %6153 }
 0x7ff   :  { %v3297_v14 = vadd.f32 1.0, %v6154_v60  ;;  %v6156_v39 = vpop.eup %6155 }
 0x800   :  { %6159 = vrcp.f32 %v3296_v33  ;;  %v6158_v55 = vpop.eup %6157 }
 0x801   :  { %6161 = vrcp.f32 %v3297_v14  ;;  %v3298_v42 = vadd.f32 1.0, %v6158_v55 }
 0x803   :  { %6163 = vrcp.f32 %v3298_v42 }
 0x80a   :  { %v6160_v22 = vpop.eup %6159 }
 0x80b   :  { %v3307_v41 = vmul.f32 %v6160_v22, %v6156_v39  ;;  %v6162_v46 = vpop.eup %6161  ;;  %v3318_v39 = vmul.f32 %v3313_v37, %v6798_v0 }
 0x80c   :  { %v3306_v30 = vmul.f32 %v6162_v46, %v7397_v2  ;;  %v3321_v2 = vadd.f32 %v3317_v20, %v6794_v32 }
 0x80d   :  { %v3322_v53 = vadd.f32 %v3318_v39, %v6802_v8 }
 0x80e   :  { %v3389_v33 = vpop.f32.mrb[24].mxu0  ;;  %v3460_v54 = vpop.f32.mrb[24].mxu1  ;;  %v7520_v60 = vadd.f32 %v3307_v41, %v3306_v30 }
 0x80f   :  { %v3465_v14 = vadd.f32 %v3389_v33, %v3319_v28  ;;  %v3391_v29 = vpop.f32.mrb[25].mxu0  ;;  %v3462_v3 = vpop.f32.mrb[25].mxu1  ;;  %v3467_v55 = vadd.f32 %v3460_v54, %v3321_v2 }
 0x810   :  { %v3466_v59 = vadd.f32 %v3391_v29, %v3320_v63  ;;  %6165 = vtanh.f32 %v7520_v60  ;;  %v6164_v41 = vpop.eup %6163  ;;  %v3468_v28 = vadd.f32 %v3462_v3, %v3322_v53 }
 0x811   :  { %v4368_v22 = vmul.f32 -1.442695, %v3465_v14  ;;  %v4370_v30 = vmul.f32 -1.442695, %v3467_v55  ;;  %v8396_v55 = vld [vmem:[#allocation15_spill] sm:$0xff] }
 0x812   :  { %v4369_v24 = vmul.f32 -1.442695, %v3466_v59 }
 0x813   :  { %6167 = vpow2.f32 %v4368_v22 }
 0x814   :  { %6169 = vpow2.f32 %v4369_v24 }
 0x815   :  { %6171 = vtanh.f32 %v3468_v28  ;;  %v8400_v28 = vld [vmem:[#allocation19_spill] sm:$0xff] }
 0x816   :  { %6173 = vpow2.f32 %v4370_v30  ;;  %v8405_v30 = vld [vmem:[#allocation24_spill] sm:$0xff] }
 0x81a   :  { %v6166_v46 = vpop.eup %6165 }
 0x81b   :  { %v3310_v33 = vmul.f32 %v6166_v46, %v6164_v41  ;;  %v8397_v41 = vld [vmem:[#allocation16_spill] sm:$0xff] }
 0x81c   :  { %v8401_v46 = vld [vmem:[#allocation20_spill] sm:$0xff] }
 0x81d   :  { %v6168_v42 = vpop.eup %6167  ;;  %3558 = vmatmul.mubr.f32.vlgmr.msra.gmra.mrb[26].mxu0 %v3310_v33  ;;  %3629 = vmatmul.mubr.f32.vlgmr.msra.gmra.mrb[26].mxu1 %v3310_v33  ;;  %v8406_v33 = vld [vmem:[#allocation25_spill] sm:$0xff] }
 0x81e   :  { %v3478_v29 = vadd.f32 1.0, %v6168_v42  ;;  %v6170_v59 = vpop.eup %6169  ;;  %5666 = vmatpush1.bf16.msra.mxu0 %v8056_v17  ;;  %5698 = vmatpush1.bf16.msra.mxu1 %v8057_v6  ;;  %v8407_v42 = vld [vmem:[#allocation26_spill] sm:$0xff] }
 0x81f   :  { %v3479_v20 = vadd.f32 1.0, %v6170_v59  ;;  %5668 = vmatprep.subr.bf16.mxu0 %v8058_v52  ;;  %5700 = vmatprep.subr.bf16.mxu1 %v8059_v35  ;;  %v6172_v37 = vpop.eup %6171  ;;  %v8409_v59 = vld [vmem:[#allocation28_spill] sm:$0xff] }
 0x820   :  { %6175 = vrcp.f32 %v3478_v29  ;;  %3699 = vmatprep.mubr.f32.mxu0 %v7981_v36  ;;  %3770 = vmatprep.mubr.f32.mxu1 %v7981_v36  ;;  %v6174_v3 = vpop.eup %6173  ;;  %v8408_v29 = vld [vmem:[#allocation27_spill] sm:$0xff] }
 0x821   :  { %6177 = vrcp.f32 %v3479_v20  ;;  %v3480_v22 = vadd.f32 1.0, %v6174_v3  ;;  %v8410_v20 = vld [vmem:[#allocation29_spill] sm:$0xff]  ;;  %v8412_v3 = vld [vmem:[#allocation31_spill] sm:$0xff] }
 0x822   :  { %5670 = vmatpush1.bf16.msra.mxu0 %v8060_v43  ;;  %5702 = vmatpush1.bf16.msra.mxu1 %v8061_v45 }
 0x823   :  { %5672 = vmatprep.subr.bf16.mxu0 %v8124_v49  ;;  %5704 = vmatprep.subr.bf16.mxu1 %v8125_v58  ;;  %6179 = vrcp.f32 %v3480_v22  ;;  %v8416_v22 = vld [vmem:[#allocation36_spill] sm:$0xff] }
 0x826   :  { %5674 = vmatpush1.bf16.msra.mxu0 %v8126_v23  ;;  %5706 = vmatpush1.bf16.msra.mxu1 %v8127_v16 }
 0x827   :  { %5676 = vmatprep.subr.bf16.mxu0 %v8128_v40  ;;  %5708 = vmatprep.subr.bf16.mxu1 %v8129_v47 }
 0x82a   :  { %v6176_v63 = vpop.eup %6175  ;;  %5678 = vmatpush1.bf16.msra.mxu0 %v8068_v48  ;;  %5710 = vmatpush1.bf16.msra.mxu1 %v8069_v44 }
 0x82b   :  { %v3489_v54 = vmul.f32 %v6176_v63, %v6172_v37  ;;  %v6178_v14 = vpop.eup %6177  ;;  %5680 = vmatprep.subr.bf16.mxu0 %v8130_v27  ;;  %5712 = vmatprep.subr.bf16.mxu1 %v8131_v13  ;;  %v8411_v37 = vld [vmem:[#allocation30_spill] sm:$0xff]  ;;  %v8413_v63 = vld [vmem:[#allocation32_spill] sm:$0xff] }
 0x82c   :  { %v3488_v24 = vmul.f32 %v6178_v14, %v7423_v56  ;;  %v8415_v14 = vld [vmem:[#allocation34_spill] sm:$0xff] }
 0x82d   :  { %v6180_v56 = vpop.eup %6179 }
 0x82e   :  { %v7546_v39 = vadd.f32 %v3489_v54, %v3488_v24  ;;  %5682 = vmatpush1.bf16.msra.mxu0 %v8132_v38  ;;  %5714 = vmatpush1.bf16.msra.mxu1 %v8133_v9  ;;  %v8414_v54 = vld [vmem:[#allocation33_spill] sm:$0xff] }
 0x82f   :  { %5684 = vmatprep.subr.bf16.mxu0 %v8134_v4  ;;  %5716 = vmatprep.subr.bf16.mxu1 %v8135_v26  ;;  %v8417_v24 = vld [vmem:[#allocation37_spill] sm:$0xff] }
 0x830   :  { %6181 = vtanh.f32 %v7546_v39 }
 0x832   :  { %5686 = vmatpush1.bf16.msra.mxu0 %v8136_v57  ;;  %5718 = vmatpush1.bf16.msra.mxu1 %v8137_v51 }
 0x833   :  { %5688 = vmatprep.subr.bf16.mxu0 %v8138_v10  ;;  %5720 = vmatprep.subr.bf16.mxu1 %v8079_v21 }
 0x836   :  { %5690 = vmatpush1.bf16.msra.mxu0 %v8080_v62  ;;  %5722 = vmatpush1.bf16.msra.mxu1 %v8081_v50 }
 0x837   :  { %5692 = vmatprep.subr.bf16.mxu0 %v8082_v34  ;;  %5724 = vmatprep.subr.bf16.mxu1 %v8083_v12 }
 0x83a   :  { %v6182_v2 = vpop.eup %6181  ;;  %5694 = vmatpush1.bf16.msra.mxu0 %v8084_v61  ;;  %5726 = vmatpush1.bf16.msra.mxu1 %v8085_v1 }
 0x83b   :  { %5728 = vmatprep.subr.bf16.mxu0 %v8086_v7  ;;  %5760 = vmatprep.subr.bf16.mxu1 %v8087_v31  ;;  %v3492_v53 = vmul.f32 %v6182_v2, %v6180_v56  ;;  %v8398_v7 = vld [vmem:[#allocation17_spill] sm:$0xff]  ;;  %v8399_v31 = vld [vmem:[#allocation18_spill] sm:$0xff]  ;;  %v8419_v2 = vld [vmem:[#allocation39_spill] sm:$0xff] }
 0x83c   :  { %v8418_v56 = vld [vmem:[#allocation38_spill] sm:$0xff] }
 0x83d   :  { %3700 = vmatmul.mubr.f32.vlgmr.msra.gmra.mrb[26].mxu0 %v3492_v53  ;;  %3771 = vmatmul.mubr.f32.vlgmr.msra.gmra.mrb[26].mxu1 %v3492_v53 }
 0x83e   :  { %5730 = vmatpush1.bf16.msra.mxu0 %v6462_v11  ;;  %5762 = vmatpush1.bf16.msra.mxu1 %v6465_v15  ;;  %v8402_v11 = vld [vmem:[#allocation21_spill] sm:$0xff]  ;;  %v8403_v15 = vld [vmem:[#allocation22_spill] sm:$0xff] }
 0x83f   :  { %5732 = vmatprep.subr.bf16.mxu0 %v6469_v19  ;;  %5764 = vmatprep.subr.bf16.mxu1 %v8396_v55  ;;  %v8404_v19 = vld [vmem:[#allocation23_spill] sm:$0xff]  ;;  %v8420_v55 = vld [vmem:[#allocation40_spill] sm:$0xff] }
 0x840   :  { %3881 = vmatprep.mubr.f32.mxu0 %v7981_v36  ;;  %3952 = vmatprep.mubr.f32.mxu1 %v7981_v36 }
 0x842   :  { %5734 = vmatpush1.bf16.msra.mxu0 %v8397_v41  ;;  %5766 = vmatpush1.bf16.msra.mxu1 %v8398_v7  ;;  %v8421_v41 = vld [vmem:[#allocation41_spill] sm:$0xff]  ;;  %v8422_v7 = vld [vmem:[#allocation42_spill] sm:$0xff] }
 0x843   :  { %5736 = vmatprep.subr.bf16.mxu0 %v8399_v31  ;;  %5768 = vmatprep.subr.bf16.mxu1 %v8400_v28  ;;  %v8423_v31 = vld [vmem:[#allocation43_spill] sm:$0xff]  ;;  %v8424_v28 = vld [vmem:[#allocation44_spill] sm:$0xff] }
 0x846   :  { %5738 = vmatpush1.bf16.msra.mxu0 %v8401_v46  ;;  %5770 = vmatpush1.bf16.msra.mxu1 %v8402_v11  ;;  %v8425_v46 = vld [vmem:[#allocation45_spill] sm:$0xff]  ;;  %v8426_v11 = vld [vmem:[#allocation46_spill] sm:$0xff] }
 0x847   :  { %5740 = vmatprep.subr.bf16.mxu0 %v8403_v15  ;;  %5772 = vmatprep.subr.bf16.mxu1 %v8404_v19  ;;  %v8427_v15 = vld [vmem:[#allocation47_spill] sm:$0xff]  ;;  %v8428_v19 = vld [vmem:[#allocation48_spill] sm:$0xff] }
 0x84a   :  { %5742 = vmatpush1.bf16.msra.mxu0 %v8405_v30  ;;  %5774 = vmatpush1.bf16.msra.mxu1 %v8406_v33  ;;  %v8429_v30 = vld [vmem:[#allocation49_spill] sm:$0xff]  ;;  %v8430_v33 = vld [vmem:[#allocation50_spill] sm:$0xff] }
 0x84b   :  { %5744 = vmatprep.subr.bf16.mxu0 %v8407_v42  ;;  %5776 = vmatprep.subr.bf16.mxu1 %v8408_v29  ;;  %v8431_v42 = vld [vmem:[#allocation51_spill] sm:$0xff]  ;;  %v8432_v29 = vld [vmem:[#allocation52_spill] sm:$0xff] }
 0x84e   :  { %5746 = vmatpush1.bf16.msra.mxu0 %v8409_v59  ;;  %5778 = vmatpush1.bf16.msra.mxu1 %v8410_v20  ;;  %v8434_v59 = vld [vmem:[#allocation54_spill] sm:$0xff]  ;;  %v8435_v20 = vld [vmem:[#allocation55_spill] sm:$0xff] }
 0x84f   :  { %5748 = vmatprep.subr.bf16.mxu0 %v8411_v37  ;;  %5780 = vmatprep.subr.bf16.mxu1 %v8412_v3  ;;  %v8436_v37 = vld [vmem:[#allocation56_spill] sm:$0xff]  ;;  %v8437_v3 = vld [vmem:[#allocation57_spill] sm:$0xff] }
 0x852   :  { %5750 = vmatpush1.bf16.msra.mxu0 %v8413_v63  ;;  %5782 = vmatpush1.bf16.msra.mxu1 %v8414_v54  ;;  %v8438_v63 = vld [vmem:[#allocation58_spill] sm:$0xff]  ;;  %v8439_v54 = vld [vmem:[#allocation59_spill] sm:$0xff] }
 0x853   :  { %5752 = vmatprep.subr.bf16.mxu0 %v8415_v14  ;;  %5784 = vmatprep.subr.bf16.mxu1 %v8416_v22  ;;  %v8440_v14 = vld [vmem:[#allocation60_spill] sm:$0xff]  ;;  %v8441_v22 = vld [vmem:[#allocation61_spill] sm:$0xff] }
 0x856   :  { %5754 = vmatpush1.bf16.msra.mxu0 %v8417_v24  ;;  %5786 = vmatpush1.bf16.msra.mxu1 %v8418_v56  ;;  %v8442_v24 = vld [vmem:[#allocation62_spill] sm:$0xff]  ;;  %v8443_v56 = vld [vmem:[#allocation63_spill] sm:$0xff] }
 0x857   :  { %5756 = vmatprep.subr.bf16.mxu0 %v8419_v2  ;;  %5788 = vmatprep.subr.bf16.mxu1 %v8420_v55  ;;  %v8444_v2 = vld [vmem:[#allocation64_spill] sm:$0xff]  ;;  %v8445_v55 = vld [vmem:[#allocation65_spill] sm:$0xff] }
 0x85a   :  { %5758 = vmatpush1.bf16.msra.mxu0 %v8421_v41  ;;  %5790 = vmatpush1.bf16.msra.mxu1 %v8422_v7  ;;  %v8446_v41 = vld [vmem:[#allocation66_spill] sm:$0xff]  ;;  %v8447_v7 = vld [vmem:[#allocation67_spill] sm:$0xff] }
 0x85b   :  { %5792 = vmatprep.subr.bf16.mxu0 %v8423_v31  ;;  %5824 = vmatprep.subr.bf16.mxu1 %v8424_v28  ;;  %v8448_v31 = vld [vmem:[#allocation68_spill] sm:$0xff]  ;;  %v8449_v28 = vld [vmem:[#allocation69_spill] sm:$0xff] }
 0x85d   :  { %3882 = vmatmul.mubr.f32.vlgmr.msra.gmra.mrb[28].mxu0 %v3492_v53  ;;  %3953 = vmatmul.mubr.f32.vlgmr.msra.gmra.mrb[28].mxu1 %v3492_v53  ;;  %v8433_v53 = vld [vmem:[#allocation53_spill] sm:$0xff] }
 0x85e   :  { %5794 = vmatpush1.bf16.msra.mxu0 %v8425_v46  ;;  %5826 = vmatpush1.bf16.msra.mxu1 %v8426_v11  ;;  %v8450_v46 = vld [vmem:[#allocation70_spill] sm:$0xff]  ;;  %v8451_v11 = vld [vmem:[#allocation71_spill] sm:$0xff] }
 0x85f   :  { %5796 = vmatprep.subr.bf16.mxu0 %v8427_v15  ;;  %5828 = vmatprep.subr.bf16.mxu1 %v8428_v19  ;;  %v8452_v15 = vld [vmem:[#allocation72_spill] sm:$0xff]  ;;  %v8453_v19 = vld [vmem:[#allocation73_spill] sm:$0xff] }
 0x860   :  { %4051 = vmatprep.mubr.f32.mxu0 %v7981_v36  ;;  %4122 = vmatprep.mubr.f32.mxu1 %v7981_v36 }
 0x862   :  { %5798 = vmatpush1.bf16.msra.mxu0 %v8429_v30  ;;  %5830 = vmatpush1.bf16.msra.mxu1 %v8430_v33  ;;  %v8454_v30 = vld [vmem:[#allocation74_spill] sm:$0xff]  ;;  %v8455_v33 = vld [vmem:[#allocation75_spill] sm:$0xff] }
 0x863   :  { %5800 = vmatprep.subr.bf16.mxu0 %v8431_v42  ;;  %5832 = vmatprep.subr.bf16.mxu1 %v8432_v29  ;;  %v8456_v42 = vld [vmem:[#allocation76_spill] sm:$0xff] }
 0x866   :  { %5802 = vmatpush1.bf16.msra.mxu0 %v8433_v53  ;;  %5834 = vmatpush1.bf16.msra.mxu1 %v8434_v59  ;;  %v8457_v59 = vld [vmem:[#allocation35_spill] sm:$0xff] }
 0x867   :  { %5804 = vmatprep.subr.bf16.mxu0 %v8435_v20  ;;  %5836 = vmatprep.subr.bf16.mxu1 %v8436_v37 }
 0x86a   :  { %5806 = vmatpush1.bf16.msra.mxu0 %v8437_v3  ;;  %5838 = vmatpush1.bf16.msra.mxu1 %v8438_v63  ;;  %v8458_v63 = vld [vmem:[#allocation107_spill] sm:$0xff] }
 0x86b   :  { %5808 = vmatprep.subr.bf16.mxu0 %v8439_v54  ;;  %5840 = vmatprep.subr.bf16.mxu1 %v8440_v14 }
 0x86e   :  { %5810 = vmatpush1.bf16.msra.mxu0 %v8441_v22  ;;  %5842 = vmatpush1.bf16.msra.mxu1 %v8442_v24  ;;  %v8459_v24 = vld [vmem:[#allocation108_spill] sm:$0xff] }
 0x86f   :  { %5812 = vmatprep.subr.bf16.mxu0 %v8443_v56  ;;  %5844 = vmatprep.subr.bf16.mxu1 %v8444_v2  ;;  %v8460_v2 = vld [vmem:[#allocation111_spill] sm:$0xff] }
 0x872   :  { %5814 = vmatpush1.bf16.msra.mxu0 %v8445_v55  ;;  %5846 = vmatpush1.bf16.msra.mxu1 %v8446_v41 }
 0x873   :  { %5816 = vmatprep.subr.bf16.mxu0 %v8447_v7  ;;  %5848 = vmatprep.subr.bf16.mxu1 %v8448_v31 }
 0x876   :  { %5818 = vmatpush1.bf16.msra.mxu0 %v8449_v28  ;;  %5850 = vmatpush1.bf16.msra.mxu1 %v8450_v46 }
 0x877   :  { %5820 = vmatprep.subr.bf16.mxu0 %v8451_v11  ;;  %5852 = vmatprep.subr.bf16.mxu1 %v8452_v15  ;;  %v3807_v11 = vpop.permute.xlu1 %3806  ;;  %v8461_v15 = vld [vmem:[#allocation109_spill] sm:$0xff] }
 0x87a   :  { %5822 = vmatpush1.bf16.msra.mxu0 %v8453_v19  ;;  %5854 = vmatpush1.bf16.msra.mxu1 %v8454_v30  ;;  %v3809_v19 = vmul.f32 %v3807_v11, %v8461_v15 }
 0x87b   :  { %5856 = vmatprep.subr.bf16.mxu0 %v8455_v33  ;;  %5888 = vmatprep.subr.bf16.mxu1 %v8456_v42  ;;  %v8462_v33 = vld [vmem:[#allocation110_spill] sm:$0xff] }
 0x87c   :  { %v3810_v42 = vmul.f32 %v3807_v11, %v8462_v33 }
 0x910   :  { %v3701_v29 = vpop.f32.mrb[26].mxu0  ;;  %v3772_v53 = vpop.f32.mrb[26].mxu1 }
 0x911   :  { %v3777_v20 = vadd.f32 %v3701_v29, %v8457_v59  ;;  %v3703_v37 = vpop.f32.mrb[27].mxu0  ;;  %v3774_v3 = vpop.f32.mrb[27].mxu1  ;;  %v3779_v56 = vadd.f32 %v3772_v53, %v8459_v24 }
 0x912   :  { %v3778_v54 = vadd.f32 %v3703_v37, %v8458_v63  ;;  %v3780_v55 = vadd.f32 %v3774_v3, %v8460_v2  ;;  %v3813_v37 = vadd.f32 %v3809_v19, %v8053_v25  ;;  %v3812_v19 = vmul.f32 %v3807_v11, %v6798_v0 }
 0x913   :  { %v4371_v14 = vmul.f32 -1.442695, %v3777_v20  ;;  %v4373_v41 = vmul.f32 -1.442695, %v3779_v56 }
 0x914   :  { %v4372_v22 = vmul.f32 -1.442695, %v3778_v54 }
 0x915   :  { %6183 = vpow2.f32 %v4371_v14  ;;  %v3814_v14 = vadd.f32 %v3810_v42, %v8054_v5 }
 0x916   :  { %6185 = vpow2.f32 %v4372_v22 }
 0x917   :  { %6187 = vtanh.f32 %v3780_v55 }
 0x918   :  { %6189 = vpow2.f32 %v4373_v41 }
 0x91f   :  { %v6184_v7 = vpop.eup %6183 }
 0x920   :  { %v3790_v31 = vadd.f32 1.0, %v6184_v7  ;;  %v6186_v28 = vpop.eup %6185  ;;  %v3811_v7 = vmul.f32 %v3807_v11, %v8123_v18 }
 0x921   :  { %v3791_v46 = vadd.f32 1.0, %v6186_v28  ;;  %v6188_v30 = vpop.eup %6187 }
 0x922   :  { %6191 = vrcp.f32 %v3790_v31  ;;  %v6190_v29 = vpop.eup %6189  ;;  %v3815_v5 = vadd.f32 %v3811_v7, %v6794_v32 }
 0x923   :  { %6193 = vrcp.f32 %v3791_v46  ;;  %v3792_v54 = vadd.f32 1.0, %v6190_v29 }
 0x925   :  { %6195 = vrcp.f32 %v3792_v54 }
 0x92c   :  { %v6192_v20 = vpop.eup %6191 }
 0x92d   :  { %v3801_v53 = vmul.f32 %v6192_v20, %v6188_v30  ;;  %v6194_v3 = vpop.eup %6193 }
 0x92e   :  { %v3800_v22 = vmul.f32 %v6194_v3, %v7520_v60  ;;  %v3816_v60 = vadd.f32 %v3812_v19, %v6802_v8 }
 0x92f   :  { %v6196_v42 = vpop.eup %6195 }
 0x930   :  { %v3883_v56 = vpop.f32.mrb[28].mxu0  ;;  %v3954_v55 = vpop.f32.mrb[28].mxu1  ;;  %v7642_v41 = vadd.f32 %v3801_v53, %v3800_v22 }
 0x931   :  { %v3959_v31 = vadd.f32 %v3883_v56, %v3813_v37  ;;  %v3885_v28 = vpop.f32.mrb[29].mxu0  ;;  %v3956_v46 = vpop.f32.mrb[29].mxu1  ;;  %v3961_v33 = vadd.f32 %v3954_v55, %v3815_v5 }
 0x932   :  { %v3960_v15 = vadd.f32 %v3885_v28, %v3814_v14  ;;  %6197 = vtanh.f32 %v7642_v41  ;;  %v3962_v18 = vadd.f32 %v3956_v46, %v3816_v60  ;;  %v4381_v14 = vld [vmem:[#allocation2] ss:$0 sm:$0xff] }
 0x933   :  { %v4374_v25 = vmul.f32 -1.442695, %v3959_v31  ;;  %v4376_v20 = vmul.f32 -1.442695, %v3961_v33 }
 0x934   :  { %v4375_v30 = vmul.f32 -1.442695, %v3960_v15 }
 0x935   :  { %6199 = vpow2.f32 %v4374_v25 }
 0x936   :  { %6201 = vpow2.f32 %v4375_v30 }
 0x937   :  { %6203 = vtanh.f32 %v3962_v18 }
 0x938   :  { %6205 = vpow2.f32 %v4376_v20 }
 0x93c   :  { %v6198_v29 = vpop.eup %6197 }
 0x93d   :  { %v3804_v53 = vmul.f32 %v6198_v29, %v6196_v42 }
 0x93f   :  { %v6200_v37 = vpop.eup %6199  ;;  %4052 = vmatmul.mubr.f32.vlgmr.msra.gmra.mrb[30].mxu0 %v3804_v53  ;;  %4123 = vmatmul.mubr.f32.vlgmr.msra.gmra.mrb[30].mxu1 %v3804_v53 }
 0x940   :  { %v3972_v3 = vadd.f32 1.0, %v6200_v37  ;;  %v6202_v54 = vpop.eup %6201  ;;  %5858 = vmatpush1.bf16.msra.mxu0 %v8056_v17  ;;  %5890 = vmatpush1.bf16.msra.mxu1 %v8057_v6 }
 0x941   :  { %v3973_v32 = vadd.f32 1.0, %v6202_v54  ;;  %5860 = vmatprep.subr.bf16.mxu0 %v8058_v52  ;;  %5892 = vmatprep.subr.bf16.mxu1 %v8059_v35  ;;  %v6204_v0 = vpop.eup %6203 }
 0x942   :  { %6207 = vrcp.f32 %v3972_v3  ;;  %4193 = vmatprep.mubr.f32.mxu0 %v7981_v36  ;;  %4264 = vmatprep.mubr.f32.mxu1 %v7981_v36  ;;  %v6206_v8 = vpop.eup %6205 }
 0x943   :  { %6209 = vrcp.f32 %v3973_v32  ;;  %v3974_v52 = vadd.f32 1.0, %v6206_v8 }
 0x944   :  { %5862 = vmatpush1.bf16.msra.mxu0 %v8060_v43  ;;  %5894 = vmatpush1.bf16.msra.mxu1 %v8061_v45 }
 0x945   :  { %5864 = vmatprep.subr.bf16.mxu0 %v8124_v49  ;;  %5896 = vmatprep.subr.bf16.mxu1 %v8125_v58  ;;  %6211 = vrcp.f32 %v3974_v52 }
 0x948   :  { %5866 = vmatpush1.bf16.msra.mxu0 %v8126_v23  ;;  %5898 = vmatpush1.bf16.msra.mxu1 %v8127_v16 }
 0x949   :  { %5868 = vmatprep.subr.bf16.mxu0 %v8128_v40  ;;  %5900 = vmatprep.subr.bf16.mxu1 %v8129_v47 }
 0x94c   :  { %v6208_v36 = vpop.eup %6207  ;;  %5870 = vmatpush1.bf16.msra.mxu0 %v8068_v48  ;;  %5902 = vmatpush1.bf16.msra.mxu1 %v8069_v44 }
 0x94d   :  { %v3983_v17 = vmul.f32 %v6208_v36, %v6204_v0  ;;  %v6210_v6 = vpop.eup %6209  ;;  %5872 = vmatprep.subr.bf16.mxu0 %v8130_v27  ;;  %5904 = vmatprep.subr.bf16.mxu1 %v8131_v13 }
 0x94e   :  { %v3982_v35 = vmul.f32 %v6210_v6, %v7546_v39 }
 0x94f   :  { %v6212_v45 = vpop.eup %6211 }
 0x950   :  { %v3984_v43 = vadd.f32 %v3983_v17, %v3982_v35  ;;  %5874 = vmatpush1.bf16.msra.mxu0 %v8132_v38  ;;  %5906 = vmatpush1.bf16.msra.mxu1 %v8133_v9 }
 0x951   :  { %5876 = vmatprep.subr.bf16.mxu0 %v8134_v4  ;;  %5908 = vmatprep.subr.bf16.mxu1 %v8135_v26 }
 0x952   :  { %6213 = vtanh.f32 %v3984_v43 }
 0x954   :  { %5878 = vmatpush1.bf16.msra.mxu0 %v8136_v57  ;;  %5910 = vmatpush1.bf16.msra.mxu1 %v8137_v51 }
 0x955   :  { %5880 = vmatprep.subr.bf16.mxu0 %v8138_v10  ;;  %5912 = vmatprep.subr.bf16.mxu1 %v8079_v21 }
 0x958   :  { %5882 = vmatpush1.bf16.msra.mxu0 %v8080_v62  ;;  %5914 = vmatpush1.bf16.msra.mxu1 %v8081_v50 }
 0x959   :  { %5884 = vmatprep.subr.bf16.mxu0 %v8082_v34  ;;  %5916 = vmatprep.subr.bf16.mxu1 %v8083_v12 }
 0x95c   :  { %v6214_v48 = vpop.eup %6213  ;;  %5886 = vmatpush1.bf16.msra.mxu0 %v8084_v61  ;;  %5918 = vmatpush1.bf16.msra.mxu1 %v8085_v1 }
 0x95d   :  { %v3986_v44 = vmul.f32 %v6214_v48, %v6212_v45 }
 0x95f   :  { %4194 = vmatmul.mubr.f32.vlgmr.msra.gmra.mrb[30].mxu0 %v3986_v44  ;;  %4265 = vmatmul.mubr.f32.vlgmr.msra.gmra.mrb[30].mxu1 %v3986_v44 }
 0xa32   :  { %v4195_v49 = vpop.f32.mrb[30].mxu0  ;;  %v4266_v58 = vpop.f32.mrb[30].mxu1 }
 0xa33   :  { %v4271_v21 = vadd.f32 %v4195_v49, %v8457_v59  ;;  %v4197_v62 = vpop.f32.mrb[31].mxu0  ;;  %v4268_v23 = vpop.f32.mrb[31].mxu1  ;;  %v4273_v12 = vadd.f32 %v4266_v58, %v8459_v24  ;;  %v4380_v24 = vld [vmem:[%s7700_s7] ss:$0 sm:$0xff] }
 0xa34   :  { %v4272_v50 = vadd.f32 %v4197_v62, %v8458_v63  ;;  %v4274_v61 = vadd.f32 %v4268_v23, %v8460_v2 }
 0xa35   :  { %v4377_v34 = vmul.f32 -1.442695, %v4271_v21  ;;  %v4379_v1 = vmul.f32 -1.442695, %v4273_v12 }
 0xa36   :  { %v4378_v16 = vmul.f32 -1.442695, %v4272_v50 }
 0xa37   :  { %6215 = vpow2.f32 %v4377_v34 }
 0xa38   :  { %6217 = vpow2.f32 %v4378_v16 }
 0xa39   :  { %6219 = vtanh.f32 %v4274_v61 }
 0xa3a   :  { %6221 = vpow2.f32 %v4379_v1 }
 0xa41   :  { %v6216_v40 = vpop.eup %6215 }
 0xa42   :  { %v4284_v47 = vadd.f32 1.0, %v6216_v40  ;;  %v6218_v27 = vpop.eup %6217 }
 0xa43   :  { %v4285_v13 = vadd.f32 1.0, %v6218_v27  ;;  %v6220_v38 = vpop.eup %6219 }
 0xa44   :  { %6223 = vrcp.f32 %v4284_v47  ;;  %v6222_v9 = vpop.eup %6221 }
 0xa45   :  { %6225 = vrcp.f32 %v4285_v13  ;;  %v4286_v51 = vadd.f32 1.0, %v6222_v9 }
 0xa47   :  { %6227 = vrcp.f32 %v4286_v51 }
 0xa4e   :  { %v6224_v4 = vpop.eup %6223 }
 0xa4f   :  { %v4295_v26 = vmul.f32 %v6224_v4, %v6220_v38  ;;  %v6226_v57 = vpop.eup %6225 }
 0xa50   :  { %v4294_v10 = vmul.f32 %v6226_v57, %v7642_v41 }
 0xa51   :  { %v6228_v59 = vpop.eup %6227 }
 0xa52   :  { %v4296_v39 = vadd.f32 %v4295_v26, %v4294_v10 }
 0xa54   :  { %6229 = vtanh.f32 %v4296_v39 }
 0xa5e   :  { %v6230_v63 = vpop.eup %6229 }
 0xa5f   :  { %v4298_v2 = vmul.f32 %v6230_v63, %v6228_v59 }
 0xa61   :  { %v4306_v11 = vmul.f32 %v4380_v24, %v4298_v2 }
 0xa63   :  { %4307 = vadd.xlane.f32.xlu0 %v4306_v11 }
 0xaf0   :  { %v4308_v22 = vpop.xlane.xlu0 %4307 }
 0xaf1   :  { %v4316_v56 = vadd.f32 %v4381_v14, %v4308_v22 }
 0xaf3   :  { %v4382_v55 = vmul.f32 -1.442695, %v4316_v56 }
 0xaf5   :  { %6231 = vpow2.f32 %v4382_v55 }
 0xaff   :  { %v6232_v7 = vpop.eup %6231 }
 0xb00   :  { %v4320_v31 = vadd.f32 1.0, %v6232_v7 }
 0xb02   :  { %6233 = vrcp.f32 %v4320_v31 }
 0xb0c   :  { %v6234_v41 = vpop.eup %6233 }
 0xb0d   :  { %4324 = vst.msk [vmem:[%s7702_s9] sm:$0xff] %vm4323_vm0, %v6234_v41 }
 0xb0e   :  { %4329 = vsyncpa [#allocation4], 1 }
 0xb0f   :  { %4330 = vsyncpa [#allocation6], 1 }
 0xb10   :  { %4331 = vsyncpa [#allocation9], 1 }

</bundles_post_ra>
